<compile_context>
chip_gen: v6e
topology: v6e:2x2x1
jax: 0.10.0
libtpu: 0.0.40
codegen_flags: <defaults>
</compile_context>

<pallas_src>
import functools

import jax
import jax.numpy as jnp
from jax.experimental import pallas as pl
from jax.experimental.pallas import tpu as pltpu


def _round_up(x, m):
    return (x + m - 1) // m * m


# ----------------------------------------------------------------------------
# Pallas kernel:  out = act(A @ B + bias)   (single pass, full K / full N tile)
# ----------------------------------------------------------------------------
def _matmul_bias_act_kernel(a_ref, b_ref, bias_ref, o_ref, *, act):
    acc = jnp.dot(a_ref[...], b_ref[...], preferred_element_type=jnp.float32)
    acc = acc + bias_ref[...]
    if act == "relu":
        acc = jnp.maximum(acc, 0.0)
    elif act == "tanh":
        acc = jnp.tanh(acc)
    o_ref[...] = acc.astype(o_ref.dtype)


_TM_CAP = 1024  # max rows per grid step (well within VMEM for K <= 3136 bf16)


def matmul_bias_act(a, b, bias, act):
    """act(a @ b + bias) via one fused Pallas TPU kernel.

    a: (M, K), b: (K, N), bias: (N,)  ->  (M, N) float32.
    K and N are kept as full-extent VMEM-resident blocks (no k/j grid axes,
    no zero-padded reduction steps); the grid only tiles M.
    """
    M, K = a.shape
    K2, N = b.shape
    assert K == K2 and bias.shape == (N,)

    Mp = _round_up(M, 8)
    if Mp <= _TM_CAP:
        tm = Mp
    else:
        tm = _TM_CAP
        Mp = _round_up(M, tm)

    # bf16 MXU inputs; f32 accumulation / epilogue inside the kernel.
    a_bf = a.astype(jnp.bfloat16)
    if Mp != M:
        a_bf = jnp.pad(a_bf, ((0, Mp - M), (0, 0)))
    b_bf = b.astype(jnp.bfloat16)
    bias2 = bias.astype(jnp.float32).reshape(1, N)

    out = pl.pallas_call(
        functools.partial(_matmul_bias_act_kernel, act=act),
        out_shape=jax.ShapeDtypeStruct((Mp, N), jnp.float32),
        grid_spec=pltpu.PrefetchScalarGridSpec(
            num_scalar_prefetch=0,
            grid=(Mp // tm,),
            in_specs=[
                pl.BlockSpec((tm, K), lambda i: (i, 0)),   # streamed over M
                pl.BlockSpec((K, N), lambda i: (0, 0)),    # weights, resident
                pl.BlockSpec((1, N), lambda i: (0, 0)),    # bias, resident
            ],
            out_specs=pl.BlockSpec((tm, N), lambda i: (i, 0)),
        ),
        compiler_params=pltpu.CompilerParams(
            dimension_semantics=("parallel",),          # M shards across TCs (v7x)
            vmem_limit_bytes=32 * 1024 * 1024,
        ),
    )(a_bf, b_bf, bias2)

    if Mp != M:
        out = out[:M]
    return out


# ----------------------------------------------------------------------------
# Conv2d (valid padding) lowered to im2col + the fused Pallas matmul kernel
# ----------------------------------------------------------------------------
def conv2d_nhwc(x, w_oihw, bias, stride, act):
    """x: (B,H,W,Cin); w_oihw: (Cout,Cin,KH,KW) (PyTorch Conv2d layout)."""
    B, H, W, Cin = x.shape
    Cout, _, KH, KW = w_oihw.shape
    OH = (H - KH) // stride + 1
    OW = (W - KW) // stride + 1
    # TODO(synk): im2col could be fused into the kernel (k-grid over (kh,kw)
    # with shifted-window BlockSpecs) for large batches; at these sizes the
    # explicit im2col matrix is < 0.5 MB so it is not the bottleneck.
    patches = []
    for i in range(KH):
        for j in range(KW):
            patches.append(
                x[:, i:i + stride * OH:stride, j:j + stride * OW:stride, :])
    p = jnp.stack(patches, axis=3)                       # (B,OH,OW,KH*KW,Cin)
    p = p.reshape(B * OH * OW, KH * KW * Cin)
    w = jnp.transpose(w_oihw, (2, 3, 1, 0)).reshape(KH * KW * Cin, Cout)
    out = matmul_bias_act(p, w, bias, act)
    return out.reshape(B, OH, OW, Cout)


# ----------------------------------------------------------------------------
# Parameters (deterministic synthetic init, PyTorch weight layouts)
# ----------------------------------------------------------------------------
def init_encoder_params(key, channel_in=3, z=64):
    ks = jax.random.split(key, 8)

    def _w(k, shape):
        fan_in = 1
        for d in shape[1:]:
            fan_in *= d
        return jax.random.normal(k, shape, jnp.float32) / jnp.sqrt(float(fan_in))

    def _b(k, n):
        return 0.01 * jax.random.normal(k, (n,), jnp.float32)

    p = {}
    p["conv1_w"] = _w(ks[0], (32, channel_in, 8, 8)); p["conv1_b"] = _b(ks[1], 32)
    p["conv2_w"] = _w(ks[2], (64, 32, 4, 4));         p["conv2_b"] = _b(ks[3], 64)
    p["conv3_w"] = _w(ks[4], (64, 64, 3, 3));         p["conv3_b"] = _b(ks[5], 64)
    p["fc_w"]    = _w(ks[6], (z, 64 * 7 * 7));        p["fc_b"]    = _b(ks[7], z)
    return p


# ----------------------------------------------------------------------------
# Forward pass (mirrors Encoder.forward)
# ----------------------------------------------------------------------------
@jax.jit
def encoder_forward(params, x_nchw):
    x = jnp.transpose(x_nchw, (0, 2, 3, 1)).astype(jnp.float32)   # NCHW -> NHWC

    h = conv2d_nhwc(x, params["conv1_w"], params["conv1_b"], 4, act="relu")
    h = conv2d_nhwc(h, params["conv2_w"], params["conv2_b"], 2, act="relu")
    h = conv2d_nhwc(h, params["conv3_w"], params["conv3_b"], 1, act="relu")

    # nn.Flatten() on NCHW tensors flattens channel-major: (B, C, H, W) -> (B, C*H*W)
    B = h.shape[0]
    h = jnp.transpose(h, (0, 3, 1, 2)).reshape(B, -1)             # (B, 3136)

    # Linear(3136, z) + Tanh, same fused kernel
    out = matmul_bias_act(h, params["fc_w"].T, params["fc_b"], act="tanh")
    return out


if __name__ == "__main__":
    key = jax.random.PRNGKey(0)
    pkey, xkey = jax.random.split(key)
    params = init_encoder_params(pkey, channel_in=3, z=64)

    # nn.Linear(3136, z) implies a 3x84x84 input (84 -> 20 -> 9 -> 7 spatially).
    x = jax.random.normal(xkey, (2, 3, 84, 84), dtype=jnp.float32)

    out = encoder_forward(params, x)
    jax.block_until_ready(out)

    assert out.shape == (2, 64), out.shape
    assert bool(jnp.all(jnp.isfinite(out)))
    assert bool(jnp.all(jnp.abs(out) <= 1.0 + 1e-6))   # tanh range
    print("KERNEL_OK")
</pallas_src>

<mosaic_0001>
module attributes {stable_mosaic.version = 11 : i64} {
  func.func @_matmul_bias_act_kernel(%arg0: i32, %arg1: memref<800x192xbf16, #tpu.memory_space<vmem>>, %arg2: memref<192x32xbf16, #tpu.memory_space<vmem>>, %arg3: memref<1x32xf32, #tpu.memory_space<vmem>>, %arg4: memref<800x32xf32, #tpu.memory_space<vmem>>) attributes {dimension_semantics = [#tpu.dimension_semantics<parallel>], iteration_bounds = array<i64: 1>, scalar_prefetch = 0 : i64, scratch_operands = 0 : i64, tpu.core_type = #tpu.core_type<tc>, window_params = [{transform_indices = @transform_0, window_bounds = array<i64: 800, 192>}, {pipeline_mode = #tpu.pipeline_mode<synchronous>, transform_indices = @transform_1, window_bounds = array<i64: 192, 32>}, {pipeline_mode = #tpu.pipeline_mode<synchronous>, transform_indices = @transform_2, window_bounds = array<i64: 1, 32>}, {transform_indices = @transform_3, window_bounds = array<i64: 800, 32>}]} {
    %c0 = arith.constant 0 : index
    %c0_0 = arith.constant 0 : index
    %0 = vector.load %arg1[%c0, %c0_0] : memref<800x192xbf16, #tpu.memory_space<vmem>>, vector<800x192xbf16>
    %c0_1 = arith.constant 0 : index
    %c0_2 = arith.constant 0 : index
    %1 = vector.load %arg2[%c0_1, %c0_2] : memref<192x32xbf16, #tpu.memory_space<vmem>>, vector<192x32xbf16>
    %cst = arith.constant dense<0.000000e+00> : vector<800x32xf32>
    %2 = tpu.matmul %0, %1, %cst {dimension_numbers = #tpu.dot_dimension_numbers<[1], [0], [0], [1], [0, 0, 1, 1], [], []>} : vector<800x192xbf16>, vector<192x32xbf16>, vector<800x32xf32> -> vector<800x32xf32>
    %c0_3 = arith.constant 0 : index
    %c0_4 = arith.constant 0 : index
    %3 = vector.load %arg3[%c0_3, %c0_4] : memref<1x32xf32, #tpu.memory_space<vmem>>, vector<1x32xf32>
    %4 = vector.broadcast %3 : vector<1x32xf32> to vector<800x32xf32>
    %5 = arith.addf %2, %4 : vector<800x32xf32>
    %cst_5 = arith.constant 0.000000e+00 : f32
    %6 = vector.broadcast %cst_5 : f32 to vector<800x32xf32>
    %7 = arith.maximumf %5, %6 : vector<800x32xf32>
    %c0_6 = arith.constant 0 : index
    %c0_7 = arith.constant 0 : index
    %8 = vector.load %arg4[%c0_6, %c0_7] : memref<800x32xf32, #tpu.memory_space<vmem>>, vector<800x32xf32>
    tpu.vector_store %arg4[%c0_6, %c0_7], %7 {strides = array<i32>} : memref<800x32xf32, #tpu.memory_space<vmem>>, vector<800x32xf32>,
    return
  }
  func.func @transform_0(%arg0: i32) -> (i32, i32) {
    %c0_i32 = arith.constant 0 : i32
    %c0_i32_0 = arith.constant 0 : i32
    return %arg0, %c0_i32 : i32, i32
  }
  func.func @transform_1(%arg0: i32) -> (i32, i32) {
    %c0_i32 = arith.constant 0 : i32
    %c0_i32_0 = arith.constant 0 : i32
    %c0_i32_1 = arith.constant 0 : i32
    return %c0_i32, %c0_i32_0 : i32, i32
  }
  func.func @transform_2(%arg0: i32) -> (i32, i32) {
    %c0_i32 = arith.constant 0 : i32
    %c0_i32_0 = arith.constant 0 : i32
    %c0_i32_1 = arith.constant 0 : i32
    return %c0_i32, %c0_i32_0 : i32, i32
  }
  func.func @transform_3(%arg0: i32) -> (i32, i32) {
    %c0_i32 = arith.constant 0 : i32
    %c0_i32_0 = arith.constant 0 : i32
    return %arg0, %c0_i32 : i32, i32
  }
}

module attributes {stable_mosaic.version = 11 : i64} {
  func.func @_matmul_bias_act_kernel(%arg0: i32, %arg1: memref<168x512xbf16, #tpu.memory_space<vmem>>, %arg2: memref<512x64xbf16, #tpu.memory_space<vmem>>, %arg3: memref<1x64xf32, #tpu.memory_space<vmem>>, %arg4: memref<168x64xf32, #tpu.memory_space<vmem>>) attributes {dimension_semantics = [#tpu.dimension_semantics<parallel>], iteration_bounds = array<i64: 1>, scalar_prefetch = 0 : i64, scratch_operands = 0 : i64, tpu.core_type = #tpu.core_type<tc>, window_params = [{transform_indices = @transform_0, window_bounds = array<i64: 168, 512>}, {pipeline_mode = #tpu.pipeline_mode<synchronous>, transform_indices = @transform_1, window_bounds = array<i64: 512, 64>}, {pipeline_mode = #tpu.pipeline_mode<synchronous>, transform_indices = @transform_2, window_bounds = array<i64: 1, 64>}, {transform_indices = @transform_3, window_bounds = array<i64: 168, 64>}]} {
    %c0 = arith.constant 0 : index
    %c0_0 = arith.constant 0 : index
    %0 = vector.load %arg1[%c0, %c0_0] : memref<168x512xbf16, #tpu.memory_space<vmem>>, vector<168x512xbf16>
    %c0_1 = arith.constant 0 : index
    %c0_2 = arith.constant 0 : index
    %1 = vector.load %arg2[%c0_1, %c0_2] : memref<512x64xbf16, #tpu.memory_space<vmem>>, vector<512x64xbf16>
    %cst = arith.constant dense<0.000000e+00> : vector<168x64xf32>
    %2 = tpu.matmul %0, %1, %cst {dimension_numbers = #tpu.dot_dimension_numbers<[1], [0], [0], [1], [0, 0, 1, 1], [], []>} : vector<168x512xbf16>, vector<512x64xbf16>, vector<168x64xf32> -> vector<168x64xf32>
    %c0_3 = arith.constant 0 : index
    %c0_4 = arith.constant 0 : index
    %3 = vector.load %arg3[%c0_3, %c0_4] : memref<1x64xf32, #tpu.memory_space<vmem>>, vector<1x64xf32>
    %4 = vector.broadcast %3 : vector<1x64xf32> to vector<168x64xf32>
    %5 = arith.addf %2, %4 : vector<168x64xf32>
    %cst_5 = arith.constant 0.000000e+00 : f32
    %6 = vector.broadcast %cst_5 : f32 to vector<168x64xf32>
    %7 = arith.maximumf %5, %6 : vector<168x64xf32>
    %c0_6 = arith.constant 0 : index
    %c0_7 = arith.constant 0 : index
    %8 = vector.load %arg4[%c0_6, %c0_7] : memref<168x64xf32, #tpu.memory_space<vmem>>, vector<168x64xf32>
    tpu.vector_store %arg4[%c0_6, %c0_7], %7 {strides = array<i32>} : memref<168x64xf32, #tpu.memory_space<vmem>>, vector<168x64xf32>,
    return
  }
  func.func @transform_0(%arg0: i32) -> (i32, i32) {
    %c0_i32 = arith.constant 0 : i32
    %c0_i32_0 = arith.constant 0 : i32
    return %arg0, %c0_i32 : i32, i32
  }
  func.func @transform_1(%arg0: i32) -> (i32, i32) {
    %c0_i32 = arith.constant 0 : i32
    %c0_i32_0 = arith.constant 0 : i32
    %c0_i32_1 = arith.constant 0 : i32
    return %c0_i32, %c0_i32_0 : i32, i32
  }
  func.func @transform_2(%arg0: i32) -> (i32, i32) {
    %c0_i32 = arith.constant 0 : i32
    %c0_i32_0 = arith.constant 0 : i32
    %c0_i32_1 = arith.constant 0 : i32
    return %c0_i32, %c0_i32_0 : i32, i32
  }
  func.func @transform_3(%arg0: i32) -> (i32, i32) {
    %c0_i32 = arith.constant 0 : i32
    %c0_i32_0 = arith.constant 0 : i32
    return %arg0, %c0_i32 : i32, i32
  }
}

module attributes {stable_mosaic.version = 11 : i64} {
  func.func @_matmul_bias_act_kernel(%arg0: i32, %arg1: memref<104x576xbf16, #tpu.memory_space<vmem>>, %arg2: memref<576x64xbf16, #tpu.memory_space<vmem>>, %arg3: memref<1x64xf32, #tpu.memory_space<vmem>>, %arg4: memref<104x64xf32, #tpu.memory_space<vmem>>) attributes {dimension_semantics = [#tpu.dimension_semantics<parallel>], iteration_bounds = array<i64: 1>, scalar_prefetch = 0 : i64, scratch_operands = 0 : i64, tpu.core_type = #tpu.core_type<tc>, window_params = [{transform_indices = @transform_0, window_bounds = array<i64: 104, 576>}, {pipeline_mode = #tpu.pipeline_mode<synchronous>, transform_indices = @transform_1, window_bounds = array<i64: 576, 64>}, {pipeline_mode = #tpu.pipeline_mode<synchronous>, transform_indices = @transform_2, window_bounds = array<i64: 1, 64>}, {transform_indices = @transform_3, window_bounds = array<i64: 104, 64>}]} {
    %c0 = arith.constant 0 : index
    %c0_0 = arith.constant 0 : index
    %0 = vector.load %arg1[%c0, %c0_0] : memref<104x576xbf16, #tpu.memory_space<vmem>>, vector<104x576xbf16>
    %c0_1 = arith.constant 0 : index
    %c0_2 = arith.constant 0 : index
    %1 = vector.load %arg2[%c0_1, %c0_2] : memref<576x64xbf16, #tpu.memory_space<vmem>>, vector<576x64xbf16>
    %cst = arith.constant dense<0.000000e+00> : vector<104x64xf32>
    %2 = tpu.matmul %0, %1, %cst {dimension_numbers = #tpu.dot_dimension_numbers<[1], [0], [0], [1], [0, 0, 1, 1], [], []>} : vector<104x576xbf16>, vector<576x64xbf16>, vector<104x64xf32> -> vector<104x64xf32>
    %c0_3 = arith.constant 0 : index
    %c0_4 = arith.constant 0 : index
    %3 = vector.load %arg3[%c0_3, %c0_4] : memref<1x64xf32, #tpu.memory_space<vmem>>, vector<1x64xf32>
    %4 = vector.broadcast %3 : vector<1x64xf32> to vector<104x64xf32>
    %5 = arith.addf %2, %4 : vector<104x64xf32>
    %cst_5 = arith.constant 0.000000e+00 : f32
    %6 = vector.broadcast %cst_5 : f32 to vector<104x64xf32>
    %7 = arith.maximumf %5, %6 : vector<104x64xf32>
    %c0_6 = arith.constant 0 : index
    %c0_7 = arith.constant 0 : index
    %8 = vector.load %arg4[%c0_6, %c0_7] : memref<104x64xf32, #tpu.memory_space<vmem>>, vector<104x64xf32>
    tpu.vector_store %arg4[%c0_6, %c0_7], %7 {strides = array<i32>} : memref<104x64xf32, #tpu.memory_space<vmem>>, vector<104x64xf32>,
    return
  }
  func.func @transform_0(%arg0: i32) -> (i32, i32) {
    %c0_i32 = arith.constant 0 : i32
    %c0_i32_0 = arith.constant 0 : i32
    return %arg0, %c0_i32 : i32, i32
  }
  func.func @transform_1(%arg0: i32) -> (i32, i32) {
    %c0_i32 = arith.constant 0 : i32
    %c0_i32_0 = arith.constant 0 : i32
    %c0_i32_1 = arith.constant 0 : i32
    return %c0_i32, %c0_i32_0 : i32, i32
  }
  func.func @transform_2(%arg0: i32) -> (i32, i32) {
    %c0_i32 = arith.constant 0 : i32
    %c0_i32_0 = arith.constant 0 : i32
    %c0_i32_1 = arith.constant 0 : i32
    return %c0_i32, %c0_i32_0 : i32, i32
  }
  func.func @transform_3(%arg0: i32) -> (i32, i32) {
    %c0_i32 = arith.constant 0 : i32
    %c0_i32_0 = arith.constant 0 : i32
    return %arg0, %c0_i32 : i32, i32
  }
}

module attributes {stable_mosaic.version = 11 : i64} {
  func.func @_matmul_bias_act_kernel(%arg0: i32, %arg1: memref<8x3136xbf16, #tpu.memory_space<vmem>>, %arg2: memref<3136x64xbf16, #tpu.memory_space<vmem>>, %arg3: memref<1x64xf32, #tpu.memory_space<vmem>>, %arg4: memref<8x64xf32, #tpu.memory_space<vmem>>) attributes {dimension_semantics = [#tpu.dimension_semantics<parallel>], iteration_bounds = array<i64: 1>, scalar_prefetch = 0 : i64, scratch_operands = 0 : i64, tpu.core_type = #tpu.core_type<tc>, window_params = [{transform_indices = @transform_0, window_bounds = array<i64: 8, 3136>}, {pipeline_mode = #tpu.pipeline_mode<synchronous>, transform_indices = @transform_1, window_bounds = array<i64: 3136, 64>}, {pipeline_mode = #tpu.pipeline_mode<synchronous>, transform_indices = @transform_2, window_bounds = array<i64: 1, 64>}, {transform_indices = @transform_3, window_bounds = array<i64: 8, 64>}]} {
    %c0 = arith.constant 0 : index
    %c0_0 = arith.constant 0 : index
    %0 = vector.load %arg1[%c0, %c0_0] : memref<8x3136xbf16, #tpu.memory_space<vmem>>, vector<8x3136xbf16>
    %c0_1 = arith.constant 0 : index
    %c0_2 = arith.constant 0 : index
    %1 = vector.load %arg2[%c0_1, %c0_2] : memref<3136x64xbf16, #tpu.memory_space<vmem>>, vector<3136x64xbf16>
    %cst = arith.constant dense<0.000000e+00> : vector<8x64xf32>
    %2 = tpu.matmul %0, %1, %cst {dimension_numbers = #tpu.dot_dimension_numbers<[1], [0], [0], [1], [0, 0, 1, 1], [], []>} : vector<8x3136xbf16>, vector<3136x64xbf16>, vector<8x64xf32> -> vector<8x64xf32>
    %c0_3 = arith.constant 0 : index
    %c0_4 = arith.constant 0 : index
    %3 = vector.load %arg3[%c0_3, %c0_4] : memref<1x64xf32, #tpu.memory_space<vmem>>, vector<1x64xf32>
    %4 = vector.broadcast %3 : vector<1x64xf32> to vector<8x64xf32>
    %5 = arith.addf %2, %4 : vector<8x64xf32>
    %6 = math.tanh %5 : vector<8x64xf32>
    %c0_5 = arith.constant 0 : index
    %c0_6 = arith.constant 0 : index
    %7 = vector.load %arg4[%c0_5, %c0_6] : memref<8x64xf32, #tpu.memory_space<vmem>>, vector<8x64xf32>
    tpu.vector_store %arg4[%c0_5, %c0_6], %6 {strides = array<i32>} : memref<8x64xf32, #tpu.memory_space<vmem>>, vector<8x64xf32>,
    return
  }
  func.func @transform_0(%arg0: i32) -> (i32, i32) {
    %c0_i32 = arith.constant 0 : i32
    %c0_i32_0 = arith.constant 0 : i32
    return %arg0, %c0_i32 : i32, i32
  }
  func.func @transform_1(%arg0: i32) -> (i32, i32) {
    %c0_i32 = arith.constant 0 : i32
    %c0_i32_0 = arith.constant 0 : i32
    %c0_i32_1 = arith.constant 0 : i32
    return %c0_i32, %c0_i32_0 : i32, i32
  }
  func.func @transform_2(%arg0: i32) -> (i32, i32) {
    %c0_i32 = arith.constant 0 : i32
    %c0_i32_0 = arith.constant 0 : i32
    %c0_i32_1 = arith.constant 0 : i32
    return %c0_i32, %c0_i32_0 : i32, i32
  }
  func.func @transform_3(%arg0: i32) -> (i32, i32) {
    %c0_i32 = arith.constant 0 : i32
    %c0_i32_0 = arith.constant 0 : i32
    return %arg0, %c0_i32 : i32, i32
  }
}

</mosaic_0001>

<bundles_post_ra>
// kernel: encoder_forward.4
= control target key start
LH: loop header
LB: loop body
LE: loop exit
PB: predicated region body
PF: predicated region fallthrough
CT: control target
= control target key end

     0   :  { %v1805_v0 = vmov 0   ;;  %vm668_vm0 = vcmask 523264   ;;  %vm1352_vm1 = vcmask 261120   ;;  %s2747_s1 = inlined_call_operand.vmem [shape: bf16[192,32], index: 1, kind: input, shape index: {}]   ;;  %s2748_s0 = inlined_call_operand.vmem [shape: bf16[800,192], index: 0, kind: input, shape index: {}]   ;;  %s2749_s2 = inlined_call_operand.vmem [shape: f32[1,32], index: 2, kind: input, shape index: {}]   ;;  %s2750_s3 = inlined_call_operand.vmem [shape: f32[800,32], index: 3, kind: output, shape index: {}]  }
   0x1   :  { %819 = vmatprep.subr.bf16.mxu0 %v1805_v0  ;;  %1620 = vmatprep.subr.bf16.mxu1 %v1805_v0  ;;  %v1645_v1 = vld [vmem:[%s2747_s1 + $0x38] sm:$0xff]   ;;  %v1646_v2 = vld [vmem:[%s2747_s1 + $0x30] sm:$0xff]   ;;  %v1647_v3 = vld [vmem:[%s2747_s1 + $0x28] sm:$0xff]  }
   0x2   :  { %820 = vmatpush1.bf16.msra.mxu0 %v1645_v1  ;;  %1632 = vmatpush1.bf16.msra.mxu1 %v1645_v1  ;;  %v1648_v4 = vld [vmem:[%s2747_s1 + $0x20] sm:$0xff]   ;;  %v1649_v6 = vld [vmem:[%s2747_s1 + $0x18] sm:$0xff]   ;;  %v1650_v8 = vld [vmem:[%s2747_s1 + $0x10] sm:$0xff]  }
   0x3   :  { %821 = vmatprep.subr.bf16.mxu0 %v1805_v0  ;;  %1621 = vmatprep.subr.bf16.mxu1 %v1805_v0  ;;  %v1659_v5 = vld [vmem:[%s2748_s0 + $0x4] ss:$8 sps:$4 sm:$0xff]   ;;  %v1662_v7 = vld [vmem:[%s2748_s0 + $0x194] ss:$8 sps:$4 sm:$0xff]   ;;  %v1657_v15 = vld [vmem:[%s2748_s0] ss:$8 sps:$4 sm:$0xff]  }
   0x4   :  { %1570 = vmatprep.mubr.msk.bf16.mxu0 %vm668_vm0, %v1659_v5  ;;  %1595 = vmatprep.mubr.msk.bf16.mxu1 %vm668_vm0, %v1662_v7  ;;  %v1651_v9 = vld [vmem:[%s2747_s1 + $0x8] sm:$0xff]   ;;  %v1652_v10 = vld [vmem:[%s2747_s1] sm:$0xff]   ;;  %v1653_v11 = vld [vmem:[%s2747_s1 + $0x58] sm:$0xff]  }
   0x5   :  { %v1654_v12 = vld [vmem:[%s2747_s1 + $0x50] sm:$0xff]   ;;  %v1655_v13 = vld [vmem:[%s2747_s1 + $0x48] sm:$0xff]   ;;  %v1656_v14 = vld [vmem:[%s2747_s1 + $0x40] sm:$0xff]  }
   0x6   :  { %822 = vmatpush1.bf16.msra.mxu0 %v1646_v2  ;;  %1633 = vmatpush1.bf16.msra.mxu1 %v1646_v2  ;;  %v1660_v16 = vld [vmem:[%s2748_s0 + $0x190] ss:$8 sps:$4 sm:$0xff]   ;;  %v1663_v17 = vld [vmem:[%s2748_s0 + $0x14] ss:$8 sps:$4 sm:$0xff]   ;;  %v1665_v18 = vld [vmem:[%s2748_s0 + $0x1a4] ss:$8 sps:$4 sm:$0xff]  }
   0x7   :  { %823 = vmatprep.subr.bf16.mxu0 %v1805_v0  ;;  %1622 = vmatprep.subr.bf16.mxu1 %v1805_v0  ;;  %v1667_v19 = vld [vmem:[%s2748_s0 + $0x10] ss:$8 sps:$4 sm:$0xff]   ;;  %v1668_v20 = vld [vmem:[%s2748_s0 + $0x1a0] ss:$8 sps:$4 sm:$0xff]   ;;  %v1669_v21 = vld [vmem:[%s2748_s0 + $0x24] ss:$8 sps:$4 sm:$0xff]  }
   0x8   :  { %v1671_v22 = vld [vmem:[%s2748_s0 + $0x1b4] ss:$8 sps:$4 sm:$0xff]   ;;  %v1673_v23 = vld [vmem:[%s2748_s0 + $0x20] ss:$8 sps:$4 sm:$0xff]   ;;  %v1674_v24 = vld [vmem:[%s2748_s0 + $0x1b0] ss:$8 sps:$4 sm:$0xff]  }
   0x9   :  { %v1675_v25 = vld [vmem:[%s2748_s0 + $0x34] ss:$8 sps:$4 sm:$0xff]   ;;  %v1677_v26 = vld [vmem:[%s2748_s0 + $0x1c4] ss:$8 sps:$4 sm:$0xff]   ;;  %v1679_v27 = vld [vmem:[%s2748_s0 + $0x30] ss:$8 sps:$4 sm:$0xff]  }
   0xa   :  { %824 = vmatpush1.bf16.msra.mxu0 %v1647_v3  ;;  %1634 = vmatpush1.bf16.msra.mxu1 %v1647_v3  ;;  %v1680_v28 = vld [vmem:[%s2748_s0 + $0x1c0] ss:$8 sps:$4 sm:$0xff]   ;;  %v1681_v29 = vld [vmem:[%s2748_s0 + $0x44] ss:$8 sps:$4 sm:$0xff]   ;;  %v1683_v30 = vld [vmem:[%s2748_s0 + $0x1d4] ss:$8 sps:$4 sm:$0xff]  }
   0xb   :  { %825 = vmatprep.subr.bf16.mxu0 %v1805_v0  ;;  %1623 = vmatprep.subr.bf16.mxu1 %v1805_v0  ;;  %v1685_v31 = vld [vmem:[%s2748_s0 + $0x40] ss:$8 sps:$4 sm:$0xff]   ;;  %v1686_v32 = vld [vmem:[%s2748_s0 + $0x1d0] ss:$8 sps:$4 sm:$0xff]   ;;  %v1687_v33 = vld [vmem:[%s2748_s0 + $0x54] ss:$8 sps:$4 sm:$0xff]  }
   0xc   :  { %v1689_v34 = vld [vmem:[%s2748_s0 + $0x1e4] ss:$8 sps:$4 sm:$0xff]   ;;  %v1691_v35 = vld [vmem:[%s2748_s0 + $0x50] ss:$8 sps:$4 sm:$0xff]   ;;  %v1692_v36 = vld [vmem:[%s2748_s0 + $0x1e0] ss:$8 sps:$4 sm:$0xff]  }
   0xd   :  { %v1693_v37 = vld [vmem:[%s2748_s0 + $0x64] ss:$8 sps:$4 sm:$0xff]   ;;  %v1695_v38 = vld [vmem:[%s2748_s0 + $0x1f4] ss:$8 sps:$4 sm:$0xff]   ;;  %v1697_v39 = vld [vmem:[%s2748_s0 + $0x60] ss:$8 sps:$4 sm:$0xff]  }
   0xe   :  { %826 = vmatpush1.bf16.msra.mxu0 %v1648_v4  ;;  %1635 = vmatpush1.bf16.msra.mxu1 %v1648_v4  ;;  %v1698_v40 = vld [vmem:[%s2748_s0 + $0x1f0] ss:$8 sps:$4 sm:$0xff]   ;;  %v1699_v41 = vld [vmem:[%s2748_s0 + $0x74] ss:$8 sps:$4 sm:$0xff]   ;;  %v1701_v42 = vld [vmem:[%s2748_s0 + $0x204] ss:$8 sps:$4 sm:$0xff]  }
   0xf   :  { %827 = vmatprep.subr.bf16.mxu0 %v1805_v0  ;;  %1624 = vmatprep.subr.bf16.mxu1 %v1805_v0  ;;  %v1703_v43 = vld [vmem:[%s2748_s0 + $0x70] ss:$8 sps:$4 sm:$0xff]   ;;  %v1704_v44 = vld [vmem:[%s2748_s0 + $0x200] ss:$8 sps:$4 sm:$0xff]   ;;  %v1705_v45 = vld [vmem:[%s2748_s0 + $0x84] ss:$8 sps:$4 sm:$0xff]  }
  0x10   :  { %v1707_v46 = vld [vmem:[%s2748_s0 + $0x214] ss:$8 sps:$4 sm:$0xff]   ;;  %v1709_v47 = vld [vmem:[%s2748_s0 + $0x80] ss:$8 sps:$4 sm:$0xff]   ;;  %v1710_v48 = vld [vmem:[%s2748_s0 + $0x210] ss:$8 sps:$4 sm:$0xff]  }
  0x11   :  { %v1711_v49 = vld [vmem:[%s2748_s0 + $0x94] ss:$8 sps:$4 sm:$0xff]   ;;  %v1713_v50 = vld [vmem:[%s2748_s0 + $0x224] ss:$8 sps:$4 sm:$0xff]   ;;  %v1715_v51 = vld [vmem:[%s2748_s0 + $0x90] ss:$8 sps:$4 sm:$0xff]  }
  0x12   :  { %828 = vmatpush1.bf16.msra.mxu0 %v1649_v6  ;;  %1636 = vmatpush1.bf16.msra.mxu1 %v1649_v6  ;;  %v1716_v52 = vld [vmem:[%s2748_s0 + $0x220] ss:$8 sps:$4 sm:$0xff]   ;;  %v1717_v53 = vld [vmem:[%s2748_s0 + $0xa4] ss:$8 sps:$4 sm:$0xff]   ;;  %v1719_v54 = vld [vmem:[%s2748_s0 + $0x234] ss:$8 sps:$4 sm:$0xff]  }
  0x13   :  { %829 = vmatprep.subr.bf16.mxu0 %v1805_v0  ;;  %1625 = vmatprep.subr.bf16.mxu1 %v1805_v0  ;;  %v1721_v55 = vld [vmem:[%s2748_s0 + $0xa0] ss:$8 sps:$4 sm:$0xff]   ;;  %v1722_v56 = vld [vmem:[%s2748_s0 + $0x230] ss:$8 sps:$4 sm:$0xff]   ;;  %v1723_v57 = vld [vmem:[%s2748_s0 + $0xb4] ss:$8 sps:$4 sm:$0xff]  }
  0x14   :  { %v1725_v58 = vld [vmem:[%s2748_s0 + $0x244] ss:$8 sps:$4 sm:$0xff]   ;;  %v1727_v59 = vld [vmem:[%s2748_s0 + $0xb0] ss:$8 sps:$4 sm:$0xff]   ;;  %v1728_v60 = vld [vmem:[%s2748_s0 + $0x240] ss:$8 sps:$4 sm:$0xff]  }
  0x15   :  { %v1729_v61 = vld [vmem:[%s2748_s0 + $0xc4] ss:$8 sps:$4 sm:$0xff]   ;;  %v1731_v62 = vld [vmem:[%s2748_s0 + $0x254] ss:$8 sps:$4 sm:$0xff]   ;;  %v1733_v63 = vld [vmem:[%s2748_s0 + $0xc0] ss:$8 sps:$4 sm:$0xff]  }
  0x16   :  { %830 = vmatpush1.bf16.msra.mxu0 %v1650_v8  ;;  %1637 = vmatpush1.bf16.msra.mxu1 %v1650_v8  ;;  %v1735_v1 = vld [vmem:[%s2748_s0 + $0xd4] ss:$8 sps:$4 sm:$0xff]   ;;  %v1737_v2 = vld [vmem:[%s2748_s0 + $0x264] ss:$8 sps:$4 sm:$0xff]   ;;  %v1739_v3 = vld [vmem:[%s2748_s0 + $0xd0] ss:$8 sps:$4 sm:$0xff]  }
  0x17   :  { %831 = vmatprep.subr.bf16.mxu0 %v1805_v0  ;;  %1626 = vmatprep.subr.bf16.mxu1 %v1805_v0  ;;  %v1740_v4 = vld [vmem:[%s2748_s0 + $0x260] ss:$8 sps:$4 sm:$0xff]   ;;  %v1741_v5 = vld [vmem:[%s2748_s0 + $0xe4] ss:$8 sps:$4 sm:$0xff]   ;;  %v1743_v6 = vld [vmem:[%s2748_s0 + $0x274] ss:$8 sps:$4 sm:$0xff]  }
  0x18   :  { %v1745_v7 = vld [vmem:[%s2748_s0 + $0xe0] ss:$8 sps:$4 sm:$0xff]   ;;  %v1746_v8 = vld [vmem:[%s2748_s0 + $0x270] ss:$8 sps:$4 sm:$0xff]  }
  0x1a   :  { %832 = vmatpush1.bf16.msra.mxu0 %v1651_v9  ;;  %1638 = vmatpush1.bf16.msra.mxu1 %v1651_v9  ;;  %v1747_v9 = vld [vmem:[%s2748_s0 + $0xf4] ss:$8 sps:$4 sm:$0xff]  }
  0x1b   :  { %833 = vmatprep.subr.bf16.mxu0 %v1805_v0  ;;  %1627 = vmatprep.subr.bf16.mxu1 %v1805_v0 }
  0x1e   :  { %834 = vmatpush1.bf16.msra.mxu0 %v1652_v10  ;;  %1639 = vmatpush1.bf16.msra.mxu1 %v1652_v10  ;;  %v1749_v10 = vld [vmem:[%s2748_s0 + $0x284] ss:$8 sps:$4 sm:$0xff]  }
  0x1f   :  { %843 = vmatprep.subr.bf16.mxu0 %v1805_v0  ;;  %1628 = vmatprep.subr.bf16.mxu1 %v1805_v0 }
  0x22   :  { %844 = vmatpush2.bf16.msra.mxu0 %v1653_v11  ;;  %1640 = vmatpush2.bf16.msra.mxu1 %v1653_v11  ;;  %v1751_v11 = vld [vmem:[%s2748_s0 + $0xf0] ss:$8 sps:$4 sm:$0xff]  }
  0x23   :  { %845 = vmatprep.subr.bf16.mxu0 %v1805_v0  ;;  %1629 = vmatprep.subr.bf16.mxu1 %v1805_v0 }
  0x26   :  { %846 = vmatpush2.bf16.msra.mxu0 %v1654_v12  ;;  %1641 = vmatpush2.bf16.msra.mxu1 %v1654_v12  ;;  %v1752_v12 = vld [vmem:[%s2748_s0 + $0x280] ss:$8 sps:$4 sm:$0xff]  }
  0x27   :  { %847 = vmatprep.subr.bf16.mxu0 %v1805_v0  ;;  %1630 = vmatprep.subr.bf16.mxu1 %v1805_v0 }
  0x2a   :  { %848 = vmatpush2.bf16.msra.mxu0 %v1655_v13  ;;  %1642 = vmatpush2.bf16.msra.mxu1 %v1655_v13  ;;  %v1753_v13 = vld [vmem:[%s2748_s0 + $0x104] ss:$8 sps:$4 sm:$0xff]  }
  0x2b   :  { %849 = vmatprep.subr.bf16.mxu0 %v1805_v0  ;;  %1631 = vmatprep.subr.bf16.mxu1 %v1805_v0  ;;  %v1734_v0 = vld [vmem:[%s2748_s0 + $0x250] ss:$8 sps:$4 sm:$0xff]  }
  0x2e   :  { %850 = vmatpush2.bf16.msra.mxu0 %v1656_v14  ;;  %1643 = vmatpush2.bf16.msra.mxu1 %v1656_v14  ;;  %v1755_v14 = vld [vmem:[%s2748_s0 + $0x294] ss:$8 sps:$4 sm:$0xff]  }
  0x31   :  { %852 = vmatmul.mubr.bf16.vlgmr.msra.gmra.mxu0 %v1657_v15  ;;  %1052 = vmatmul.mubr.bf16.vlgmr.msra.gmra.mxu1 %v1660_v16  ;;  %v1757_v15 = vld [vmem:[%s2748_s0 + $0x100] ss:$8 sps:$4 sm:$0xff]   ;;  %v1758_v16 = vld [vmem:[%s2748_s0 + $0x290] ss:$8 sps:$4 sm:$0xff]  }
  0x32   :  { %1571 = vmatprep.mubr.msk.bf16.mxu0 %vm668_vm0, %v1663_v17  ;;  %1596 = vmatprep.mubr.msk.bf16.mxu1 %vm668_vm0, %v1665_v18  ;;  %v1759_v17 = vld [vmem:[%s2748_s0 + $0x114] ss:$8 sps:$4 sm:$0xff]   ;;  %v1761_v18 = vld [vmem:[%s2748_s0 + $0x2a4] ss:$8 sps:$4 sm:$0xff]  }
  0x39   :  { %860 = vmatmul.mubr.bf16.gmra.mxu0 %v1667_v19  ;;  %1060 = vmatmul.mubr.bf16.gmra.mxu1 %v1668_v20  ;;  %v1763_v19 = vld [vmem:[%s2748_s0 + $0x110] ss:$8 sps:$4 sm:$0xff]   ;;  %v1764_v20 = vld [vmem:[%s2748_s0 + $0x2a0] ss:$8 sps:$4 sm:$0xff]  }
  0x3a   :  { %1572 = vmatprep.mubr.msk.bf16.mxu0 %vm668_vm0, %v1669_v21  ;;  %1597 = vmatprep.mubr.msk.bf16.mxu1 %vm668_vm0, %v1671_v22  ;;  %v1765_v21 = vld [vmem:[%s2748_s0 + $0x124] ss:$8 sps:$4 sm:$0xff]   ;;  %v1767_v22 = vld [vmem:[%s2748_s0 + $0x2b4] ss:$8 sps:$4 sm:$0xff]  }
  0x41   :  { %868 = vmatmul.mubr.bf16.gmra.mxu0 %v1673_v23  ;;  %1068 = vmatmul.mubr.bf16.gmra.mxu1 %v1674_v24  ;;  %v1769_v23 = vld [vmem:[%s2748_s0 + $0x120] ss:$8 sps:$4 sm:$0xff]   ;;  %v1770_v24 = vld [vmem:[%s2748_s0 + $0x2b0] ss:$8 sps:$4 sm:$0xff]  }
  0x42   :  { %1573 = vmatprep.mubr.msk.bf16.mxu0 %vm668_vm0, %v1675_v25  ;;  %1598 = vmatprep.mubr.msk.bf16.mxu1 %vm668_vm0, %v1677_v26  ;;  %v1771_v25 = vld [vmem:[%s2748_s0 + $0x134] ss:$8 sps:$4 sm:$0xff]   ;;  %v1773_v26 = vld [vmem:[%s2748_s0 + $0x2c4] ss:$8 sps:$4 sm:$0xff]  }
  0x49   :  { %876 = vmatmul.mubr.bf16.gmra.mxu0 %v1679_v27  ;;  %1076 = vmatmul.mubr.bf16.gmra.mxu1 %v1680_v28  ;;  %v1775_v27 = vld [vmem:[%s2748_s0 + $0x130] ss:$8 sps:$4 sm:$0xff]   ;;  %v1776_v28 = vld [vmem:[%s2748_s0 + $0x2c0] ss:$8 sps:$4 sm:$0xff]  }
  0x4a   :  { %1574 = vmatprep.mubr.msk.bf16.mxu0 %vm668_vm0, %v1681_v29  ;;  %1599 = vmatprep.mubr.msk.bf16.mxu1 %vm668_vm0, %v1683_v30  ;;  %v1777_v29 = vld [vmem:[%s2748_s0 + $0x144] ss:$8 sps:$4 sm:$0xff]   ;;  %v1779_v30 = vld [vmem:[%s2748_s0 + $0x2d4] ss:$8 sps:$4 sm:$0xff]  }
  0x51   :  { %884 = vmatmul.mubr.bf16.gmra.mxu0 %v1685_v31  ;;  %1084 = vmatmul.mubr.bf16.gmra.mxu1 %v1686_v32  ;;  %v1781_v31 = vld [vmem:[%s2748_s0 + $0x140] ss:$8 sps:$4 sm:$0xff]   ;;  %v1782_v32 = vld [vmem:[%s2748_s0 + $0x2d0] ss:$8 sps:$4 sm:$0xff]  }
  0x52   :  { %1575 = vmatprep.mubr.msk.bf16.mxu0 %vm668_vm0, %v1687_v33  ;;  %1600 = vmatprep.mubr.msk.bf16.mxu1 %vm668_vm0, %v1689_v34  ;;  %v1783_v33 = vld [vmem:[%s2748_s0 + $0x154] ss:$8 sps:$4 sm:$0xff]   ;;  %v1785_v34 = vld [vmem:[%s2748_s0 + $0x2e4] ss:$8 sps:$4 sm:$0xff]  }
  0x59   :  { %892 = vmatmul.mubr.bf16.gmra.mxu0 %v1691_v35  ;;  %1092 = vmatmul.mubr.bf16.gmra.mxu1 %v1692_v36  ;;  %v1787_v35 = vld [vmem:[%s2748_s0 + $0x150] ss:$8 sps:$4 sm:$0xff]   ;;  %v1788_v36 = vld [vmem:[%s2748_s0 + $0x2e0] ss:$8 sps:$4 sm:$0xff]  }
  0x5a   :  { %1576 = vmatprep.mubr.msk.bf16.mxu0 %vm668_vm0, %v1693_v37  ;;  %1601 = vmatprep.mubr.msk.bf16.mxu1 %vm668_vm0, %v1695_v38  ;;  %v1789_v37 = vld [vmem:[%s2748_s0 + $0x164] ss:$8 sps:$4 sm:$0xff]   ;;  %v1791_v38 = vld [vmem:[%s2748_s0 + $0x2f4] ss:$8 sps:$4 sm:$0xff]  }
  0x61   :  { %900 = vmatmul.mubr.bf16.gmra.mxu0 %v1697_v39  ;;  %1100 = vmatmul.mubr.bf16.gmra.mxu1 %v1698_v40  ;;  %v1793_v39 = vld [vmem:[%s2748_s0 + $0x160] ss:$8 sps:$4 sm:$0xff]   ;;  %v1794_v40 = vld [vmem:[%s2748_s0 + $0x2f0] ss:$8 sps:$4 sm:$0xff]  }
  0x62   :  { %1577 = vmatprep.mubr.msk.bf16.mxu0 %vm668_vm0, %v1699_v41  ;;  %1602 = vmatprep.mubr.msk.bf16.mxu1 %vm668_vm0, %v1701_v42  ;;  %v1795_v41 = vld [vmem:[%s2748_s0 + $0x174] ss:$8 sps:$4 sm:$0xff]   ;;  %v1797_v42 = vld [vmem:[%s2748_s0 + $0x304] ss:$8 sps:$4 sm:$0xff]  }
  0x69   :  { %908 = vmatmul.mubr.bf16.gmra.mxu0 %v1703_v43  ;;  %1108 = vmatmul.mubr.bf16.gmra.mxu1 %v1704_v44  ;;  %v1799_v43 = vld [vmem:[%s2748_s0 + $0x170] ss:$8 sps:$4 sm:$0xff]   ;;  %v1800_v44 = vld [vmem:[%s2748_s0 + $0x300] ss:$8 sps:$4 sm:$0xff]  }
  0x6a   :  { %1578 = vmatprep.mubr.msk.bf16.mxu0 %vm668_vm0, %v1705_v45  ;;  %1603 = vmatprep.mubr.msk.bf16.mxu1 %vm668_vm0, %v1707_v46  ;;  %v1801_v45 = vld [vmem:[%s2748_s0 + $0x184] ss:$8 sps:$4 sm:$0xff]   ;;  %v1803_v46 = vld [vmem:[%s2748_s0 + $0x314] ss:$8 sps:$4 sm:$0xff]  }
  0x71   :  { %916 = vmatmul.mubr.bf16.gmra.mxu0 %v1709_v47  ;;  %1116 = vmatmul.mubr.bf16.gmra.mxu1 %v1710_v48  ;;  %v63_v47 = vld [vmem:[%s2748_s0 + $0x180] sm:$0xff]  ;;  %v64_v48 = vld [vmem:[%s2748_s0 + $0x188] sm:$0xff] }
  0x72   :  { %1579 = vmatprep.mubr.msk.bf16.mxu0 %vm668_vm0, %v1711_v49  ;;  %1604 = vmatprep.mubr.msk.bf16.mxu1 %vm668_vm0, %v1713_v50  ;;  %v113_v49 = vld [vmem:[%s2748_s0 + $0x310] sm:$0xff]  ;;  %v114_v50 = vld [vmem:[%s2748_s0 + $0x318] sm:$0xff] }
  0x79   :  { %924 = vmatmul.mubr.bf16.gmra.mxu0 %v1715_v51  ;;  %1124 = vmatmul.mubr.bf16.gmra.mxu1 %v1716_v52  ;;  %v1506_v51 = vcombine.low %v63_v47, %v64_v48  ;;  %v1556_v52 = vcombine.low %v113_v49, %v114_v50 }
  0x7a   :  { %1580 = vmatprep.mubr.msk.bf16.mxu0 %vm668_vm0, %v1717_v53  ;;  %1605 = vmatprep.mubr.msk.bf16.mxu1 %vm668_vm0, %v1719_v54  ;;  %v2245_v53 = vld [vmem:[%s2749_s2] ss:$0 sm:$0xff] }
  0x81   :  { %932 = vmatmul.mubr.bf16.gmra.mxu0 %v1721_v55  ;;  %1132 = vmatmul.mubr.bf16.gmra.mxu1 %v1722_v56 }
  0x82   :  { %1581 = vmatprep.mubr.msk.bf16.mxu0 %vm668_vm0, %v1723_v57  ;;  %1606 = vmatprep.mubr.msk.bf16.mxu1 %vm668_vm0, %v1725_v58 }
  0x89   :  { %940 = vmatmul.mubr.bf16.gmra.mxu0 %v1727_v59  ;;  %1140 = vmatmul.mubr.bf16.gmra.mxu1 %v1728_v60 }
  0x8a   :  { %1582 = vmatprep.mubr.msk.bf16.mxu0 %vm668_vm0, %v1729_v61  ;;  %1607 = vmatprep.mubr.msk.bf16.mxu1 %vm668_vm0, %v1731_v62 }
  0x91   :  { %948 = vmatmul.mubr.bf16.gmra.mxu0 %v1733_v63  ;;  %1148 = vmatmul.mubr.bf16.gmra.mxu1 %v1734_v0 }
  0x92   :  { %1583 = vmatprep.mubr.msk.bf16.mxu0 %vm668_vm0, %v1735_v1  ;;  %1608 = vmatprep.mubr.msk.bf16.mxu1 %vm668_vm0, %v1737_v2 }
  0x99   :  { %956 = vmatmul.mubr.bf16.gmra.mxu0 %v1739_v3  ;;  %1156 = vmatmul.mubr.bf16.gmra.mxu1 %v1740_v4 }
  0x9a   :  { %1584 = vmatprep.mubr.msk.bf16.mxu0 %vm668_vm0, %v1741_v5  ;;  %1609 = vmatprep.mubr.msk.bf16.mxu1 %vm668_vm0, %v1743_v6 }
  0xa1   :  { %964 = vmatmul.mubr.bf16.gmra.mxu0 %v1745_v7  ;;  %1164 = vmatmul.mubr.bf16.gmra.mxu1 %v1746_v8 }
  0xa2   :  { %1585 = vmatprep.mubr.msk.bf16.mxu0 %vm668_vm0, %v1747_v9  ;;  %1610 = vmatprep.mubr.msk.bf16.mxu1 %vm668_vm0, %v1749_v10 }
  0xa9   :  { %972 = vmatmul.mubr.bf16.gmra.mxu0 %v1751_v11  ;;  %1172 = vmatmul.mubr.bf16.gmra.mxu1 %v1752_v12 }
  0xaa   :  { %1586 = vmatprep.mubr.msk.bf16.mxu0 %vm668_vm0, %v1753_v13  ;;  %1611 = vmatprep.mubr.msk.bf16.mxu1 %vm668_vm0, %v1755_v14 }
  0xb1   :  { %980 = vmatmul.mubr.bf16.gmra.mxu0 %v1757_v15  ;;  %1180 = vmatmul.mubr.bf16.gmra.mxu1 %v1758_v16 }
  0xb2   :  { %1587 = vmatprep.mubr.msk.bf16.mxu0 %vm668_vm0, %v1759_v17  ;;  %1612 = vmatprep.mubr.msk.bf16.mxu1 %vm668_vm0, %v1761_v18 }
  0xb9   :  { %988 = vmatmul.mubr.bf16.gmra.mxu0 %v1763_v19  ;;  %1188 = vmatmul.mubr.bf16.gmra.mxu1 %v1764_v20 }
  0xba   :  { %1588 = vmatprep.mubr.msk.bf16.mxu0 %vm668_vm0, %v1765_v21  ;;  %1613 = vmatprep.mubr.msk.bf16.mxu1 %vm668_vm0, %v1767_v22 }
  0xc1   :  { %996 = vmatmul.mubr.bf16.gmra.mxu0 %v1769_v23  ;;  %1196 = vmatmul.mubr.bf16.gmra.mxu1 %v1770_v24 }
  0xc2   :  { %1589 = vmatprep.mubr.msk.bf16.mxu0 %vm668_vm0, %v1771_v25  ;;  %1614 = vmatprep.mubr.msk.bf16.mxu1 %vm668_vm0, %v1773_v26 }
  0xc9   :  { %1004 = vmatmul.mubr.bf16.gmra.mxu0 %v1775_v27  ;;  %1204 = vmatmul.mubr.bf16.gmra.mxu1 %v1776_v28 }
  0xca   :  { %1590 = vmatprep.mubr.msk.bf16.mxu0 %vm668_vm0, %v1777_v29  ;;  %1615 = vmatprep.mubr.msk.bf16.mxu1 %vm668_vm0, %v1779_v30 }
  0xd1   :  { %1012 = vmatmul.mubr.bf16.gmra.mxu0 %v1781_v31  ;;  %1212 = vmatmul.mubr.bf16.gmra.mxu1 %v1782_v32 }
  0xd2   :  { %1591 = vmatprep.mubr.msk.bf16.mxu0 %vm668_vm0, %v1783_v33  ;;  %1616 = vmatprep.mubr.msk.bf16.mxu1 %vm668_vm0, %v1785_v34 }
  0xd9   :  { %1020 = vmatmul.mubr.bf16.gmra.mxu0 %v1787_v35  ;;  %1220 = vmatmul.mubr.bf16.gmra.mxu1 %v1788_v36 }
  0xda   :  { %1592 = vmatprep.mubr.msk.bf16.mxu0 %vm668_vm0, %v1789_v37  ;;  %1617 = vmatprep.mubr.msk.bf16.mxu1 %vm668_vm0, %v1791_v38 }
  0xe1   :  { %1028 = vmatmul.mubr.bf16.gmra.mxu0 %v1793_v39  ;;  %1228 = vmatmul.mubr.bf16.gmra.mxu1 %v1794_v40 }
  0xe2   :  { %1593 = vmatprep.mubr.msk.bf16.mxu0 %vm668_vm0, %v1795_v41  ;;  %1618 = vmatprep.mubr.msk.bf16.mxu1 %vm668_vm0, %v1797_v42 }
  0xe9   :  { %1036 = vmatmul.mubr.bf16.gmra.mxu0 %v1799_v43  ;;  %1236 = vmatmul.mubr.bf16.gmra.mxu1 %v1800_v44 }
  0xea   :  { %1594 = vmatprep.mubr.msk.bf16.mxu0 %vm668_vm0, %v1801_v45  ;;  %1619 = vmatprep.mubr.msk.bf16.mxu1 %vm668_vm0, %v1803_v46 }
  0xf1   :  { %v853_v54 = vpop.f32.mrf.mxu0  ;;  %1044 = vmatmul.mubr.bf16.gmra.mxu0 %v1506_v51  ;;  %v1053_v55 = vpop.f32.mrf.mxu1  ;;  %1244 = vmatmul.mubr.bf16.gmra.mxu1 %v1556_v52 }
  0xf2   :  { %v854_v56 = vadd.f32 %v2245_v53, %v853_v54  ;;  %v1054_v57 = vadd.f32 %v2245_v53, %v1053_v55 }
  0xf3   :  { %v855_v58 = vpop.f32.mrf.mxu0  ;;  %v1055_v59 = vpop.f32.mrf.mxu1 }
  0xf4   :  { %v1252_v60 = vmax.f32 %v854_v56, 0.0  ;;  %v1302_v61 = vmax.f32 %v1054_v57, 0.0 }
  0xf5   :  { %v856_v62 = vpop.f32.mrf.mxu0  ;;  %v1056_v63 = vpop.f32.mrf.mxu1 }
  0xf6   :  { %1353 = vst.msk [vmem:[%s2750_s3] sm:$0xff] %vm1352_vm1, %v1252_v60  ;;  %1403 = vst.msk [vmem:[%s2750_s3 + $0x190] sm:$0xff] %vm1352_vm1, %v1302_v61  ;;  %v857_v0 = vadd.f32 %v2245_v53, %v856_v62  ;;  %v1057_v1 = vadd.f32 %v2245_v53, %v1056_v63 }
  0xf7   :  { %v858_v2 = vpop.f32.mrf.mxu0  ;;  %v1058_v3 = vpop.f32.mrf.mxu1 }
  0xf8   :  { %v1253_v4 = vmax.f32 %v857_v0, 0.0  ;;  %v1303_v5 = vmax.f32 %v1057_v1, 0.0 }
  0xf9   :  { %v861_v6 = vpop.f32.mrf.mxu0  ;;  %v1061_v7 = vpop.f32.mrf.mxu1 }
  0xfa   :  { %1354 = vst.msk [vmem:[%s2750_s3 + $0x8] sm:$0xff] %vm1352_vm1, %v1253_v4  ;;  %1404 = vst.msk [vmem:[%s2750_s3 + $0x198] sm:$0xff] %vm1352_vm1, %v1303_v5  ;;  %v862_v8 = vadd.f32 %v2245_v53, %v861_v6  ;;  %v1062_v9 = vadd.f32 %v2245_v53, %v1061_v7 }
  0xfb   :  { %v863_v10 = vpop.f32.mrf.mxu0  ;;  %v1063_v11 = vpop.f32.mrf.mxu1 }
  0xfc   :  { %v1254_v12 = vmax.f32 %v862_v8, 0.0  ;;  %v1304_v13 = vmax.f32 %v1062_v9, 0.0 }
  0xfd   :  { %v864_v14 = vpop.f32.mrf.mxu0  ;;  %v1064_v15 = vpop.f32.mrf.mxu1 }
  0xfe   :  { %1355 = vst.msk [vmem:[%s2750_s3 + $0x10] sm:$0xff] %vm1352_vm1, %v1254_v12  ;;  %1405 = vst.msk [vmem:[%s2750_s3 + $0x1a0] sm:$0xff] %vm1352_vm1, %v1304_v13  ;;  %v865_v16 = vadd.f32 %v2245_v53, %v864_v14  ;;  %v1065_v17 = vadd.f32 %v2245_v53, %v1064_v15 }
  0xff   :  { %v866_v18 = vpop.f32.mrf.mxu0  ;;  %v1066_v19 = vpop.f32.mrf.mxu1 }
 0x100   :  { %v1255_v20 = vmax.f32 %v865_v16, 0.0  ;;  %v1305_v21 = vmax.f32 %v1065_v17, 0.0 }
 0x101   :  { %v869_v22 = vpop.f32.mrf.mxu0  ;;  %v1069_v23 = vpop.f32.mrf.mxu1 }
 0x102   :  { %1356 = vst.msk [vmem:[%s2750_s3 + $0x18] sm:$0xff] %vm1352_vm1, %v1255_v20  ;;  %1406 = vst.msk [vmem:[%s2750_s3 + $0x1a8] sm:$0xff] %vm1352_vm1, %v1305_v21  ;;  %v870_v24 = vadd.f32 %v2245_v53, %v869_v22  ;;  %v1070_v25 = vadd.f32 %v2245_v53, %v1069_v23 }
 0x103   :  { %v871_v26 = vpop.f32.mrf.mxu0  ;;  %v1071_v27 = vpop.f32.mrf.mxu1 }
 0x104   :  { %v1256_v28 = vmax.f32 %v870_v24, 0.0  ;;  %v1306_v29 = vmax.f32 %v1070_v25, 0.0 }
 0x105   :  { %v872_v30 = vpop.f32.mrf.mxu0  ;;  %v1072_v31 = vpop.f32.mrf.mxu1 }
 0x106   :  { %1357 = vst.msk [vmem:[%s2750_s3 + $0x20] sm:$0xff] %vm1352_vm1, %v1256_v28  ;;  %1407 = vst.msk [vmem:[%s2750_s3 + $0x1b0] sm:$0xff] %vm1352_vm1, %v1306_v29  ;;  %v873_v32 = vadd.f32 %v2245_v53, %v872_v30  ;;  %v1073_v33 = vadd.f32 %v2245_v53, %v1072_v31 }
 0x107   :  { %v874_v34 = vpop.f32.mrf.mxu0  ;;  %v1074_v35 = vpop.f32.mrf.mxu1 }
 0x108   :  { %v1257_v36 = vmax.f32 %v873_v32, 0.0  ;;  %v1307_v37 = vmax.f32 %v1073_v33, 0.0 }
 0x109   :  { %v877_v38 = vpop.f32.mrf.mxu0  ;;  %v1077_v39 = vpop.f32.mrf.mxu1 }
 0x10a   :  { %1358 = vst.msk [vmem:[%s2750_s3 + $0x28] sm:$0xff] %vm1352_vm1, %v1257_v36  ;;  %1408 = vst.msk [vmem:[%s2750_s3 + $0x1b8] sm:$0xff] %vm1352_vm1, %v1307_v37  ;;  %v878_v40 = vadd.f32 %v2245_v53, %v877_v38  ;;  %v1078_v41 = vadd.f32 %v2245_v53, %v1077_v39 }
 0x10b   :  { %v879_v42 = vpop.f32.mrf.mxu0  ;;  %v1079_v43 = vpop.f32.mrf.mxu1 }
 0x10c   :  { %v1258_v44 = vmax.f32 %v878_v40, 0.0  ;;  %v1308_v45 = vmax.f32 %v1078_v41, 0.0 }
 0x10d   :  { %v880_v46 = vpop.f32.mrf.mxu0  ;;  %v1080_v47 = vpop.f32.mrf.mxu1 }
 0x10e   :  { %1359 = vst.msk [vmem:[%s2750_s3 + $0x30] sm:$0xff] %vm1352_vm1, %v1258_v44  ;;  %1409 = vst.msk [vmem:[%s2750_s3 + $0x1c0] sm:$0xff] %vm1352_vm1, %v1308_v45  ;;  %v881_v48 = vadd.f32 %v2245_v53, %v880_v46  ;;  %v1081_v49 = vadd.f32 %v2245_v53, %v1080_v47 }
 0x10f   :  { %v882_v50 = vpop.f32.mrf.mxu0  ;;  %v1082_v51 = vpop.f32.mrf.mxu1 }
 0x110   :  { %v1259_v52 = vmax.f32 %v881_v48, 0.0  ;;  %v1309_v54 = vmax.f32 %v1081_v49, 0.0 }
 0x111   :  { %v885_v55 = vpop.f32.mrf.mxu0  ;;  %v1085_v56 = vpop.f32.mrf.mxu1 }
 0x112   :  { %1360 = vst.msk [vmem:[%s2750_s3 + $0x38] sm:$0xff] %vm1352_vm1, %v1259_v52  ;;  %1410 = vst.msk [vmem:[%s2750_s3 + $0x1c8] sm:$0xff] %vm1352_vm1, %v1309_v54  ;;  %v886_v57 = vadd.f32 %v2245_v53, %v885_v55  ;;  %v1086_v58 = vadd.f32 %v2245_v53, %v1085_v56 }
 0x113   :  { %v887_v59 = vpop.f32.mrf.mxu0  ;;  %v1087_v60 = vpop.f32.mrf.mxu1 }
 0x114   :  { %v1260_v61 = vmax.f32 %v886_v57, 0.0  ;;  %v1310_v62 = vmax.f32 %v1086_v58, 0.0 }
 0x115   :  { %v888_v63 = vpop.f32.mrf.mxu0  ;;  %v1088_v0 = vpop.f32.mrf.mxu1 }
 0x116   :  { %1361 = vst.msk [vmem:[%s2750_s3 + $0x40] sm:$0xff] %vm1352_vm1, %v1260_v61  ;;  %1411 = vst.msk [vmem:[%s2750_s3 + $0x1d0] sm:$0xff] %vm1352_vm1, %v1310_v62  ;;  %v889_v1 = vadd.f32 %v2245_v53, %v888_v63  ;;  %v1089_v2 = vadd.f32 %v2245_v53, %v1088_v0 }
 0x117   :  { %v890_v3 = vpop.f32.mrf.mxu0  ;;  %v1090_v4 = vpop.f32.mrf.mxu1 }
 0x118   :  { %v1261_v5 = vmax.f32 %v889_v1, 0.0  ;;  %v1311_v6 = vmax.f32 %v1089_v2, 0.0 }
 0x119   :  { %v893_v7 = vpop.f32.mrf.mxu0  ;;  %v1093_v8 = vpop.f32.mrf.mxu1 }
 0x11a   :  { %1362 = vst.msk [vmem:[%s2750_s3 + $0x48] sm:$0xff] %vm1352_vm1, %v1261_v5  ;;  %1412 = vst.msk [vmem:[%s2750_s3 + $0x1d8] sm:$0xff] %vm1352_vm1, %v1311_v6  ;;  %v894_v9 = vadd.f32 %v2245_v53, %v893_v7  ;;  %v1094_v10 = vadd.f32 %v2245_v53, %v1093_v8 }
 0x11b   :  { %v895_v11 = vpop.f32.mrf.mxu0  ;;  %v1095_v12 = vpop.f32.mrf.mxu1 }
 0x11c   :  { %v1262_v13 = vmax.f32 %v894_v9, 0.0  ;;  %v1312_v14 = vmax.f32 %v1094_v10, 0.0 }
 0x11d   :  { %v896_v15 = vpop.f32.mrf.mxu0  ;;  %v1096_v16 = vpop.f32.mrf.mxu1 }
 0x11e   :  { %1363 = vst.msk [vmem:[%s2750_s3 + $0x50] sm:$0xff] %vm1352_vm1, %v1262_v13  ;;  %1413 = vst.msk [vmem:[%s2750_s3 + $0x1e0] sm:$0xff] %vm1352_vm1, %v1312_v14  ;;  %v897_v17 = vadd.f32 %v2245_v53, %v896_v15  ;;  %v1097_v18 = vadd.f32 %v2245_v53, %v1096_v16 }
 0x11f   :  { %v898_v19 = vpop.f32.mrf.mxu0  ;;  %v1098_v20 = vpop.f32.mrf.mxu1 }
 0x120   :  { %v1263_v21 = vmax.f32 %v897_v17, 0.0  ;;  %v1313_v22 = vmax.f32 %v1097_v18, 0.0 }
 0x121   :  { %v901_v23 = vpop.f32.mrf.mxu0  ;;  %v1101_v24 = vpop.f32.mrf.mxu1 }
 0x122   :  { %1364 = vst.msk [vmem:[%s2750_s3 + $0x58] sm:$0xff] %vm1352_vm1, %v1263_v21  ;;  %1414 = vst.msk [vmem:[%s2750_s3 + $0x1e8] sm:$0xff] %vm1352_vm1, %v1313_v22  ;;  %v902_v25 = vadd.f32 %v2245_v53, %v901_v23  ;;  %v1102_v26 = vadd.f32 %v2245_v53, %v1101_v24 }
 0x123   :  { %v903_v27 = vpop.f32.mrf.mxu0  ;;  %v1103_v28 = vpop.f32.mrf.mxu1 }
 0x124   :  { %v1264_v29 = vmax.f32 %v902_v25, 0.0  ;;  %v1314_v30 = vmax.f32 %v1102_v26, 0.0 }
 0x125   :  { %v904_v31 = vpop.f32.mrf.mxu0  ;;  %v1104_v32 = vpop.f32.mrf.mxu1 }
 0x126   :  { %1365 = vst.msk [vmem:[%s2750_s3 + $0x60] sm:$0xff] %vm1352_vm1, %v1264_v29  ;;  %1415 = vst.msk [vmem:[%s2750_s3 + $0x1f0] sm:$0xff] %vm1352_vm1, %v1314_v30  ;;  %v905_v33 = vadd.f32 %v2245_v53, %v904_v31  ;;  %v1105_v34 = vadd.f32 %v2245_v53, %v1104_v32 }
 0x127   :  { %v906_v35 = vpop.f32.mrf.mxu0  ;;  %v1106_v36 = vpop.f32.mrf.mxu1 }
 0x128   :  { %v1265_v37 = vmax.f32 %v905_v33, 0.0  ;;  %v1315_v38 = vmax.f32 %v1105_v34, 0.0 }
 0x129   :  { %v909_v39 = vpop.f32.mrf.mxu0  ;;  %v1109_v40 = vpop.f32.mrf.mxu1 }
 0x12a   :  { %1366 = vst.msk [vmem:[%s2750_s3 + $0x68] sm:$0xff] %vm1352_vm1, %v1265_v37  ;;  %1416 = vst.msk [vmem:[%s2750_s3 + $0x1f8] sm:$0xff] %vm1352_vm1, %v1315_v38  ;;  %v910_v41 = vadd.f32 %v2245_v53, %v909_v39  ;;  %v1110_v42 = vadd.f32 %v2245_v53, %v1109_v40 }
 0x12b   :  { %v911_v43 = vpop.f32.mrf.mxu0  ;;  %v1111_v44 = vpop.f32.mrf.mxu1 }
 0x12c   :  { %v1266_v45 = vmax.f32 %v910_v41, 0.0  ;;  %v1316_v46 = vmax.f32 %v1110_v42, 0.0 }
 0x12d   :  { %v912_v47 = vpop.f32.mrf.mxu0  ;;  %v1112_v48 = vpop.f32.mrf.mxu1 }
 0x12e   :  { %1367 = vst.msk [vmem:[%s2750_s3 + $0x70] sm:$0xff] %vm1352_vm1, %v1266_v45  ;;  %1417 = vst.msk [vmem:[%s2750_s3 + $0x200] sm:$0xff] %vm1352_vm1, %v1316_v46  ;;  %v913_v49 = vadd.f32 %v2245_v53, %v912_v47  ;;  %v1113_v50 = vadd.f32 %v2245_v53, %v1112_v48 }
 0x12f   :  { %v914_v51 = vpop.f32.mrf.mxu0  ;;  %v1114_v52 = vpop.f32.mrf.mxu1 }
 0x130   :  { %v1267_v54 = vmax.f32 %v913_v49, 0.0  ;;  %v1317_v55 = vmax.f32 %v1113_v50, 0.0 }
 0x131   :  { %v917_v56 = vpop.f32.mrf.mxu0  ;;  %v1117_v57 = vpop.f32.mrf.mxu1 }
 0x132   :  { %1368 = vst.msk [vmem:[%s2750_s3 + $0x78] sm:$0xff] %vm1352_vm1, %v1267_v54  ;;  %1418 = vst.msk [vmem:[%s2750_s3 + $0x208] sm:$0xff] %vm1352_vm1, %v1317_v55  ;;  %v918_v58 = vadd.f32 %v2245_v53, %v917_v56  ;;  %v1118_v59 = vadd.f32 %v2245_v53, %v1117_v57 }
 0x133   :  { %v919_v60 = vpop.f32.mrf.mxu0  ;;  %v1119_v61 = vpop.f32.mrf.mxu1 }
 0x134   :  { %v1268_v62 = vmax.f32 %v918_v58, 0.0  ;;  %v1318_v63 = vmax.f32 %v1118_v59, 0.0 }
 0x135   :  { %v920_v0 = vpop.f32.mrf.mxu0  ;;  %v1120_v1 = vpop.f32.mrf.mxu1 }
 0x136   :  { %1369 = vst.msk [vmem:[%s2750_s3 + $0x80] sm:$0xff] %vm1352_vm1, %v1268_v62  ;;  %1419 = vst.msk [vmem:[%s2750_s3 + $0x210] sm:$0xff] %vm1352_vm1, %v1318_v63  ;;  %v921_v2 = vadd.f32 %v2245_v53, %v920_v0  ;;  %v1121_v3 = vadd.f32 %v2245_v53, %v1120_v1 }
 0x137   :  { %v922_v4 = vpop.f32.mrf.mxu0  ;;  %v1122_v5 = vpop.f32.mrf.mxu1 }
 0x138   :  { %v1269_v6 = vmax.f32 %v921_v2, 0.0  ;;  %v1319_v7 = vmax.f32 %v1121_v3, 0.0 }
 0x139   :  { %v925_v8 = vpop.f32.mrf.mxu0  ;;  %v1125_v9 = vpop.f32.mrf.mxu1 }
 0x13a   :  { %1370 = vst.msk [vmem:[%s2750_s3 + $0x88] sm:$0xff] %vm1352_vm1, %v1269_v6  ;;  %1420 = vst.msk [vmem:[%s2750_s3 + $0x218] sm:$0xff] %vm1352_vm1, %v1319_v7  ;;  %v926_v10 = vadd.f32 %v2245_v53, %v925_v8  ;;  %v1126_v11 = vadd.f32 %v2245_v53, %v1125_v9 }
 0x13b   :  { %v927_v12 = vpop.f32.mrf.mxu0  ;;  %v1127_v13 = vpop.f32.mrf.mxu1 }
 0x13c   :  { %v1270_v14 = vmax.f32 %v926_v10, 0.0  ;;  %v1320_v15 = vmax.f32 %v1126_v11, 0.0 }
 0x13d   :  { %v928_v16 = vpop.f32.mrf.mxu0  ;;  %v1128_v17 = vpop.f32.mrf.mxu1 }
 0x13e   :  { %1371 = vst.msk [vmem:[%s2750_s3 + $0x90] sm:$0xff] %vm1352_vm1, %v1270_v14  ;;  %1421 = vst.msk [vmem:[%s2750_s3 + $0x220] sm:$0xff] %vm1352_vm1, %v1320_v15  ;;  %v929_v18 = vadd.f32 %v2245_v53, %v928_v16  ;;  %v1129_v19 = vadd.f32 %v2245_v53, %v1128_v17 }
 0x13f   :  { %v930_v20 = vpop.f32.mrf.mxu0  ;;  %v1130_v21 = vpop.f32.mrf.mxu1 }
 0x140   :  { %v1271_v22 = vmax.f32 %v929_v18, 0.0  ;;  %v1321_v23 = vmax.f32 %v1129_v19, 0.0 }
 0x141   :  { %v933_v24 = vpop.f32.mrf.mxu0  ;;  %v1133_v25 = vpop.f32.mrf.mxu1 }
 0x142   :  { %1372 = vst.msk [vmem:[%s2750_s3 + $0x98] sm:$0xff] %vm1352_vm1, %v1271_v22  ;;  %1422 = vst.msk [vmem:[%s2750_s3 + $0x228] sm:$0xff] %vm1352_vm1, %v1321_v23  ;;  %v934_v26 = vadd.f32 %v2245_v53, %v933_v24  ;;  %v1134_v27 = vadd.f32 %v2245_v53, %v1133_v25 }
 0x143   :  { %v935_v28 = vpop.f32.mrf.mxu0  ;;  %v1135_v29 = vpop.f32.mrf.mxu1 }
 0x144   :  { %v1272_v30 = vmax.f32 %v934_v26, 0.0  ;;  %v1322_v31 = vmax.f32 %v1134_v27, 0.0 }
 0x145   :  { %v936_v32 = vpop.f32.mrf.mxu0  ;;  %v1136_v33 = vpop.f32.mrf.mxu1 }
 0x146   :  { %1373 = vst.msk [vmem:[%s2750_s3 + $0xa0] sm:$0xff] %vm1352_vm1, %v1272_v30  ;;  %1423 = vst.msk [vmem:[%s2750_s3 + $0x230] sm:$0xff] %vm1352_vm1, %v1322_v31  ;;  %v937_v34 = vadd.f32 %v2245_v53, %v936_v32  ;;  %v1137_v35 = vadd.f32 %v2245_v53, %v1136_v33 }
 0x147   :  { %v938_v36 = vpop.f32.mrf.mxu0  ;;  %v1138_v37 = vpop.f32.mrf.mxu1 }
 0x148   :  { %v1273_v38 = vmax.f32 %v937_v34, 0.0  ;;  %v1323_v39 = vmax.f32 %v1137_v35, 0.0 }
 0x149   :  { %v941_v40 = vpop.f32.mrf.mxu0  ;;  %v1141_v41 = vpop.f32.mrf.mxu1 }
 0x14a   :  { %1374 = vst.msk [vmem:[%s2750_s3 + $0xa8] sm:$0xff] %vm1352_vm1, %v1273_v38  ;;  %1424 = vst.msk [vmem:[%s2750_s3 + $0x238] sm:$0xff] %vm1352_vm1, %v1323_v39  ;;  %v942_v42 = vadd.f32 %v2245_v53, %v941_v40  ;;  %v1142_v43 = vadd.f32 %v2245_v53, %v1141_v41 }
 0x14b   :  { %v943_v44 = vpop.f32.mrf.mxu0  ;;  %v1143_v45 = vpop.f32.mrf.mxu1 }
 0x14c   :  { %v1274_v46 = vmax.f32 %v942_v42, 0.0  ;;  %v1324_v47 = vmax.f32 %v1142_v43, 0.0 }
 0x14d   :  { %v944_v48 = vpop.f32.mrf.mxu0  ;;  %v1144_v49 = vpop.f32.mrf.mxu1 }
 0x14e   :  { %1375 = vst.msk [vmem:[%s2750_s3 + $0xb0] sm:$0xff] %vm1352_vm1, %v1274_v46  ;;  %1425 = vst.msk [vmem:[%s2750_s3 + $0x240] sm:$0xff] %vm1352_vm1, %v1324_v47  ;;  %v945_v50 = vadd.f32 %v2245_v53, %v944_v48  ;;  %v1145_v51 = vadd.f32 %v2245_v53, %v1144_v49 }
 0x14f   :  { %v946_v52 = vpop.f32.mrf.mxu0  ;;  %v1146_v54 = vpop.f32.mrf.mxu1 }
 0x150   :  { %v1275_v55 = vmax.f32 %v945_v50, 0.0  ;;  %v1325_v56 = vmax.f32 %v1145_v51, 0.0 }
 0x151   :  { %v949_v57 = vpop.f32.mrf.mxu0  ;;  %v1149_v58 = vpop.f32.mrf.mxu1 }
 0x152   :  { %1376 = vst.msk [vmem:[%s2750_s3 + $0xb8] sm:$0xff] %vm1352_vm1, %v1275_v55  ;;  %1426 = vst.msk [vmem:[%s2750_s3 + $0x248] sm:$0xff] %vm1352_vm1, %v1325_v56  ;;  %v950_v59 = vadd.f32 %v2245_v53, %v949_v57  ;;  %v1150_v60 = vadd.f32 %v2245_v53, %v1149_v58 }
 0x153   :  { %v951_v61 = vpop.f32.mrf.mxu0  ;;  %v1151_v62 = vpop.f32.mrf.mxu1 }
 0x154   :  { %v1276_v63 = vmax.f32 %v950_v59, 0.0  ;;  %v1326_v0 = vmax.f32 %v1150_v60, 0.0 }
 0x155   :  { %v952_v1 = vpop.f32.mrf.mxu0  ;;  %v1152_v2 = vpop.f32.mrf.mxu1 }
 0x156   :  { %1377 = vst.msk [vmem:[%s2750_s3 + $0xc0] sm:$0xff] %vm1352_vm1, %v1276_v63  ;;  %1427 = vst.msk [vmem:[%s2750_s3 + $0x250] sm:$0xff] %vm1352_vm1, %v1326_v0  ;;  %v953_v3 = vadd.f32 %v2245_v53, %v952_v1  ;;  %v1153_v4 = vadd.f32 %v2245_v53, %v1152_v2 }
 0x157   :  { %v954_v5 = vpop.f32.mrf.mxu0  ;;  %v1154_v6 = vpop.f32.mrf.mxu1 }
 0x158   :  { %v1277_v7 = vmax.f32 %v953_v3, 0.0  ;;  %v1327_v8 = vmax.f32 %v1153_v4, 0.0 }
 0x159   :  { %v957_v9 = vpop.f32.mrf.mxu0  ;;  %v1157_v10 = vpop.f32.mrf.mxu1 }
 0x15a   :  { %1378 = vst.msk [vmem:[%s2750_s3 + $0xc8] sm:$0xff] %vm1352_vm1, %v1277_v7  ;;  %1428 = vst.msk [vmem:[%s2750_s3 + $0x258] sm:$0xff] %vm1352_vm1, %v1327_v8  ;;  %v958_v11 = vadd.f32 %v2245_v53, %v957_v9  ;;  %v1158_v12 = vadd.f32 %v2245_v53, %v1157_v10 }
 0x15b   :  { %v959_v13 = vpop.f32.mrf.mxu0  ;;  %v1159_v14 = vpop.f32.mrf.mxu1 }
 0x15c   :  { %v1278_v15 = vmax.f32 %v958_v11, 0.0  ;;  %v1328_v16 = vmax.f32 %v1158_v12, 0.0 }
 0x15d   :  { %v960_v17 = vpop.f32.mrf.mxu0  ;;  %v1160_v18 = vpop.f32.mrf.mxu1 }
 0x15e   :  { %1379 = vst.msk [vmem:[%s2750_s3 + $0xd0] sm:$0xff] %vm1352_vm1, %v1278_v15  ;;  %1429 = vst.msk [vmem:[%s2750_s3 + $0x260] sm:$0xff] %vm1352_vm1, %v1328_v16  ;;  %v961_v19 = vadd.f32 %v2245_v53, %v960_v17  ;;  %v1161_v20 = vadd.f32 %v2245_v53, %v1160_v18 }
 0x15f   :  { %v962_v21 = vpop.f32.mrf.mxu0  ;;  %v1162_v22 = vpop.f32.mrf.mxu1 }
 0x160   :  { %v1279_v23 = vmax.f32 %v961_v19, 0.0  ;;  %v1329_v24 = vmax.f32 %v1161_v20, 0.0 }
 0x161   :  { %v965_v25 = vpop.f32.mrf.mxu0  ;;  %v1165_v26 = vpop.f32.mrf.mxu1 }
 0x162   :  { %1380 = vst.msk [vmem:[%s2750_s3 + $0xd8] sm:$0xff] %vm1352_vm1, %v1279_v23  ;;  %1430 = vst.msk [vmem:[%s2750_s3 + $0x268] sm:$0xff] %vm1352_vm1, %v1329_v24  ;;  %v966_v27 = vadd.f32 %v2245_v53, %v965_v25  ;;  %v1166_v28 = vadd.f32 %v2245_v53, %v1165_v26 }
 0x163   :  { %v967_v29 = vpop.f32.mrf.mxu0  ;;  %v1167_v30 = vpop.f32.mrf.mxu1 }
 0x164   :  { %v1280_v31 = vmax.f32 %v966_v27, 0.0  ;;  %v1330_v32 = vmax.f32 %v1166_v28, 0.0 }
 0x165   :  { %v968_v33 = vpop.f32.mrf.mxu0  ;;  %v1168_v34 = vpop.f32.mrf.mxu1 }
 0x166   :  { %1381 = vst.msk [vmem:[%s2750_s3 + $0xe0] sm:$0xff] %vm1352_vm1, %v1280_v31  ;;  %1431 = vst.msk [vmem:[%s2750_s3 + $0x270] sm:$0xff] %vm1352_vm1, %v1330_v32  ;;  %v969_v35 = vadd.f32 %v2245_v53, %v968_v33  ;;  %v1169_v36 = vadd.f32 %v2245_v53, %v1168_v34 }
 0x167   :  { %v970_v37 = vpop.f32.mrf.mxu0  ;;  %v1170_v38 = vpop.f32.mrf.mxu1 }
 0x168   :  { %v1281_v39 = vmax.f32 %v969_v35, 0.0  ;;  %v1331_v40 = vmax.f32 %v1169_v36, 0.0 }
 0x169   :  { %v973_v41 = vpop.f32.mrf.mxu0  ;;  %v1173_v42 = vpop.f32.mrf.mxu1 }
 0x16a   :  { %1382 = vst.msk [vmem:[%s2750_s3 + $0xe8] sm:$0xff] %vm1352_vm1, %v1281_v39  ;;  %1432 = vst.msk [vmem:[%s2750_s3 + $0x278] sm:$0xff] %vm1352_vm1, %v1331_v40  ;;  %v974_v43 = vadd.f32 %v2245_v53, %v973_v41  ;;  %v1174_v44 = vadd.f32 %v2245_v53, %v1173_v42 }
 0x16b   :  { %v975_v45 = vpop.f32.mrf.mxu0  ;;  %v1175_v46 = vpop.f32.mrf.mxu1 }
 0x16c   :  { %v1282_v47 = vmax.f32 %v974_v43, 0.0  ;;  %v1332_v48 = vmax.f32 %v1174_v44, 0.0 }
 0x16d   :  { %v976_v49 = vpop.f32.mrf.mxu0  ;;  %v1176_v50 = vpop.f32.mrf.mxu1 }
 0x16e   :  { %1383 = vst.msk [vmem:[%s2750_s3 + $0xf0] sm:$0xff] %vm1352_vm1, %v1282_v47  ;;  %1433 = vst.msk [vmem:[%s2750_s3 + $0x280] sm:$0xff] %vm1352_vm1, %v1332_v48  ;;  %v977_v51 = vadd.f32 %v2245_v53, %v976_v49  ;;  %v1177_v52 = vadd.f32 %v2245_v53, %v1176_v50 }
 0x16f   :  { %v978_v54 = vpop.f32.mrf.mxu0  ;;  %v1178_v55 = vpop.f32.mrf.mxu1 }
 0x170   :  { %v1283_v56 = vmax.f32 %v977_v51, 0.0  ;;  %v1333_v57 = vmax.f32 %v1177_v52, 0.0 }
 0x171   :  { %v981_v58 = vpop.f32.mrf.mxu0  ;;  %v1181_v59 = vpop.f32.mrf.mxu1 }
 0x172   :  { %1384 = vst.msk [vmem:[%s2750_s3 + $0xf8] sm:$0xff] %vm1352_vm1, %v1283_v56  ;;  %1434 = vst.msk [vmem:[%s2750_s3 + $0x288] sm:$0xff] %vm1352_vm1, %v1333_v57  ;;  %v982_v60 = vadd.f32 %v2245_v53, %v981_v58  ;;  %v1182_v61 = vadd.f32 %v2245_v53, %v1181_v59 }
 0x173   :  { %v983_v62 = vpop.f32.mrf.mxu0  ;;  %v1183_v63 = vpop.f32.mrf.mxu1 }
 0x174   :  { %v1284_v0 = vmax.f32 %v982_v60, 0.0  ;;  %v1334_v1 = vmax.f32 %v1182_v61, 0.0 }
 0x175   :  { %v984_v2 = vpop.f32.mrf.mxu0  ;;  %v1184_v3 = vpop.f32.mrf.mxu1 }
 0x176   :  { %1385 = vst.msk [vmem:[%s2750_s3 + $0x100] sm:$0xff] %vm1352_vm1, %v1284_v0  ;;  %1435 = vst.msk [vmem:[%s2750_s3 + $0x290] sm:$0xff] %vm1352_vm1, %v1334_v1  ;;  %v985_v4 = vadd.f32 %v2245_v53, %v984_v2  ;;  %v1185_v5 = vadd.f32 %v2245_v53, %v1184_v3 }
 0x177   :  { %v986_v6 = vpop.f32.mrf.mxu0  ;;  %v1186_v7 = vpop.f32.mrf.mxu1 }
 0x178   :  { %v1285_v8 = vmax.f32 %v985_v4, 0.0  ;;  %v1335_v9 = vmax.f32 %v1185_v5, 0.0 }
 0x179   :  { %v989_v10 = vpop.f32.mrf.mxu0  ;;  %v1189_v11 = vpop.f32.mrf.mxu1 }
 0x17a   :  { %1386 = vst.msk [vmem:[%s2750_s3 + $0x108] sm:$0xff] %vm1352_vm1, %v1285_v8  ;;  %1436 = vst.msk [vmem:[%s2750_s3 + $0x298] sm:$0xff] %vm1352_vm1, %v1335_v9  ;;  %v990_v12 = vadd.f32 %v2245_v53, %v989_v10  ;;  %v1190_v13 = vadd.f32 %v2245_v53, %v1189_v11 }
 0x17b   :  { %v991_v14 = vpop.f32.mrf.mxu0  ;;  %v1191_v15 = vpop.f32.mrf.mxu1 }
 0x17c   :  { %v1286_v16 = vmax.f32 %v990_v12, 0.0  ;;  %v1336_v17 = vmax.f32 %v1190_v13, 0.0 }
 0x17d   :  { %v992_v18 = vpop.f32.mrf.mxu0  ;;  %v1192_v19 = vpop.f32.mrf.mxu1 }
 0x17e   :  { %1387 = vst.msk [vmem:[%s2750_s3 + $0x110] sm:$0xff] %vm1352_vm1, %v1286_v16  ;;  %1437 = vst.msk [vmem:[%s2750_s3 + $0x2a0] sm:$0xff] %vm1352_vm1, %v1336_v17  ;;  %v993_v20 = vadd.f32 %v2245_v53, %v992_v18  ;;  %v1193_v21 = vadd.f32 %v2245_v53, %v1192_v19 }
 0x17f   :  { %v994_v22 = vpop.f32.mrf.mxu0  ;;  %v1194_v23 = vpop.f32.mrf.mxu1 }
 0x180   :  { %v1287_v24 = vmax.f32 %v993_v20, 0.0  ;;  %v1337_v25 = vmax.f32 %v1193_v21, 0.0 }
 0x181   :  { %v997_v26 = vpop.f32.mrf.mxu0  ;;  %v1197_v27 = vpop.f32.mrf.mxu1 }
 0x182   :  { %1388 = vst.msk [vmem:[%s2750_s3 + $0x118] sm:$0xff] %vm1352_vm1, %v1287_v24  ;;  %1438 = vst.msk [vmem:[%s2750_s3 + $0x2a8] sm:$0xff] %vm1352_vm1, %v1337_v25  ;;  %v998_v28 = vadd.f32 %v2245_v53, %v997_v26  ;;  %v1198_v29 = vadd.f32 %v2245_v53, %v1197_v27 }
 0x183   :  { %v999_v30 = vpop.f32.mrf.mxu0  ;;  %v1199_v31 = vpop.f32.mrf.mxu1 }
 0x184   :  { %v1288_v32 = vmax.f32 %v998_v28, 0.0  ;;  %v1338_v33 = vmax.f32 %v1198_v29, 0.0 }
 0x185   :  { %v1000_v34 = vpop.f32.mrf.mxu0  ;;  %v1200_v35 = vpop.f32.mrf.mxu1 }
 0x186   :  { %1389 = vst.msk [vmem:[%s2750_s3 + $0x120] sm:$0xff] %vm1352_vm1, %v1288_v32  ;;  %1439 = vst.msk [vmem:[%s2750_s3 + $0x2b0] sm:$0xff] %vm1352_vm1, %v1338_v33  ;;  %v1001_v36 = vadd.f32 %v2245_v53, %v1000_v34  ;;  %v1201_v37 = vadd.f32 %v2245_v53, %v1200_v35 }
 0x187   :  { %v1002_v38 = vpop.f32.mrf.mxu0  ;;  %v1202_v39 = vpop.f32.mrf.mxu1 }
 0x188   :  { %v1289_v40 = vmax.f32 %v1001_v36, 0.0  ;;  %v1339_v41 = vmax.f32 %v1201_v37, 0.0 }
 0x189   :  { %v1005_v42 = vpop.f32.mrf.mxu0  ;;  %v1205_v43 = vpop.f32.mrf.mxu1 }
 0x18a   :  { %1390 = vst.msk [vmem:[%s2750_s3 + $0x128] sm:$0xff] %vm1352_vm1, %v1289_v40  ;;  %1440 = vst.msk [vmem:[%s2750_s3 + $0x2b8] sm:$0xff] %vm1352_vm1, %v1339_v41  ;;  %v1006_v44 = vadd.f32 %v2245_v53, %v1005_v42  ;;  %v1206_v45 = vadd.f32 %v2245_v53, %v1205_v43 }
 0x18b   :  { %v1007_v46 = vpop.f32.mrf.mxu0  ;;  %v1207_v47 = vpop.f32.mrf.mxu1 }
 0x18c   :  { %v1290_v48 = vmax.f32 %v1006_v44, 0.0  ;;  %v1340_v49 = vmax.f32 %v1206_v45, 0.0 }
 0x18d   :  { %v1008_v50 = vpop.f32.mrf.mxu0  ;;  %v1208_v51 = vpop.f32.mrf.mxu1 }
 0x18e   :  { %1391 = vst.msk [vmem:[%s2750_s3 + $0x130] sm:$0xff] %vm1352_vm1, %v1290_v48  ;;  %1441 = vst.msk [vmem:[%s2750_s3 + $0x2c0] sm:$0xff] %vm1352_vm1, %v1340_v49  ;;  %v1009_v52 = vadd.f32 %v2245_v53, %v1008_v50  ;;  %v1209_v54 = vadd.f32 %v2245_v53, %v1208_v51 }
 0x18f   :  { %v1010_v55 = vpop.f32.mrf.mxu0  ;;  %v1210_v56 = vpop.f32.mrf.mxu1 }
 0x190   :  { %v1291_v57 = vmax.f32 %v1009_v52, 0.0  ;;  %v1341_v58 = vmax.f32 %v1209_v54, 0.0 }
 0x191   :  { %v1013_v59 = vpop.f32.mrf.mxu0  ;;  %v1213_v60 = vpop.f32.mrf.mxu1 }
 0x192   :  { %1392 = vst.msk [vmem:[%s2750_s3 + $0x138] sm:$0xff] %vm1352_vm1, %v1291_v57  ;;  %1442 = vst.msk [vmem:[%s2750_s3 + $0x2c8] sm:$0xff] %vm1352_vm1, %v1341_v58  ;;  %v1014_v61 = vadd.f32 %v2245_v53, %v1013_v59  ;;  %v1214_v62 = vadd.f32 %v2245_v53, %v1213_v60 }
 0x193   :  { %v1015_v63 = vpop.f32.mrf.mxu0  ;;  %v1215_v0 = vpop.f32.mrf.mxu1 }
 0x194   :  { %v1292_v1 = vmax.f32 %v1014_v61, 0.0  ;;  %v1342_v2 = vmax.f32 %v1214_v62, 0.0 }
 0x195   :  { %v1016_v3 = vpop.f32.mrf.mxu0  ;;  %v1216_v4 = vpop.f32.mrf.mxu1 }
 0x196   :  { %1393 = vst.msk [vmem:[%s2750_s3 + $0x140] sm:$0xff] %vm1352_vm1, %v1292_v1  ;;  %1443 = vst.msk [vmem:[%s2750_s3 + $0x2d0] sm:$0xff] %vm1352_vm1, %v1342_v2  ;;  %v1017_v5 = vadd.f32 %v2245_v53, %v1016_v3  ;;  %v1217_v6 = vadd.f32 %v2245_v53, %v1216_v4 }
 0x197   :  { %v1018_v7 = vpop.f32.mrf.mxu0  ;;  %v1218_v8 = vpop.f32.mrf.mxu1 }
 0x198   :  { %v1293_v9 = vmax.f32 %v1017_v5, 0.0  ;;  %v1343_v10 = vmax.f32 %v1217_v6, 0.0 }
 0x199   :  { %v1021_v11 = vpop.f32.mrf.mxu0  ;;  %v1221_v12 = vpop.f32.mrf.mxu1 }
 0x19a   :  { %1394 = vst.msk [vmem:[%s2750_s3 + $0x148] sm:$0xff] %vm1352_vm1, %v1293_v9  ;;  %1444 = vst.msk [vmem:[%s2750_s3 + $0x2d8] sm:$0xff] %vm1352_vm1, %v1343_v10  ;;  %v1022_v13 = vadd.f32 %v2245_v53, %v1021_v11  ;;  %v1222_v14 = vadd.f32 %v2245_v53, %v1221_v12 }
 0x19b   :  { %v1023_v15 = vpop.f32.mrf.mxu0  ;;  %v1223_v16 = vpop.f32.mrf.mxu1 }
 0x19c   :  { %v1294_v17 = vmax.f32 %v1022_v13, 0.0  ;;  %v1344_v18 = vmax.f32 %v1222_v14, 0.0 }
 0x19d   :  { %v1024_v19 = vpop.f32.mrf.mxu0  ;;  %v1224_v20 = vpop.f32.mrf.mxu1 }
 0x19e   :  { %1395 = vst.msk [vmem:[%s2750_s3 + $0x150] sm:$0xff] %vm1352_vm1, %v1294_v17  ;;  %1445 = vst.msk [vmem:[%s2750_s3 + $0x2e0] sm:$0xff] %vm1352_vm1, %v1344_v18  ;;  %v1025_v21 = vadd.f32 %v2245_v53, %v1024_v19  ;;  %v1225_v22 = vadd.f32 %v2245_v53, %v1224_v20 }
 0x19f   :  { %v1026_v23 = vpop.f32.mrf.mxu0  ;;  %v1226_v24 = vpop.f32.mrf.mxu1 }
 0x1a0   :  { %v1295_v25 = vmax.f32 %v1025_v21, 0.0  ;;  %v1345_v26 = vmax.f32 %v1225_v22, 0.0 }
 0x1a1   :  { %v1029_v27 = vpop.f32.mrf.mxu0  ;;  %v1229_v28 = vpop.f32.mrf.mxu1 }
 0x1a2   :  { %1396 = vst.msk [vmem:[%s2750_s3 + $0x158] sm:$0xff] %vm1352_vm1, %v1295_v25  ;;  %1446 = vst.msk [vmem:[%s2750_s3 + $0x2e8] sm:$0xff] %vm1352_vm1, %v1345_v26  ;;  %v1030_v29 = vadd.f32 %v2245_v53, %v1029_v27  ;;  %v1230_v30 = vadd.f32 %v2245_v53, %v1229_v28 }
 0x1a3   :  { %v1031_v31 = vpop.f32.mrf.mxu0  ;;  %v1231_v32 = vpop.f32.mrf.mxu1 }
 0x1a4   :  { %v1296_v33 = vmax.f32 %v1030_v29, 0.0  ;;  %v1346_v34 = vmax.f32 %v1230_v30, 0.0 }
 0x1a5   :  { %v1032_v35 = vpop.f32.mrf.mxu0  ;;  %v1232_v36 = vpop.f32.mrf.mxu1 }
 0x1a6   :  { %1397 = vst.msk [vmem:[%s2750_s3 + $0x160] sm:$0xff] %vm1352_vm1, %v1296_v33  ;;  %1447 = vst.msk [vmem:[%s2750_s3 + $0x2f0] sm:$0xff] %vm1352_vm1, %v1346_v34  ;;  %v1033_v37 = vadd.f32 %v2245_v53, %v1032_v35  ;;  %v1233_v38 = vadd.f32 %v2245_v53, %v1232_v36 }
 0x1a7   :  { %v1034_v39 = vpop.f32.mrf.mxu0  ;;  %v1234_v40 = vpop.f32.mrf.mxu1 }
 0x1a8   :  { %v1297_v41 = vmax.f32 %v1033_v37, 0.0  ;;  %v1347_v42 = vmax.f32 %v1233_v38, 0.0 }
 0x1a9   :  { %v1037_v43 = vpop.f32.mrf.mxu0  ;;  %v1237_v44 = vpop.f32.mrf.mxu1 }
 0x1aa   :  { %1398 = vst.msk [vmem:[%s2750_s3 + $0x168] sm:$0xff] %vm1352_vm1, %v1297_v41  ;;  %1448 = vst.msk [vmem:[%s2750_s3 + $0x2f8] sm:$0xff] %vm1352_vm1, %v1347_v42  ;;  %v1038_v45 = vadd.f32 %v2245_v53, %v1037_v43  ;;  %v1238_v46 = vadd.f32 %v2245_v53, %v1237_v44 }
 0x1ab   :  { %v1039_v47 = vpop.f32.mrf.mxu0  ;;  %v1239_v48 = vpop.f32.mrf.mxu1 }
 0x1ac   :  { %v1298_v49 = vmax.f32 %v1038_v45, 0.0  ;;  %v1348_v50 = vmax.f32 %v1238_v46, 0.0 }
 0x1ad   :  { %v1040_v51 = vpop.f32.mrf.mxu0  ;;  %v1240_v52 = vpop.f32.mrf.mxu1 }
 0x1ae   :  { %1399 = vst.msk [vmem:[%s2750_s3 + $0x170] sm:$0xff] %vm1352_vm1, %v1298_v49  ;;  %1449 = vst.msk [vmem:[%s2750_s3 + $0x300] sm:$0xff] %vm1352_vm1, %v1348_v50  ;;  %v1041_v54 = vadd.f32 %v2245_v53, %v1040_v51  ;;  %v1241_v55 = vadd.f32 %v2245_v53, %v1240_v52 }
 0x1af   :  { %v1042_v56 = vpop.f32.mrf.mxu0  ;;  %v1242_v57 = vpop.f32.mrf.mxu1 }
 0x1b0   :  { %v1299_v58 = vmax.f32 %v1041_v54, 0.0  ;;  %v1349_v59 = vmax.f32 %v1241_v55, 0.0 }
 0x1b1   :  { %v1045_v60 = vpop.f32.mrf.mxu0  ;;  %v1245_v61 = vpop.f32.mrf.mxu1 }
 0x1b2   :  { %1400 = vst.msk [vmem:[%s2750_s3 + $0x178] sm:$0xff] %vm1352_vm1, %v1299_v58  ;;  %1450 = vst.msk [vmem:[%s2750_s3 + $0x308] sm:$0xff] %vm1352_vm1, %v1349_v59  ;;  %v1046_v62 = vadd.f32 %v2245_v53, %v1045_v60  ;;  %v1246_v63 = vadd.f32 %v2245_v53, %v1245_v61 }
 0x1b3   :  { %v1047_v0 = vpop.f32.mrf.mxu0  ;;  %v1247_v1 = vpop.f32.mrf.mxu1 }
 0x1b4   :  { %v1300_v2 = vmax.f32 %v1046_v62, 0.0  ;;  %v1350_v3 = vmax.f32 %v1246_v63, 0.0 }
 0x1b5   :  { %v1048_v4 = vpop.f32.mrf.mxu0  ;;  %v1248_v5 = vpop.f32.mrf.mxu1 }
 0x1b6   :  { %1401 = vst.msk [vmem:[%s2750_s3 + $0x180] sm:$0xff] %vm1352_vm1, %v1300_v2  ;;  %1451 = vst.msk [vmem:[%s2750_s3 + $0x310] sm:$0xff] %vm1352_vm1, %v1350_v3  ;;  %v1049_v6 = vadd.f32 %v2245_v53, %v1048_v4  ;;  %v1249_v7 = vadd.f32 %v2245_v53, %v1248_v5 }
 0x1b7   :  { %v1050_v8 = vpop.f32.mrf.mxu0  ;;  %v1250_v9 = vpop.f32.mrf.mxu1 }
 0x1b8   :  { %v1301_v10 = vmax.f32 %v1049_v6, 0.0  ;;  %v1351_v11 = vmax.f32 %v1249_v7, 0.0 }
 0x1ba   :  { %1402 = vst.msk [vmem:[%s2750_s3 + $0x188] sm:$0xff] %vm1352_vm1, %v1301_v10  ;;  %1452 = vst.msk [vmem:[%s2750_s3 + $0x318] sm:$0xff] %vm1352_vm1, %v1351_v11 }

// kernel: encoder_forward.5
= control target key start
LH: loop header
LB: loop body
LE: loop exit
PB: predicated region body
PF: predicated region fallthrough
CT: control target
= control target key end

     0   :  { %vm795_vm0 = vcmask 523264   ;;  %s1510_s1 = inlined_call_operand.vmem [shape: bf16[512,64], index: 1, kind: input, shape index: {}]   ;;  %s1511_s0 = inlined_call_operand.vmem [shape: bf16[168,512], index: 0, kind: input, shape index: {}]   ;;  %s1512_s2 = inlined_call_operand.vmem [shape: f32[1,64], index: 2, kind: input, shape index: {}]   ;;  %s1513_s3 = inlined_call_operand.vmem [shape: f32[168,64], index: 3, kind: output, shape index: {}]  }
   0x1   :  { %v1062_v0 = vld [vmem:[%s1510_s1 + $0x78] sm:$0xff]   ;;  %v1066_v4 = vld [vmem:[%s1510_s1 + $0x70] sm:$0xff]   ;;  %v1070_v8 = vld [vmem:[%s1510_s1 + $0x68] sm:$0xff]  }
   0x2   :  { %v1063_v1 = vld [vmem:[%s1510_s1 + $0xf8] sm:$0xff]   ;;  %898 = vmatprep.subr.bf16.mxu0 %v1062_v0  ;;  %v1067_v5 = vld [vmem:[%s1510_s1 + $0xf0] sm:$0xff]   ;;  %v1071_v9 = vld [vmem:[%s1510_s1 + $0xe8] sm:$0xff]  }
   0x3   :  { %v1064_v2 = vld [vmem:[%s1510_s1 + $0x38] sm:$0xff]   ;;  %980 = vmatprep.subr.bf16.mxu1 %v1063_v1  ;;  %v1068_v6 = vld [vmem:[%s1510_s1 + $0x30] sm:$0xff]   ;;  %v1072_v10 = vld [vmem:[%s1510_s1 + $0x28] sm:$0xff]  }
   0x4   :  { %v1065_v3 = vld [vmem:[%s1510_s1 + $0xb8] sm:$0xff]   ;;  %899 = vmatpush3.bf16.msra.mxu0 %v1064_v2  ;;  %v1069_v7 = vld [vmem:[%s1510_s1 + $0xb0] sm:$0xff]   ;;  %v1073_v11 = vld [vmem:[%s1510_s1 + $0xa8] sm:$0xff]  }
   0x5   :  { %981 = vmatpush3.bf16.msra.mxu1 %v1065_v3  ;;  %900 = vmatprep.subr.bf16.mxu0 %v1066_v4  ;;  %v1074_v12 = vld [vmem:[%s1510_s1 + $0x60] sm:$0xff]   ;;  %v1078_v16 = vld [vmem:[%s1510_s1 + $0x58] sm:$0xff]   ;;  %v1082_v20 = vld [vmem:[%s1510_s1 + $0x50] sm:$0xff]  }
   0x6   :  { %982 = vmatprep.subr.bf16.mxu1 %v1067_v5  ;;  %v1075_v13 = vld [vmem:[%s1510_s1 + $0xe0] sm:$0xff]   ;;  %v1079_v17 = vld [vmem:[%s1510_s1 + $0xd8] sm:$0xff]   ;;  %v1083_v21 = vld [vmem:[%s1510_s1 + $0xd0] sm:$0xff]  }
   0x7   :  { %v1076_v14 = vld [vmem:[%s1510_s1 + $0x20] sm:$0xff]   ;;  %v1080_v18 = vld [vmem:[%s1510_s1 + $0x18] sm:$0xff]   ;;  %v1084_v22 = vld [vmem:[%s1510_s1 + $0x10] sm:$0xff]  }
   0x8   :  { %901 = vmatpush3.bf16.msra.mxu0 %v1068_v6  ;;  %v1077_v15 = vld [vmem:[%s1510_s1 + $0xa0] sm:$0xff]   ;;  %v1081_v19 = vld [vmem:[%s1510_s1 + $0x98] sm:$0xff]   ;;  %v1085_v23 = vld [vmem:[%s1510_s1 + $0x90] sm:$0xff]  }
   0x9   :  { %983 = vmatpush3.bf16.msra.mxu1 %v1069_v7  ;;  %902 = vmatprep.subr.bf16.mxu0 %v1070_v8  ;;  %v1086_v24 = vld [vmem:[%s1510_s1 + $0x48] sm:$0xff]   ;;  %v1090_v28 = vld [vmem:[%s1510_s1 + $0x40] sm:$0xff]  }
   0xa   :  { %984 = vmatprep.subr.bf16.mxu1 %v1071_v9  ;;  %v1087_v25 = vld [vmem:[%s1510_s1 + $0xc8] sm:$0xff]   ;;  %v1091_v29 = vld [vmem:[%s1510_s1 + $0xc0] sm:$0xff]  }
   0xb   :  { %v1088_v26 = vld [vmem:[%s1510_s1 + $0x8] sm:$0xff]   ;;  %v1092_v30 = vld [vmem:[%s1510_s1] sm:$0xff]  }
   0xc   :  { %903 = vmatpush3.bf16.msra.mxu0 %v1072_v10  ;;  %v1089_v27 = vld [vmem:[%s1510_s1 + $0x88] sm:$0xff]   ;;  %v1093_v31 = vld [vmem:[%s1510_s1 + $0x80] sm:$0xff]  }
   0xd   :  { %985 = vmatpush3.bf16.msra.mxu1 %v1073_v11  ;;  %904 = vmatprep.subr.bf16.mxu0 %v1074_v12  ;;  %v1094_v32 = vld [vmem:[%s1511_s0] ss:$16 sps:$4 sm:$0xff]   ;;  %v1096_v33 = vld [vmem:[%s1511_s0 + $0x4] ss:$16 sps:$4 sm:$0xff]   ;;  %v1097_v34 = vld [vmem:[%s1511_s0 + $0x8] ss:$16 sps:$4 sm:$0xff]  }
   0xe   :  { %986 = vmatprep.subr.bf16.mxu1 %v1075_v13  ;;  %v1099_v35 = vld [vmem:[%s1511_s0 + $0xc] ss:$16 sps:$4 sm:$0xff]   ;;  %566 = vmatprep.mubr.bf16.mxu0 %v1096_v33  ;;  %v1100_v36 = vld [vmem:[%s1511_s0 + $0x24] ss:$16 sps:$4 sm:$0xff]   ;;  %v1104_v38 = vld [vmem:[%s1511_s0 + $0x20] ss:$16 sps:$4 sm:$0xff]  }
   0xf   :  { %686 = vmatprep.mubr.bf16.mxu1 %v1099_v35  ;;  %v1102_v37 = vld [vmem:[%s1511_s0 + $0x2c] ss:$16 sps:$4 sm:$0xff]   ;;  %v1105_v39 = vld [vmem:[%s1511_s0 + $0x28] ss:$16 sps:$4 sm:$0xff]   ;;  %v1106_v40 = vld [vmem:[%s1511_s0 + $0x44] ss:$16 sps:$4 sm:$0xff]  }
  0x10   :  { %905 = vmatpush3.bf16.msra.mxu0 %v1076_v14  ;;  %v1108_v41 = vld [vmem:[%s1511_s0 + $0x4c] ss:$16 sps:$4 sm:$0xff]   ;;  %v1110_v42 = vld [vmem:[%s1511_s0 + $0x40] ss:$16 sps:$4 sm:$0xff]   ;;  %v1111_v43 = vld [vmem:[%s1511_s0 + $0x48] ss:$16 sps:$4 sm:$0xff]  }
  0x11   :  { %987 = vmatpush3.bf16.msra.mxu1 %v1077_v15  ;;  %906 = vmatprep.subr.bf16.mxu0 %v1078_v16  ;;  %v1112_v44 = vld [vmem:[%s1511_s0 + $0x64] ss:$16 sps:$4 sm:$0xff]   ;;  %v1114_v45 = vld [vmem:[%s1511_s0 + $0x6c] ss:$16 sps:$4 sm:$0xff]   ;;  %v1116_v46 = vld [vmem:[%s1511_s0 + $0x60] ss:$16 sps:$4 sm:$0xff]  }
  0x12   :  { %988 = vmatprep.subr.bf16.mxu1 %v1079_v17  ;;  %v1117_v47 = vld [vmem:[%s1511_s0 + $0x68] ss:$16 sps:$4 sm:$0xff]   ;;  %v1118_v48 = vld [vmem:[%s1511_s0 + $0x84] ss:$16 sps:$4 sm:$0xff]   ;;  %v1120_v49 = vld [vmem:[%s1511_s0 + $0x8c] ss:$16 sps:$4 sm:$0xff]  }
  0x13   :  { %v1122_v50 = vld [vmem:[%s1511_s0 + $0x80] ss:$16 sps:$4 sm:$0xff]   ;;  %v1123_v51 = vld [vmem:[%s1511_s0 + $0x88] ss:$16 sps:$4 sm:$0xff]   ;;  %v1124_v52 = vld [vmem:[%s1511_s0 + $0xa4] ss:$16 sps:$4 sm:$0xff]  }
  0x14   :  { %907 = vmatpush3.bf16.msra.mxu0 %v1080_v18  ;;  %v1126_v53 = vld [vmem:[%s1511_s0 + $0xac] ss:$16 sps:$4 sm:$0xff]   ;;  %v1128_v54 = vld [vmem:[%s1511_s0 + $0xa0] ss:$16 sps:$4 sm:$0xff]   ;;  %v1129_v55 = vld [vmem:[%s1511_s0 + $0xa8] ss:$16 sps:$4 sm:$0xff]  }
  0x15   :  { %989 = vmatpush3.bf16.msra.mxu1 %v1081_v19  ;;  %908 = vmatprep.subr.bf16.mxu0 %v1082_v20  ;;  %v1130_v56 = vld [vmem:[%s1511_s0 + $0xc4] ss:$16 sps:$4 sm:$0xff]   ;;  %v1132_v57 = vld [vmem:[%s1511_s0 + $0xcc] ss:$16 sps:$4 sm:$0xff]   ;;  %v1134_v58 = vld [vmem:[%s1511_s0 + $0xc0] ss:$16 sps:$4 sm:$0xff]  }
  0x16   :  { %990 = vmatprep.subr.bf16.mxu1 %v1083_v21  ;;  %v1135_v59 = vld [vmem:[%s1511_s0 + $0xc8] ss:$16 sps:$4 sm:$0xff]   ;;  %v1136_v60 = vld [vmem:[%s1511_s0 + $0xe4] ss:$16 sps:$4 sm:$0xff]   ;;  %v1138_v61 = vld [vmem:[%s1511_s0 + $0xec] ss:$16 sps:$4 sm:$0xff]  }
  0x17   :  { %v1140_v62 = vld [vmem:[%s1511_s0 + $0xe0] ss:$16 sps:$4 sm:$0xff]   ;;  %v1141_v63 = vld [vmem:[%s1511_s0 + $0xe8] ss:$16 sps:$4 sm:$0xff]   ;;  %v1142_v0 = vld [vmem:[%s1511_s0 + $0x104] ss:$16 sps:$4 sm:$0xff]  }
  0x18   :  { %909 = vmatpush3.bf16.msra.mxu0 %v1084_v22  ;;  %v1144_v1 = vld [vmem:[%s1511_s0 + $0x10c] ss:$16 sps:$4 sm:$0xff]   ;;  %v1146_v2 = vld [vmem:[%s1511_s0 + $0x100] ss:$16 sps:$4 sm:$0xff]   ;;  %v1147_v3 = vld [vmem:[%s1511_s0 + $0x108] ss:$16 sps:$4 sm:$0xff]  }
  0x19   :  { %991 = vmatpush3.bf16.msra.mxu1 %v1085_v23  ;;  %910 = vmatprep.subr.bf16.mxu0 %v1086_v24  ;;  %v1148_v4 = vld [vmem:[%s1511_s0 + $0x124] ss:$16 sps:$4 sm:$0xff]   ;;  %v1150_v5 = vld [vmem:[%s1511_s0 + $0x12c] ss:$16 sps:$4 sm:$0xff]   ;;  %v1152_v8 = vld [vmem:[%s1511_s0 + $0x120] ss:$16 sps:$4 sm:$0xff]  }
  0x1a   :  { %992 = vmatprep.subr.bf16.mxu1 %v1087_v25  ;;  %v55_v6 = vld [vmem:[%s1511_s0 + $0x140] sm:$0xff]  ;;  %v56_v7 = vld [vmem:[%s1511_s0 + $0x148] sm:$0xff] }
  0x1b   :  { %v1153_v9 = vld [vmem:[%s1511_s0 + $0x128] ss:$16 sps:$4 sm:$0xff]   ;;  %v863_v10 = vcombine.high %v55_v6, %v55_v6  ;;  %v865_v11 = vcombine.high %v56_v7, %v56_v7  ;;  %v862_v12 = vcombine.low %v55_v6, %v55_v6  ;;  %v864_v13 = vcombine.low %v56_v7, %v56_v7  ;;  %v1403_v16 = vld [vmem:[%s1512_s2] ss:$0 sm:$0xff] }
  0x1c   :  { %911 = vmatpush3.bf16.msra.mxu0 %v1088_v26 }
  0x1d   :  { %993 = vmatpush3.bf16.msra.mxu1 %v1089_v27  ;;  %912 = vmatprep.subr.bf16.mxu0 %v1090_v28 }
  0x1e   :  { %994 = vmatprep.subr.bf16.mxu1 %v1091_v29 }
  0x20   :  { %913 = vmatpush3.bf16.msra.mxu0 %v1092_v30 }
  0x21   :  { %995 = vmatpush3.bf16.msra.mxu1 %v1093_v31 }
  0x23   :  { %567 = vmatmul.mubr.bf16.vlgmr.msra.gmra.mxu0 %v1094_v32 }
  0x24   :  { %687 = vmatmul.mubr.bf16.vlgmr.msra.gmra.mxu1 %v1097_v34  ;;  %574 = vmatprep.mubr.bf16.mxu0 %v1100_v36 }
  0x25   :  { %694 = vmatprep.mubr.bf16.mxu1 %v1102_v37 }
  0x2b   :  { %575 = vmatmul.mubr.bf16.gmra.mxu0 %v1104_v38 }
  0x2c   :  { %695 = vmatmul.mubr.bf16.gmra.mxu1 %v1105_v39  ;;  %582 = vmatprep.mubr.bf16.mxu0 %v1106_v40 }
  0x2d   :  { %702 = vmatprep.mubr.bf16.mxu1 %v1108_v41 }
  0x33   :  { %583 = vmatmul.mubr.bf16.gmra.mxu0 %v1110_v42 }
  0x34   :  { %703 = vmatmul.mubr.bf16.gmra.mxu1 %v1111_v43  ;;  %590 = vmatprep.mubr.bf16.mxu0 %v1112_v44 }
  0x35   :  { %710 = vmatprep.mubr.bf16.mxu1 %v1114_v45 }
  0x3b   :  { %591 = vmatmul.mubr.bf16.gmra.mxu0 %v1116_v46 }
  0x3c   :  { %711 = vmatmul.mubr.bf16.gmra.mxu1 %v1117_v47  ;;  %598 = vmatprep.mubr.bf16.mxu0 %v1118_v48 }
  0x3d   :  { %718 = vmatprep.mubr.bf16.mxu1 %v1120_v49 }
  0x43   :  { %599 = vmatmul.mubr.bf16.gmra.mxu0 %v1122_v50 }
  0x44   :  { %719 = vmatmul.mubr.bf16.gmra.mxu1 %v1123_v51  ;;  %606 = vmatprep.mubr.bf16.mxu0 %v1124_v52 }
  0x45   :  { %726 = vmatprep.mubr.bf16.mxu1 %v1126_v53 }
  0x4b   :  { %607 = vmatmul.mubr.bf16.gmra.mxu0 %v1128_v54 }
  0x4c   :  { %727 = vmatmul.mubr.bf16.gmra.mxu1 %v1129_v55  ;;  %614 = vmatprep.mubr.bf16.mxu0 %v1130_v56 }
  0x4d   :  { %734 = vmatprep.mubr.bf16.mxu1 %v1132_v57 }
  0x53   :  { %615 = vmatmul.mubr.bf16.gmra.mxu0 %v1134_v58 }
  0x54   :  { %735 = vmatmul.mubr.bf16.gmra.mxu1 %v1135_v59  ;;  %622 = vmatprep.mubr.bf16.mxu0 %v1136_v60 }
  0x55   :  { %742 = vmatprep.mubr.bf16.mxu1 %v1138_v61 }
  0x5b   :  { %623 = vmatmul.mubr.bf16.gmra.mxu0 %v1140_v62 }
  0x5c   :  { %743 = vmatmul.mubr.bf16.gmra.mxu1 %v1141_v63  ;;  %630 = vmatprep.mubr.bf16.mxu0 %v1142_v0 }
  0x5d   :  { %750 = vmatprep.mubr.bf16.mxu1 %v1144_v1 }
  0x63   :  { %631 = vmatmul.mubr.bf16.gmra.mxu0 %v1146_v2 }
  0x64   :  { %751 = vmatmul.mubr.bf16.gmra.mxu1 %v1147_v3  ;;  %638 = vmatprep.mubr.bf16.mxu0 %v1148_v4 }
  0x65   :  { %758 = vmatprep.mubr.bf16.mxu1 %v1150_v5 }
  0x6b   :  { %639 = vmatmul.mubr.bf16.gmra.mxu0 %v1152_v8 }
  0x6c   :  { %759 = vmatmul.mubr.bf16.gmra.mxu1 %v1153_v9  ;;  %646 = vmatprep.mubr.bf16.mxu0 %v863_v10 }
  0x6d   :  { %766 = vmatprep.mubr.bf16.mxu1 %v865_v11 }
  0x73   :  { %647 = vmatmul.mubr.bf16.gmra.mxu0 %v862_v12 }
  0x74   :  { %767 = vmatmul.mubr.bf16.gmra.mxu1 %v864_v13 }
  0xe3   :  { %v914_v14 = vpop.f32.mrf.mxu0 }
  0xe4   :  { %v996_v15 = vpop.f32.mrf.mxu1 }
  0xe5   :  { %v915_v17 = vpop.f32.mrf.mxu0 }
  0xe6   :  { %v916_v18 = vadd.f32 %v915_v17, %v914_v14  ;;  %v997_v19 = vpop.f32.mrf.mxu1 }
  0xe7   :  { %v917_v20 = vpop.f32.mrf.mxu0  ;;  %v998_v22 = vadd.f32 %v997_v19, %v996_v15 }
  0xe8   :  { %v569_v21 = vadd.f32 %v916_v18, %v1403_v16  ;;  %v999_v23 = vpop.f32.mrf.mxu1 }
  0xe9   :  { %v918_v24 = vpop.f32.mrf.mxu0 }
  0xea   :  { %v689_v25 = vadd.f32 %v998_v22, %v569_v21  ;;  %v919_v26 = vadd.f32 %v918_v24, %v917_v20  ;;  %v1000_v27 = vpop.f32.mrf.mxu1 }
  0xeb   :  { %v920_v28 = vpop.f32.mrf.mxu0  ;;  %v1001_v31 = vadd.f32 %v1000_v27, %v999_v23 }
  0xec   :  { %v774_v29 = vmax.f32 %v689_v25, 0.0  ;;  %v572_v30 = vadd.f32 %v919_v26, %v1403_v16  ;;  %v1002_v32 = vpop.f32.mrf.mxu1 }
  0xed   :  { %v921_v33 = vpop.f32.mrf.mxu0 }
  0xee   :  { %796 = vst.msk [vmem:[%s1513_s3] sm:$0xff] %vm795_vm0, %v774_v29  ;;  %v692_v34 = vadd.f32 %v1001_v31, %v572_v30  ;;  %v922_v35 = vadd.f32 %v921_v33, %v920_v28  ;;  %v1003_v36 = vpop.f32.mrf.mxu1 }
  0xef   :  { %v923_v37 = vpop.f32.mrf.mxu0  ;;  %v1004_v40 = vadd.f32 %v1003_v36, %v1002_v32 }
  0xf0   :  { %v775_v38 = vmax.f32 %v692_v34, 0.0  ;;  %v577_v39 = vadd.f32 %v922_v35, %v1403_v16  ;;  %v1005_v41 = vpop.f32.mrf.mxu1 }
  0xf1   :  { %v924_v42 = vpop.f32.mrf.mxu0 }
  0xf2   :  { %797 = vst.msk [vmem:[%s1513_s3 + $0x8] sm:$0xff] %vm795_vm0, %v775_v38  ;;  %v697_v43 = vadd.f32 %v1004_v40, %v577_v39  ;;  %v925_v44 = vadd.f32 %v924_v42, %v923_v37  ;;  %v1006_v45 = vpop.f32.mrf.mxu1 }
  0xf3   :  { %v926_v46 = vpop.f32.mrf.mxu0  ;;  %v1007_v49 = vadd.f32 %v1006_v45, %v1005_v41 }
  0xf4   :  { %v776_v47 = vmax.f32 %v697_v43, 0.0  ;;  %v580_v48 = vadd.f32 %v925_v44, %v1403_v16  ;;  %v1008_v50 = vpop.f32.mrf.mxu1 }
  0xf5   :  { %v927_v51 = vpop.f32.mrf.mxu0 }
  0xf6   :  { %798 = vst.msk [vmem:[%s1513_s3 + $0x10] sm:$0xff] %vm795_vm0, %v776_v47  ;;  %v700_v52 = vadd.f32 %v1007_v49, %v580_v48  ;;  %v928_v53 = vadd.f32 %v927_v51, %v926_v46  ;;  %v1009_v54 = vpop.f32.mrf.mxu1 }
  0xf7   :  { %v929_v55 = vpop.f32.mrf.mxu0  ;;  %v1010_v58 = vadd.f32 %v1009_v54, %v1008_v50 }
  0xf8   :  { %v777_v56 = vmax.f32 %v700_v52, 0.0  ;;  %v585_v57 = vadd.f32 %v928_v53, %v1403_v16  ;;  %v1011_v59 = vpop.f32.mrf.mxu1 }
  0xf9   :  { %v930_v60 = vpop.f32.mrf.mxu0 }
  0xfa   :  { %799 = vst.msk [vmem:[%s1513_s3 + $0x18] sm:$0xff] %vm795_vm0, %v777_v56  ;;  %v705_v61 = vadd.f32 %v1010_v58, %v585_v57  ;;  %v931_v62 = vadd.f32 %v930_v60, %v929_v55  ;;  %v1012_v63 = vpop.f32.mrf.mxu1 }
  0xfb   :  { %v932_v0 = vpop.f32.mrf.mxu0  ;;  %v1013_v3 = vadd.f32 %v1012_v63, %v1011_v59 }
  0xfc   :  { %v778_v1 = vmax.f32 %v705_v61, 0.0  ;;  %v588_v2 = vadd.f32 %v931_v62, %v1403_v16  ;;  %v1014_v4 = vpop.f32.mrf.mxu1 }
  0xfd   :  { %v933_v5 = vpop.f32.mrf.mxu0 }
  0xfe   :  { %800 = vst.msk [vmem:[%s1513_s3 + $0x20] sm:$0xff] %vm795_vm0, %v778_v1  ;;  %v708_v6 = vadd.f32 %v1013_v3, %v588_v2  ;;  %v934_v7 = vadd.f32 %v933_v5, %v932_v0  ;;  %v1015_v8 = vpop.f32.mrf.mxu1 }
  0xff   :  { %v935_v9 = vpop.f32.mrf.mxu0  ;;  %v1016_v12 = vadd.f32 %v1015_v8, %v1014_v4 }
 0x100   :  { %v779_v10 = vmax.f32 %v708_v6, 0.0  ;;  %v593_v11 = vadd.f32 %v934_v7, %v1403_v16  ;;  %v1017_v13 = vpop.f32.mrf.mxu1 }
 0x101   :  { %v936_v14 = vpop.f32.mrf.mxu0 }
 0x102   :  { %801 = vst.msk [vmem:[%s1513_s3 + $0x28] sm:$0xff] %vm795_vm0, %v779_v10  ;;  %v713_v15 = vadd.f32 %v1016_v12, %v593_v11  ;;  %v937_v17 = vadd.f32 %v936_v14, %v935_v9  ;;  %v1018_v18 = vpop.f32.mrf.mxu1 }
 0x103   :  { %v938_v19 = vpop.f32.mrf.mxu0  ;;  %v1019_v22 = vadd.f32 %v1018_v18, %v1017_v13 }
 0x104   :  { %v780_v20 = vmax.f32 %v713_v15, 0.0  ;;  %v596_v21 = vadd.f32 %v937_v17, %v1403_v16  ;;  %v1020_v23 = vpop.f32.mrf.mxu1 }
 0x105   :  { %v939_v24 = vpop.f32.mrf.mxu0 }
 0x106   :  { %802 = vst.msk [vmem:[%s1513_s3 + $0x30] sm:$0xff] %vm795_vm0, %v780_v20  ;;  %v716_v25 = vadd.f32 %v1019_v22, %v596_v21  ;;  %v940_v26 = vadd.f32 %v939_v24, %v938_v19  ;;  %v1021_v27 = vpop.f32.mrf.mxu1 }
 0x107   :  { %v941_v28 = vpop.f32.mrf.mxu0  ;;  %v1022_v31 = vadd.f32 %v1021_v27, %v1020_v23 }
 0x108   :  { %v781_v29 = vmax.f32 %v716_v25, 0.0  ;;  %v601_v30 = vadd.f32 %v940_v26, %v1403_v16  ;;  %v1023_v32 = vpop.f32.mrf.mxu1 }
 0x109   :  { %v942_v33 = vpop.f32.mrf.mxu0 }
 0x10a   :  { %803 = vst.msk [vmem:[%s1513_s3 + $0x38] sm:$0xff] %vm795_vm0, %v781_v29  ;;  %v721_v34 = vadd.f32 %v1022_v31, %v601_v30  ;;  %v943_v35 = vadd.f32 %v942_v33, %v941_v28  ;;  %v1024_v36 = vpop.f32.mrf.mxu1 }
 0x10b   :  { %v944_v37 = vpop.f32.mrf.mxu0  ;;  %v1025_v40 = vadd.f32 %v1024_v36, %v1023_v32 }
 0x10c   :  { %v782_v38 = vmax.f32 %v721_v34, 0.0  ;;  %v604_v39 = vadd.f32 %v943_v35, %v1403_v16  ;;  %v1026_v41 = vpop.f32.mrf.mxu1 }
 0x10d   :  { %v945_v42 = vpop.f32.mrf.mxu0 }
 0x10e   :  { %804 = vst.msk [vmem:[%s1513_s3 + $0x40] sm:$0xff] %vm795_vm0, %v782_v38  ;;  %v724_v43 = vadd.f32 %v1025_v40, %v604_v39  ;;  %v946_v44 = vadd.f32 %v945_v42, %v944_v37  ;;  %v1027_v45 = vpop.f32.mrf.mxu1 }
 0x10f   :  { %v947_v46 = vpop.f32.mrf.mxu0  ;;  %v1028_v49 = vadd.f32 %v1027_v45, %v1026_v41 }
 0x110   :  { %v783_v47 = vmax.f32 %v724_v43, 0.0  ;;  %v609_v48 = vadd.f32 %v946_v44, %v1403_v16  ;;  %v1029_v50 = vpop.f32.mrf.mxu1 }
 0x111   :  { %v948_v51 = vpop.f32.mrf.mxu0 }
 0x112   :  { %805 = vst.msk [vmem:[%s1513_s3 + $0x48] sm:$0xff] %vm795_vm0, %v783_v47  ;;  %v729_v52 = vadd.f32 %v1028_v49, %v609_v48  ;;  %v949_v53 = vadd.f32 %v948_v51, %v947_v46  ;;  %v1030_v54 = vpop.f32.mrf.mxu1 }
 0x113   :  { %v950_v55 = vpop.f32.mrf.mxu0  ;;  %v1031_v58 = vadd.f32 %v1030_v54, %v1029_v50 }
 0x114   :  { %v784_v56 = vmax.f32 %v729_v52, 0.0  ;;  %v612_v57 = vadd.f32 %v949_v53, %v1403_v16  ;;  %v1032_v59 = vpop.f32.mrf.mxu1 }
 0x115   :  { %v951_v60 = vpop.f32.mrf.mxu0 }
 0x116   :  { %806 = vst.msk [vmem:[%s1513_s3 + $0x50] sm:$0xff] %vm795_vm0, %v784_v56  ;;  %v732_v61 = vadd.f32 %v1031_v58, %v612_v57  ;;  %v952_v62 = vadd.f32 %v951_v60, %v950_v55  ;;  %v1033_v63 = vpop.f32.mrf.mxu1 }
 0x117   :  { %v953_v0 = vpop.f32.mrf.mxu0  ;;  %v1034_v3 = vadd.f32 %v1033_v63, %v1032_v59 }
 0x118   :  { %v785_v1 = vmax.f32 %v732_v61, 0.0  ;;  %v617_v2 = vadd.f32 %v952_v62, %v1403_v16  ;;  %v1035_v4 = vpop.f32.mrf.mxu1 }
 0x119   :  { %v954_v5 = vpop.f32.mrf.mxu0 }
 0x11a   :  { %807 = vst.msk [vmem:[%s1513_s3 + $0x58] sm:$0xff] %vm795_vm0, %v785_v1  ;;  %v737_v6 = vadd.f32 %v1034_v3, %v617_v2  ;;  %v955_v7 = vadd.f32 %v954_v5, %v953_v0  ;;  %v1036_v8 = vpop.f32.mrf.mxu1 }
 0x11b   :  { %v956_v9 = vpop.f32.mrf.mxu0  ;;  %v1037_v12 = vadd.f32 %v1036_v8, %v1035_v4 }
 0x11c   :  { %v786_v10 = vmax.f32 %v737_v6, 0.0  ;;  %v620_v11 = vadd.f32 %v955_v7, %v1403_v16  ;;  %v1038_v13 = vpop.f32.mrf.mxu1 }
 0x11d   :  { %v957_v14 = vpop.f32.mrf.mxu0 }
 0x11e   :  { %808 = vst.msk [vmem:[%s1513_s3 + $0x60] sm:$0xff] %vm795_vm0, %v786_v10  ;;  %v740_v15 = vadd.f32 %v1037_v12, %v620_v11  ;;  %v958_v17 = vadd.f32 %v957_v14, %v956_v9  ;;  %v1039_v18 = vpop.f32.mrf.mxu1 }
 0x11f   :  { %v959_v19 = vpop.f32.mrf.mxu0  ;;  %v1040_v22 = vadd.f32 %v1039_v18, %v1038_v13 }
 0x120   :  { %v787_v20 = vmax.f32 %v740_v15, 0.0  ;;  %v625_v21 = vadd.f32 %v958_v17, %v1403_v16  ;;  %v1041_v23 = vpop.f32.mrf.mxu1 }
 0x121   :  { %v960_v24 = vpop.f32.mrf.mxu0 }
 0x122   :  { %809 = vst.msk [vmem:[%s1513_s3 + $0x68] sm:$0xff] %vm795_vm0, %v787_v20  ;;  %v745_v25 = vadd.f32 %v1040_v22, %v625_v21  ;;  %v961_v26 = vadd.f32 %v960_v24, %v959_v19  ;;  %v1042_v27 = vpop.f32.mrf.mxu1 }
 0x123   :  { %v962_v28 = vpop.f32.mrf.mxu0  ;;  %v1043_v31 = vadd.f32 %v1042_v27, %v1041_v23 }
 0x124   :  { %v788_v29 = vmax.f32 %v745_v25, 0.0  ;;  %v628_v30 = vadd.f32 %v961_v26, %v1403_v16  ;;  %v1044_v32 = vpop.f32.mrf.mxu1 }
 0x125   :  { %v963_v33 = vpop.f32.mrf.mxu0 }
 0x126   :  { %810 = vst.msk [vmem:[%s1513_s3 + $0x70] sm:$0xff] %vm795_vm0, %v788_v29  ;;  %v748_v34 = vadd.f32 %v1043_v31, %v628_v30  ;;  %v964_v35 = vadd.f32 %v963_v33, %v962_v28  ;;  %v1045_v36 = vpop.f32.mrf.mxu1 }
 0x127   :  { %v965_v37 = vpop.f32.mrf.mxu0  ;;  %v1046_v40 = vadd.f32 %v1045_v36, %v1044_v32 }
 0x128   :  { %v789_v38 = vmax.f32 %v748_v34, 0.0  ;;  %v633_v39 = vadd.f32 %v964_v35, %v1403_v16  ;;  %v1047_v41 = vpop.f32.mrf.mxu1 }
 0x129   :  { %v966_v42 = vpop.f32.mrf.mxu0 }
 0x12a   :  { %811 = vst.msk [vmem:[%s1513_s3 + $0x78] sm:$0xff] %vm795_vm0, %v789_v38  ;;  %v753_v43 = vadd.f32 %v1046_v40, %v633_v39  ;;  %v967_v44 = vadd.f32 %v966_v42, %v965_v37  ;;  %v1048_v45 = vpop.f32.mrf.mxu1 }
 0x12b   :  { %v968_v46 = vpop.f32.mrf.mxu0  ;;  %v1049_v49 = vadd.f32 %v1048_v45, %v1047_v41 }
 0x12c   :  { %v790_v47 = vmax.f32 %v753_v43, 0.0  ;;  %v636_v48 = vadd.f32 %v967_v44, %v1403_v16  ;;  %v1050_v50 = vpop.f32.mrf.mxu1 }
 0x12d   :  { %v969_v51 = vpop.f32.mrf.mxu0 }
 0x12e   :  { %812 = vst.msk [vmem:[%s1513_s3 + $0x80] sm:$0xff] %vm795_vm0, %v790_v47  ;;  %v756_v52 = vadd.f32 %v1049_v49, %v636_v48  ;;  %v970_v53 = vadd.f32 %v969_v51, %v968_v46  ;;  %v1051_v54 = vpop.f32.mrf.mxu1 }
 0x12f   :  { %v971_v55 = vpop.f32.mrf.mxu0  ;;  %v1052_v58 = vadd.f32 %v1051_v54, %v1050_v50 }
 0x130   :  { %v791_v56 = vmax.f32 %v756_v52, 0.0  ;;  %v641_v57 = vadd.f32 %v970_v53, %v1403_v16  ;;  %v1053_v59 = vpop.f32.mrf.mxu1 }
 0x131   :  { %v972_v60 = vpop.f32.mrf.mxu0 }
 0x132   :  { %813 = vst.msk [vmem:[%s1513_s3 + $0x88] sm:$0xff] %vm795_vm0, %v791_v56  ;;  %v761_v61 = vadd.f32 %v1052_v58, %v641_v57  ;;  %v973_v62 = vadd.f32 %v972_v60, %v971_v55  ;;  %v1054_v63 = vpop.f32.mrf.mxu1 }
 0x133   :  { %v974_v0 = vpop.f32.mrf.mxu0  ;;  %v1055_v3 = vadd.f32 %v1054_v63, %v1053_v59 }
 0x134   :  { %v792_v1 = vmax.f32 %v761_v61, 0.0  ;;  %v644_v2 = vadd.f32 %v973_v62, %v1403_v16  ;;  %v1056_v4 = vpop.f32.mrf.mxu1 }
 0x135   :  { %v975_v5 = vpop.f32.mrf.mxu0 }
 0x136   :  { %814 = vst.msk [vmem:[%s1513_s3 + $0x90] sm:$0xff] %vm795_vm0, %v792_v1  ;;  %v764_v6 = vadd.f32 %v1055_v3, %v644_v2  ;;  %v976_v7 = vadd.f32 %v975_v5, %v974_v0  ;;  %v1057_v8 = vpop.f32.mrf.mxu1 }
 0x137   :  { %v977_v9 = vpop.f32.mrf.mxu0  ;;  %v1058_v12 = vadd.f32 %v1057_v8, %v1056_v4 }
 0x138   :  { %v793_v10 = vmax.f32 %v764_v6, 0.0  ;;  %v649_v11 = vadd.f32 %v976_v7, %v1403_v16  ;;  %v1059_v13 = vpop.f32.mrf.mxu1 }
 0x139   :  { %v978_v14 = vpop.f32.mrf.mxu0 }
 0x13a   :  { %815 = vst.msk [vmem:[%s1513_s3 + $0x98] sm:$0xff] %vm795_vm0, %v793_v10  ;;  %v769_v15 = vadd.f32 %v1058_v12, %v649_v11  ;;  %v1060_v17 = vpop.f32.mrf.mxu1 }
 0x13c   :  { %v794_v18 = vmax.f32 %v769_v15, 0.0 }
 0x13e   :  { %816 = vst.msk [vmem:[%s1513_s3 + $0xa0] sm:$0xff] %vm795_vm0, %v794_v18 }

// kernel: encoder_forward.6
= control target key start
LH: loop header
LB: loop body
LE: loop exit
PB: predicated region body
PF: predicated region fallthrough
CT: control target
= control target key end

     0   :  { %v1167_v34 = vmov 0.0   ;;  %vm1168_vm0 = vmmov 0   ;;  %vm516_vm1 = vcmask 523264   ;;  %s1567_s1 = inlined_call_operand.vmem [shape: bf16[576,64], index: 1, kind: input, shape index: {}]   ;;  %s1568_s0 = inlined_call_operand.vmem [shape: bf16[104,576], index: 0, kind: input, shape index: {}]   ;;  %s1569_s2 = inlined_call_operand.vmem [shape: f32[1,64], index: 2, kind: input, shape index: {}]   ;;  %s1570_s3 = inlined_call_operand.vmem [shape: f32[104,64], index: 3, kind: output, shape index: {}]  }
   0x1   :  { %v1084_v0 = vld [vmem:[%s1567_s1 + $0x78] sm:$0xff]   ;;  %v1088_v4 = vld [vmem:[%s1567_s1 + $0x70] sm:$0xff]   ;;  %v1092_v8 = vld [vmem:[%s1567_s1 + $0x68] sm:$0xff]  }
   0x2   :  { %v1085_v1 = vld [vmem:[%s1567_s1 + $0xf8] sm:$0xff]   ;;  %911 = vmatprep.subr.bf16.mxu0 %v1084_v0  ;;  %v1089_v5 = vld [vmem:[%s1567_s1 + $0xf0] sm:$0xff]   ;;  %v1093_v9 = vld [vmem:[%s1567_s1 + $0xe8] sm:$0xff]  }
   0x3   :  { %v1086_v2 = vld [vmem:[%s1567_s1 + $0x38] sm:$0xff]   ;;  %969 = vmatprep.subr.bf16.mxu1 %v1085_v1  ;;  %v1090_v6 = vld [vmem:[%s1567_s1 + $0x30] sm:$0xff]   ;;  %v1094_v10 = vld [vmem:[%s1567_s1 + $0x28] sm:$0xff]  }
   0x4   :  { %v1087_v3 = vld [vmem:[%s1567_s1 + $0xb8] sm:$0xff]   ;;  %912 = vmatpush3.bf16.msra.mxu0 %v1086_v2  ;;  %v1091_v7 = vld [vmem:[%s1567_s1 + $0xb0] sm:$0xff]   ;;  %v1095_v11 = vld [vmem:[%s1567_s1 + $0xa8] sm:$0xff]  }
   0x5   :  { %970 = vmatpush3.bf16.msra.mxu1 %v1087_v3  ;;  %913 = vmatprep.subr.bf16.mxu0 %v1088_v4  ;;  %v1096_v12 = vld [vmem:[%s1567_s1 + $0x60] sm:$0xff]   ;;  %v1100_v16 = vld [vmem:[%s1567_s1 + $0x58] sm:$0xff]   ;;  %v1104_v20 = vld [vmem:[%s1567_s1 + $0x50] sm:$0xff]  }
   0x6   :  { %971 = vmatprep.subr.bf16.mxu1 %v1089_v5  ;;  %v1097_v13 = vld [vmem:[%s1567_s1 + $0xe0] sm:$0xff]   ;;  %v1101_v17 = vld [vmem:[%s1567_s1 + $0xd8] sm:$0xff]   ;;  %v1105_v21 = vld [vmem:[%s1567_s1 + $0xd0] sm:$0xff]  }
   0x7   :  { %v1098_v14 = vld [vmem:[%s1567_s1 + $0x20] sm:$0xff]   ;;  %v1102_v18 = vld [vmem:[%s1567_s1 + $0x18] sm:$0xff]   ;;  %v1106_v22 = vld [vmem:[%s1567_s1 + $0x10] sm:$0xff]  }
   0x8   :  { %914 = vmatpush3.bf16.msra.mxu0 %v1090_v6  ;;  %v1099_v15 = vld [vmem:[%s1567_s1 + $0xa0] sm:$0xff]   ;;  %v1103_v19 = vld [vmem:[%s1567_s1 + $0x98] sm:$0xff]   ;;  %v1107_v23 = vld [vmem:[%s1567_s1 + $0x90] sm:$0xff]  }
   0x9   :  { %972 = vmatpush3.bf16.msra.mxu1 %v1091_v7  ;;  %915 = vmatprep.subr.bf16.mxu0 %v1092_v8  ;;  %v1108_v24 = vld [vmem:[%s1567_s1 + $0x48] sm:$0xff]   ;;  %v1112_v28 = vld [vmem:[%s1567_s1 + $0x40] sm:$0xff]   ;;  %v1122_v37 = vld [vmem:[%s1567_s1 + $0x118] sm:$0xff]  }
   0xa   :  { %973 = vmatprep.subr.bf16.mxu1 %v1093_v9  ;;  %v1109_v25 = vld [vmem:[%s1567_s1 + $0xc8] sm:$0xff]   ;;  %v1113_v29 = vld [vmem:[%s1567_s1 + $0xc0] sm:$0xff]   ;;  %v1133_v43 = vld [vmem:[%s1567_s1 + $0x110] sm:$0xff]  }
   0xb   :  { %v1110_v26 = vld [vmem:[%s1567_s1 + $0x8] sm:$0xff]   ;;  %v1114_v30 = vld [vmem:[%s1567_s1] sm:$0xff]   ;;  %v1131_v44 = vld [vmem:[%s1568_s0 + $0x5c] ss:$20 sps:$4 sm:$0xff]  }
   0xc   :  { %916 = vmatpush3.bf16.msra.mxu0 %v1094_v10  ;;  %v1111_v27 = vld [vmem:[%s1567_s1 + $0x88] sm:$0xff]   ;;  %v1115_v31 = vld [vmem:[%s1567_s1 + $0x80] sm:$0xff]   ;;  %v1136_v48 = vld [vmem:[%s1568_s0 + $0x7c] ss:$20 sps:$4 sm:$0xff]  }
   0xd   :  { %974 = vmatpush3.bf16.msra.mxu1 %v1095_v11  ;;  %917 = vmatprep.subr.bf16.mxu0 %v1096_v12  ;;  %v1116_v32 = vld [vmem:[%s1568_s0] ss:$20 sps:$4 sm:$0xff]   ;;  %v1118_v33 = vld [vmem:[%s1568_s0 + $0x4] ss:$20 sps:$4 sm:$0xff]   ;;  %v1119_v35 = vld [vmem:[%s1568_s0 + $0x8] ss:$20 sps:$4 sm:$0xff]  }
   0xe   :  { %975 = vmatprep.subr.bf16.mxu1 %v1097_v13  ;;  %v1121_v36 = vld [vmem:[%s1568_s0 + $0xc] ss:$20 sps:$4 sm:$0xff]   ;;  %570 = vmatprep.mubr.bf16.mxu0 %v1118_v33  ;;  %v1125_v39 = vld [vmem:[%s1568_s0 + $0x34] ss:$20 sps:$4 sm:$0xff]   ;;  %v1128_v41 = vld [vmem:[%s1568_s0 + $0x30] ss:$20 sps:$4 sm:$0xff]  }
   0xf   :  { %658 = vmatprep.mubr.bf16.mxu1 %v1121_v36  ;;  %v1123_v38 = vld [vmem:[%s1568_s0 + $0x2c] ss:$20 sps:$4 sm:$0xff]   ;;  %v1127_v40 = vld [vmem:[%s1568_s0 + $0x28] ss:$20 sps:$4 sm:$0xff]   ;;  %v1134_v46 = vld [vmem:[%s1568_s0 + $0x50] ss:$20 sps:$4 sm:$0xff]  }
  0x10   :  { %918 = vmatpush3.bf16.msra.mxu0 %v1098_v14  ;;  %v1129_v42 = vld [vmem:[%s1568_s0 + $0x54] ss:$20 sps:$4 sm:$0xff]   ;;  %v1135_v47 = vld [vmem:[%s1568_s0 + $0x58] ss:$20 sps:$4 sm:$0xff]   ;;  %v1155_v50 = vld [vmem:[%s1567_s1 + $0x100] sm:$0xff]  }
  0x11   :  { %976 = vmatpush3.bf16.msra.mxu1 %v1099_v15  ;;  %919 = vmatprep.subr.bf16.mxu0 %v1100_v16  ;;  %v1142_v45 = vld [vmem:[%s1567_s1 + $0x108] sm:$0xff]   ;;  %v1138_v49 = vld [vmem:[%s1568_s0 + $0x84] ss:$20 sps:$4 sm:$0xff]   ;;  %v1141_v52 = vld [vmem:[%s1568_s0 + $0x80] ss:$20 sps:$4 sm:$0xff]  }
  0x12   :  { %977 = vmatprep.subr.bf16.mxu1 %v1101_v17  ;;  %v1140_v51 = vld [vmem:[%s1568_s0 + $0x78] ss:$20 sps:$4 sm:$0xff]   ;;  %v1147_v55 = vld [vmem:[%s1568_s0 + $0xa0] ss:$20 sps:$4 sm:$0xff]   ;;  %v1148_v56 = vld [vmem:[%s1568_s0 + $0xa8] ss:$20 sps:$4 sm:$0xff]  }
  0x13   :  { %v1143_v53 = vld [vmem:[%s1568_s0 + $0xa4] ss:$20 sps:$4 sm:$0xff]   ;;  %v1145_v54 = vld [vmem:[%s1568_s0 + $0xac] ss:$20 sps:$4 sm:$0xff]   ;;  %v1151_v58 = vld [vmem:[%s1568_s0 + $0xd4] ss:$20 sps:$4 sm:$0xff]  }
  0x14   :  { %920 = vmatpush3.bf16.msra.mxu0 %v1102_v18  ;;  %v1149_v57 = vld [vmem:[%s1568_s0 + $0xcc] ss:$20 sps:$4 sm:$0xff]   ;;  %v51_v59 = vld [vmem:[%s1568_s0 + $0xf0] sm:$0xff]  ;;  %v52_v60 = vld [vmem:[%s1568_s0 + $0xf8] sm:$0xff] }
  0x15   :  { %978 = vmatpush3.bf16.msra.mxu1 %v1103_v19  ;;  %921 = vmatprep.subr.bf16.mxu0 %v1104_v20  ;;  %v1153_v61 = vld [vmem:[%s1568_s0 + $0xc8] ss:$20 sps:$4 sm:$0xff]   ;;  %v1154_v62 = vld [vmem:[%s1568_s0 + $0xd0] ss:$20 sps:$4 sm:$0xff]   ;;  %v864_v63 = vcombine.high %v51_v59, %v51_v59  ;;  %v866_v0 = vcombine.high %v52_v60, %v52_v60  ;;  %v863_v1 = vcombine.low %v51_v59, %v51_v59  ;;  %v1162_v5 = vld [vmem:[%s1568_s0 + $0x38] ss:$20 sps:$4 sm:$0xff]  }
  0x16   :  { %979 = vmatprep.subr.bf16.mxu1 %v1105_v21  ;;  %v865_v2 = vcombine.low %v52_v60, %v52_v60  ;;  %v1160_v3 = vld [vmem:[%s1568_s0 + $0x10] ss:$20 sps:$4 sm:$0xff]   ;;  %v1163_v6 = vld [vmem:[%s1568_s0 + $0xd8] ss:$20 sps:$4 sm:$0xff]   ;;  %v1164_v7 = vld [vmem:[%s1568_s0 + $0x60] ss:$20 sps:$4 sm:$0xff]  }
  0x17   :  { %v1161_v4 = vld [vmem:[%s1568_s0 + $0xb0] ss:$20 sps:$4 sm:$0xff]   ;;  %v1165_v8 = vld [vmem:[%s1568_s0 + $0x100] ss:$0 sps:$4 sm:$0xff]   ;;  %v1166_v9 = vld [vmem:[%s1568_s0 + $0x88] ss:$20 sps:$4 sm:$0xff]  }
  0x18   :  { %922 = vmatpush3.bf16.msra.mxu0 %v1106_v22  ;;  %v1472_v59 = vld [vmem:[%s1569_s2] ss:$0 sm:$0xff] }
  0x19   :  { %980 = vmatpush3.bf16.msra.mxu1 %v1107_v23  ;;  %923 = vmatprep.subr.bf16.mxu0 %v1108_v24 }
  0x1a   :  { %981 = vmatprep.subr.bf16.mxu1 %v1109_v25 }
  0x1c   :  { %924 = vmatpush3.bf16.msra.mxu0 %v1110_v26 }
  0x1d   :  { %982 = vmatpush3.bf16.msra.mxu1 %v1111_v27  ;;  %925 = vmatprep.subr.bf16.mxu0 %v1112_v28 }
  0x1e   :  { %983 = vmatprep.subr.bf16.mxu1 %v1113_v29 }
  0x20   :  { %926 = vmatpush3.bf16.msra.mxu0 %v1114_v30 }
  0x21   :  { %984 = vmatpush3.bf16.msra.mxu1 %v1115_v31  ;;  %1038 = vmatprep.subr.bf16.mxu0 %v1167_v34 }
  0x22   :  { %1074 = vmatprep.subr.bf16.mxu1 %v1167_v34 }
  0x23   :  { %571 = vmatmul.mubr.bf16.vlgmr.msra.gmra.mxu0 %v1116_v32 }
  0x24   :  { %659 = vmatmul.mubr.bf16.vlgmr.msra.gmra.mxu1 %v1119_v35  ;;  %1039 = vmatpush3.bf16.msra.mxu0 %v1122_v37 }
  0x25   :  { %578 = vmatprep.mubr.bf16.mxu0 %v1123_v38  ;;  %1078 = vmatpush3.bf16.msra.mxu1 %v1122_v37 }
  0x26   :  { %666 = vmatprep.mubr.bf16.mxu1 %v1125_v39  ;;  %1040 = vmatprep.subr.bf16.mxu0 %v1167_v34 }
  0x27   :  { %1075 = vmatprep.subr.bf16.mxu1 %v1167_v34 }
  0x28   :  { %1041 = vmatpush3.bf16.msra.mxu0 %v1133_v43 }
  0x29   :  { %1079 = vmatpush3.bf16.msra.mxu1 %v1133_v43  ;;  %1042 = vmatprep.subr.bf16.mxu0 %v1167_v34 }
  0x2a   :  { %1076 = vmatprep.subr.bf16.mxu1 %v1167_v34 }
  0x2b   :  { %579 = vmatmul.mubr.bf16.gmra.mxu0 %v1127_v40 }
  0x2c   :  { %667 = vmatmul.mubr.bf16.gmra.mxu1 %v1128_v41  ;;  %586 = vmatprep.mubr.bf16.mxu0 %v1129_v42 }
  0x2d   :  { %674 = vmatprep.mubr.bf16.mxu1 %v1131_v44  ;;  %1043 = vmatpush3.bf16.msra.mxu0 %v1142_v45 }
  0x2e   :  { %1080 = vmatpush3.bf16.msra.mxu1 %v1142_v45  ;;  %1044 = vmatprep.subr.bf16.mxu0 %v1167_v34 }
  0x2f   :  { %1077 = vmatprep.subr.bf16.mxu1 %v1167_v34 }
  0x31   :  { %1045 = vmatpush3.bf16.msra.mxu0 %v1155_v50 }
  0x32   :  { %1081 = vmatpush3.bf16.msra.mxu1 %v1155_v50 }
  0x33   :  { %587 = vmatmul.mubr.bf16.gmra.mxu0 %v1134_v46 }
  0x34   :  { %675 = vmatmul.mubr.bf16.gmra.mxu1 %v1135_v47  ;;  %594 = vmatprep.mubr.bf16.mxu0 %v1136_v48 }
  0x35   :  { %682 = vmatprep.mubr.bf16.mxu1 %v1138_v49 }
  0x3b   :  { %595 = vmatmul.mubr.bf16.gmra.mxu0 %v1140_v51 }
  0x3c   :  { %683 = vmatmul.mubr.bf16.gmra.mxu1 %v1141_v52  ;;  %602 = vmatprep.mubr.bf16.mxu0 %v1143_v53 }
  0x3d   :  { %690 = vmatprep.mubr.bf16.mxu1 %v1145_v54 }
  0x43   :  { %603 = vmatmul.mubr.bf16.gmra.mxu0 %v1147_v55 }
  0x44   :  { %691 = vmatmul.mubr.bf16.gmra.mxu1 %v1148_v56  ;;  %610 = vmatprep.mubr.bf16.mxu0 %v1149_v57 }
  0x45   :  { %698 = vmatprep.mubr.bf16.mxu1 %v1151_v58 }
  0x4b   :  { %611 = vmatmul.mubr.bf16.gmra.mxu0 %v1153_v61 }
  0x4c   :  { %699 = vmatmul.mubr.bf16.gmra.mxu1 %v1154_v62  ;;  %618 = vmatprep.mubr.bf16.mxu0 %v864_v63 }
  0x4d   :  { %706 = vmatprep.mubr.bf16.mxu1 %v866_v0 }
  0x53   :  { %619 = vmatmul.mubr.bf16.gmra.mxu0 %v863_v1 }
  0x54   :  { %707 = vmatmul.mubr.bf16.gmra.mxu1 %v865_v2  ;;  %1046 = vmatprep.mubr.msk.bf16.mxu0 %vm1168_vm0, %v1167_v34 }
  0x55   :  { %1062 = vmatprep.mubr.msk.bf16.mxu1 %vm1168_vm0, %v1167_v34 }
  0x5b   :  { %1047 = vmatmul.mubr.msk.bf16.vlgmr.msra.gmra.mxu0 %vm516_vm1, %v1160_v3 }
  0x5c   :  { %1063 = vmatmul.mubr.msk.bf16.vlgmr.msra.gmra.mxu1 %vm516_vm1, %v1161_v4  ;;  %1050 = vmatprep.mubr.msk.bf16.mxu0 %vm1168_vm0, %v1167_v34 }
  0x5d   :  { %1066 = vmatprep.mubr.msk.bf16.mxu1 %vm1168_vm0, %v1167_v34 }
  0x63   :  { %1051 = vmatmul.mubr.msk.bf16.gmra.mxu0 %vm516_vm1, %v1162_v5 }
  0x64   :  { %1067 = vmatmul.mubr.msk.bf16.gmra.mxu1 %vm516_vm1, %v1163_v6  ;;  %1054 = vmatprep.mubr.msk.bf16.mxu0 %vm1168_vm0, %v1167_v34 }
  0x65   :  { %1070 = vmatprep.mubr.msk.bf16.mxu1 %vm1168_vm0, %v1167_v34 }
  0x6b   :  { %1055 = vmatmul.mubr.msk.bf16.gmra.mxu0 %vm516_vm1, %v1164_v7 }
  0x6c   :  { %1071 = vmatmul.mubr.msk.bf16.gmra.mxu1 %vm516_vm1, %v1165_v8  ;;  %1058 = vmatprep.mubr.msk.bf16.mxu0 %vm1168_vm0, %v1167_v34 }
  0x73   :  { %1059 = vmatmul.mubr.msk.bf16.gmra.mxu0 %vm516_vm1, %v1166_v9 }
  0xe3   :  { %v927_v10 = vpop.f32.mrf.mxu0 }
  0xe4   :  { %v985_v11 = vpop.f32.mrf.mxu1 }
  0xe5   :  { %v928_v12 = vpop.f32.mrf.mxu0 }
  0xe6   :  { %v986_v13 = vpop.f32.mrf.mxu1  ;;  %v929_v57 = vadd.f32 %v928_v12, %v927_v10 }
  0xe7   :  { %v930_v14 = vpop.f32.mrf.mxu0  ;;  %v987_v2 = vadd.f32 %v986_v13, %v985_v11 }
  0xe8   :  { %v988_v15 = vpop.f32.mrf.mxu1  ;;  %v573_v1 = vadd.f32 %v929_v57, %v1472_v59 }
  0xe9   :  { %v931_v16 = vpop.f32.mrf.mxu0 }
  0xea   :  { %v989_v17 = vpop.f32.mrf.mxu1  ;;  %v932_v63 = vadd.f32 %v931_v16, %v930_v14  ;;  %v661_v14 = vadd.f32 %v987_v2, %v573_v1 }
  0xeb   :  { %v933_v18 = vpop.f32.mrf.mxu0  ;;  %v990_v10 = vadd.f32 %v989_v17, %v988_v15 }
  0xec   :  { %v1425_v19 = vpop.f32.mrf.mxu1  ;;  %v576_v9 = vadd.f32 %v932_v63, %v1472_v59 }
  0xed   :  { %v934_v20 = vpop.f32.mrf.mxu0 }
  0xee   :  { %v1427_v21 = vpop.f32.mrf.mxu1  ;;  %v935_v12 = vadd.f32 %v934_v20, %v933_v18  ;;  %v664_v15 = vadd.f32 %v990_v10, %v576_v9 }
  0xef   :  { %v1429_v22 = vpop.f32.mrf.mxu0 }
  0xf0   :  { %v1431_v23 = vpop.f32.mrf.mxu1 }
  0xf1   :  { %v1433_v24 = vpop.f32.mrf.mxu0 }
  0xf2   :  { %v1435_v25 = vpop.f32.mrf.mxu1  ;;  %v938_v17 = vadd.f32 %v1433_v24, %v1429_v22 }
  0xf3   :  { %v1437_v26 = vpop.f32.mrf.mxu0 }
  0xf4   :  { %v1439_v27 = vpop.f32.mrf.mxu1 }
  0xf5   :  { %v1441_v28 = vpop.f32.mrf.mxu0 }
  0xf6   :  { %v1443_v29 = vpop.f32.mrf.mxu1 }
  0xf7   :  { %v1445_v30 = vpop.f32.mrf.mxu0 }
  0xf8   :  { %v1447_v31 = vpop.f32.mrf.mxu1 }
  0xf9   :  { %v1449_v32 = vpop.f32.mrf.mxu0 }
  0xfa   :  { %v1451_v33 = vpop.f32.mrf.mxu1 }
  0xfb   :  { %v1453_v34 = vpop.f32.mrf.mxu0 }
  0xfc   :  { %v1455_v35 = vpop.f32.mrf.mxu1 }
  0xfd   :  { %v1457_v36 = vpop.f32.mrf.mxu0 }
  0xfe   :  { %v1459_v37 = vpop.f32.mrf.mxu1 }
  0xff   :  { %v1461_v38 = vpop.f32.mrf.mxu0 }
 0x100   :  { %v1463_v39 = vpop.f32.mrf.mxu1 }
 0x101   :  { %1571 = vst [vmem:[#allocation2_spill] sm:$0xff] %v1463_v39  ;;  %v1465_v40 = vpop.f32.mrf.mxu0 }
 0x102   :  { %1572 = vst [vmem:[#allocation3_spill] sm:$0xff] %v1465_v40  ;;  %v1467_v41 = vpop.f32.mrf.mxu1 }
 0x103   :  { %1573 = vst [vmem:[#allocation4_spill] sm:$0xff] %v1467_v41  ;;  %v951_v42 = vpop.f32.mrf.mxu0 }
 0x104   :  { %v1009_v43 = vpop.f32.mrf.mxu1 }
 0x105   :  { %v952_v44 = vpop.f32.mrf.mxu0 }
 0x106   :  { %v1010_v45 = vpop.f32.mrf.mxu1  ;;  %v953_v60 = vadd.f32 %v952_v44, %v951_v42 }
 0x107   :  { %v954_v46 = vpop.f32.mrf.mxu0  ;;  %v1011_v5 = vadd.f32 %v1010_v45, %v1009_v43  ;;  %v581_v43 = vadd.f32 %v935_v12, %v1472_v59  ;;  %v993_v45 = vadd.f32 %v1427_v21, %v1425_v19 }
 0x108   :  { %v1012_v47 = vpop.f32.mrf.mxu1  ;;  %v605_v4 = vadd.f32 %v953_v60, %v1472_v59 }
 0x109   :  { %v955_v48 = vpop.f32.mrf.mxu0 }
 0x10a   :  { %v1013_v49 = vpop.f32.mrf.mxu1  ;;  %v956_v6 = vadd.f32 %v955_v48, %v954_v46  ;;  %v693_v13 = vadd.f32 %v1011_v5, %v605_v4 }
 0x10b   :  { %v957_v50 = vpop.f32.mrf.mxu0  ;;  %v1014_v57 = vadd.f32 %v1013_v49, %v1012_v47 }
 0x10c   :  { %v1015_v51 = vpop.f32.mrf.mxu1  ;;  %v608_v16 = vadd.f32 %v956_v6, %v1472_v59 }
 0x10d   :  { %v958_v52 = vpop.f32.mrf.mxu0 }
 0x10e   :  { %v1016_v53 = vpop.f32.mrf.mxu1  ;;  %v959_v44 = vadd.f32 %v958_v52, %v957_v50  ;;  %v696_v60 = vadd.f32 %v1014_v57, %v608_v16 }
 0x10f   :  { %v960_v54 = vpop.f32.mrf.mxu0  ;;  %v1017_v20 = vadd.f32 %v1016_v53, %v1015_v51  ;;  %v584_v51 = vadd.f32 %v938_v17, %v1472_v59  ;;  %v941_v53 = vadd.f32 %v1441_v28, %v1437_v26  ;;  %v1574_v17 = vld [vmem:[#allocation3_spill] sm:$0xff] }
 0x110   :  { %v1018_v55 = vpop.f32.mrf.mxu1  ;;  %v613_v18 = vadd.f32 %v959_v44, %v1472_v59 }
 0x111   :  { %v961_v56 = vpop.f32.mrf.mxu0 }
 0x112   :  { %v1019_v58 = vpop.f32.mrf.mxu1  ;;  %v962_v49 = vadd.f32 %v961_v56, %v960_v54  ;;  %v701_v63 = vadd.f32 %v1017_v20, %v613_v18  ;;  %v950_v18 = vadd.f32 %v1574_v17, %v1461_v38  ;;  %v1575_v38 = vld [vmem:[#allocation2_spill] sm:$0xff] }
 0x113   :  { %v963_v61 = vpop.f32.mrf.mxu0  ;;  %v1020_v2 = vadd.f32 %v1019_v58, %v1018_v55  ;;  %v589_v55 = vadd.f32 %v941_v53, %v1472_v59  ;;  %v999_v58 = vadd.f32 %v1443_v29, %v1439_v27  ;;  %v1002_v29 = vadd.f32 %v1451_v33, %v1447_v31 }
 0x114   :  { %v1474_v62 = vpop.f32.mrf.mxu1  ;;  %v616_v1 = vadd.f32 %v962_v49, %v1472_v59 }
 0x115   :  { %v964_v0 = vpop.f32.mrf.mxu0 }
 0x116   :  { %v1477_v3 = vpop.f32.mrf.mxu1  ;;  %v704_v12 = vadd.f32 %v1020_v2, %v616_v1 }
 0x117   :  { %v966_v7 = vpop.f32.mrf.mxu0 }
 0x118   :  { %v1024_v8 = vpop.f32.mrf.mxu1  ;;  %v944_v7 = vadd.f32 %v1449_v32, %v1445_v30  ;;  %v1023_v30 = vadd.f32 %v1477_v3, %v1474_v62 }
 0x119   :  { %v967_v42 = vpop.f32.mrf.mxu0 }
 0x11a   :  { %v1025_v41 = vpop.f32.mrf.mxu1  ;;  %v592_v27 = vadd.f32 %v944_v7, %v1472_v59 }
 0x11b   :  { %v748_v11 = vpop.f32.mrf.mxu0 }
 0x11c   :  { %v749_v39 = vadd.f32 %v748_v11, %v661_v14  ;;  %v780_v40 = vpop.f32.mrf.mxu1  ;;  %v947_v14 = vadd.f32 %v1457_v36, %v1453_v34  ;;  %v677_v11 = vadd.f32 %v999_v58, %v589_v55  ;;  %v680_v36 = vadd.f32 %v1002_v29, %v592_v27 }
 0x11d   :  { %v781_v46 = vadd.f32 %v780_v40, %v693_v13  ;;  %v1048_v48 = vpop.f32.mrf.mxu0  ;;  %v996_v40 = vadd.f32 %v1435_v25, %v1431_v23  ;;  %v965_v23 = vadd.f32 %v964_v0, %v963_v61 }
 0x11e   :  { %v802_v41 = vmax.f32 %v749_v39, 0.0  ;;  %v1064_v47 = vpop.f32.mrf.mxu1  ;;  %v669_v39 = vadd.f32 %v993_v45, %v581_v43  ;;  %v597_v48 = vadd.f32 %v947_v14, %v1472_v59 }
 0x11f   :  { %v810_v50 = vmax.f32 %v781_v46, 0.0  ;;  %v751_v52 = vpop.f32.mrf.mxu0  ;;  %v672_v8 = vadd.f32 %v996_v40, %v584_v51  ;;  %v621_v9 = vadd.f32 %v965_v23, %v1472_v59 }
 0x120   :  { %815 = vst.msk [vmem:[%s1570_s3] sm:$0xff] %vm516_vm1, %v802_v41  ;;  %v752_v19 = vadd.f32 %v751_v52, %v664_v15  ;;  %v783_v21 = vpop.f32.mrf.mxu1  ;;  %v1005_v15 = vadd.f32 %v1459_v37, %v1455_v35  ;;  %v600_v37 = vadd.f32 %v950_v18, %v1472_v59 }
 0x121   :  { %823 = vst.msk [vmem:[%s1570_s3 + $0x40] sm:$0xff] %vm516_vm1, %v810_v50  ;;  %v784_v22 = vadd.f32 %v783_v21, %v696_v60  ;;  %v1049_v24 = vpop.f32.mrf.mxu0  ;;  %v709_v45 = vadd.f32 %v1023_v30, %v621_v9  ;;  %v1576_v60 = vld [vmem:[#allocation4_spill] sm:$0xff] }
 0x122   :  { %v803_v54 = vmax.f32 %v752_v19, 0.0  ;;  %v1065_v56 = vpop.f32.mrf.mxu1  ;;  %v1008_v19 = vadd.f32 %v1576_v60, %v1575_v38  ;;  %v685_v40 = vadd.f32 %v1005_v15, %v597_v48 }
 0x123   :  { %v811_v25 = vmax.f32 %v784_v22, 0.0  ;;  %v756_v4 = vpop.f32.mrf.mxu0 }
 0x124   :  { %816 = vst.msk [vmem:[%s1570_s3 + $0x8] sm:$0xff] %vm516_vm1, %v803_v54  ;;  %v757_v5 = vadd.f32 %v756_v4, %v669_v39  ;;  %v788_v6 = vpop.f32.mrf.mxu1  ;;  %v688_v54 = vadd.f32 %v1008_v19, %v600_v37 }
 0x125   :  { %824 = vst.msk [vmem:[%s1570_s3 + $0x48] sm:$0xff] %vm516_vm1, %v811_v25  ;;  %v789_v26 = vadd.f32 %v788_v6, %v701_v63  ;;  %v1052_v28 = vpop.f32.mrf.mxu0 }
 0x126   :  { %v804_v61 = vmax.f32 %v757_v5, 0.0  ;;  %v1068_v0 = vpop.f32.mrf.mxu1 }
 0x127   :  { %v812_v32 = vmax.f32 %v789_v26, 0.0  ;;  %v759_v10 = vpop.f32.mrf.mxu0 }
 0x128   :  { %817 = vst.msk [vmem:[%s1570_s3 + $0x10] sm:$0xff] %vm516_vm1, %v804_v61  ;;  %v760_v42 = vadd.f32 %v759_v10, %v672_v8  ;;  %v791_v44 = vpop.f32.mrf.mxu1 }
 0x129   :  { %825 = vst.msk [vmem:[%s1570_s3 + $0x50] sm:$0xff] %vm516_vm1, %v812_v32  ;;  %v792_v62 = vadd.f32 %v791_v44, %v704_v12  ;;  %v1053_v3 = vpop.f32.mrf.mxu0 }
 0x12a   :  { %v805_v16 = vmax.f32 %v760_v42, 0.0  ;;  %v1069_v57 = vpop.f32.mrf.mxu1 }
 0x12b   :  { %v813_v13 = vmax.f32 %v792_v62, 0.0  ;;  %v764_v43 = vpop.f32.mrf.mxu0 }
 0x12c   :  { %818 = vst.msk [vmem:[%s1570_s3 + $0x18] sm:$0xff] %vm516_vm1, %v805_v16  ;;  %v765_v31 = vadd.f32 %v764_v43, %v677_v11  ;;  %v796_v33 = vpop.f32.mrf.mxu1 }
 0x12d   :  { %826 = vst.msk [vmem:[%s1570_s3 + $0x58] sm:$0xff] %vm516_vm1, %v813_v13  ;;  %v797_v46 = vadd.f32 %v796_v33, %v709_v45  ;;  %v1056_v34 = vpop.f32.mrf.mxu0 }
 0x12e   :  { %v806_v20 = vmax.f32 %v765_v31, 0.0  ;;  %v1072_v41 = vpop.f32.mrf.mxu1 }
 0x12f   :  { %v814_v47 = vmax.f32 %v797_v46, 0.0  ;;  %v767_v49 = vpop.f32.mrf.mxu0 }
 0x130   :  { %819 = vst.msk [vmem:[%s1570_s3 + $0x20] sm:$0xff] %vm516_vm1, %v806_v20  ;;  %v768_v50 = vadd.f32 %v767_v49, %v680_v36  ;;  %v799_v52 = vpop.f32.mrf.mxu1 }
 0x131   :  { %827 = vst.msk [vmem:[%s1570_s3 + $0x60] sm:$0xff] %vm516_vm1, %v814_v47  ;;  %v1057_v35 = vpop.f32.mrf.mxu0 }
 0x132   :  { %v807_v21 = vmax.f32 %v768_v50, 0.0  ;;  %v1073_v22 = vpop.f32.mrf.mxu1 }
 0x133   :  { %v772_v24 = vpop.f32.mrf.mxu0 }
 0x134   :  { %820 = vst.msk [vmem:[%s1570_s3 + $0x28] sm:$0xff] %vm516_vm1, %v807_v21  ;;  %v773_v39 = vadd.f32 %v772_v24, %v685_v40 }
 0x135   :  { %v1060_v51 = vpop.f32.mrf.mxu0 }
 0x136   :  { %v808_v53 = vmax.f32 %v773_v39, 0.0 }
 0x137   :  { %v775_v56 = vpop.f32.mrf.mxu0 }
 0x138   :  { %821 = vst.msk [vmem:[%s1570_s3 + $0x30] sm:$0xff] %vm516_vm1, %v808_v53  ;;  %v776_v59 = vadd.f32 %v775_v56, %v688_v54 }
 0x139   :  { %v1061_v63 = vpop.f32.mrf.mxu0 }
 0x13a   :  { %v809_v1 = vmax.f32 %v776_v59, 0.0 }
 0x13c   :  { %822 = vst.msk [vmem:[%s1570_s3 + $0x38] sm:$0xff] %vm516_vm1, %v809_v1 }

// kernel: encoder_forward.7
= control target key start
LH: loop header
LB: loop body
LE: loop exit
PB: predicated region body
PF: predicated region fallthrough
CT: control target
= control target key end

     0   :  { %vm2950_vm0 = vmmov 0   ;;  %vm1690_vm1 = vcmask 523264   ;;  %s3606_s1 = inlined_call_operand.vmem [shape: bf16[3136,64], index: 1, kind: input, shape index: {}]   ;;  %s3607_s0 = inlined_call_operand.vmem [shape: bf16[8,3136], index: 0, kind: input, shape index: {}]   ;;  %s3608_s2 = inlined_call_operand.vmem [shape: f32[1,64], index: 2, kind: input, shape index: {}]   ;;  %s3609_s3 = inlined_call_operand.vmem [shape: f32[8,64], index: 3, kind: output, shape index: {}]  }
   0x1   :  { %v2726_v0 = vld [vmem:[%s3606_s1 + $0x78] sm:$0xff]   ;;  %v2730_v4 = vld [vmem:[%s3606_s1 + $0x70] sm:$0xff]   ;;  %v2734_v8 = vld [vmem:[%s3606_s1 + $0x68] sm:$0xff]  }
   0x2   :  { %v2727_v1 = vld [vmem:[%s3606_s1 + $0x38] sm:$0xff]   ;;  %2443 = vmatprep.subr.bf16.mxu0 %v2726_v0  ;;  %v2731_v5 = vld [vmem:[%s3606_s1 + $0x30] sm:$0xff]   ;;  %v2735_v9 = vld [vmem:[%s3606_s1 + $0x28] sm:$0xff]  }
   0x3   :  { %v2728_v2 = vld [vmem:[%s3606_s1 + $0xf8] sm:$0xff]   ;;  %2444 = vmatpush3.bf16.msra.mxu0 %v2727_v1  ;;  %v2732_v6 = vld [vmem:[%s3606_s1 + $0xf0] sm:$0xff]   ;;  %v2736_v10 = vld [vmem:[%s3606_s1 + $0xe8] sm:$0xff]  }
   0x4   :  { %v2729_v3 = vld [vmem:[%s3606_s1 + $0xb8] sm:$0xff]   ;;  %2465 = vmatprep.subr.bf16.mxu1 %v2728_v2  ;;  %2445 = vmatprep.subr.bf16.mxu0 %v2730_v4  ;;  %v2733_v7 = vld [vmem:[%s3606_s1 + $0xb0] sm:$0xff]   ;;  %v2737_v11 = vld [vmem:[%s3606_s1 + $0xa8] sm:$0xff]  }
   0x5   :  { %2466 = vmatpush3.bf16.msra.mxu1 %v2729_v3  ;;  %v2738_v12 = vld [vmem:[%s3606_s1 + $0x60] sm:$0xff]   ;;  %v2742_v16 = vld [vmem:[%s3606_s1 + $0x58] sm:$0xff]   ;;  %v2746_v20 = vld [vmem:[%s3606_s1 + $0x50] sm:$0xff]  }
   0x6   :  { %2467 = vmatprep.subr.bf16.mxu1 %v2732_v6  ;;  %v2739_v13 = vld [vmem:[%s3606_s1 + $0x20] sm:$0xff]   ;;  %v2743_v17 = vld [vmem:[%s3606_s1 + $0x18] sm:$0xff]   ;;  %v2747_v21 = vld [vmem:[%s3606_s1 + $0x10] sm:$0xff]  }
   0x7   :  { %2446 = vmatpush3.bf16.msra.mxu0 %v2731_v5  ;;  %v2740_v14 = vld [vmem:[%s3606_s1 + $0xe0] sm:$0xff]   ;;  %v2744_v18 = vld [vmem:[%s3606_s1 + $0xd8] sm:$0xff]   ;;  %v2748_v22 = vld [vmem:[%s3606_s1 + $0xd0] sm:$0xff]  }
   0x8   :  { %2447 = vmatprep.subr.bf16.mxu0 %v2734_v8  ;;  %v2741_v15 = vld [vmem:[%s3606_s1 + $0xa0] sm:$0xff]   ;;  %v2745_v19 = vld [vmem:[%s3606_s1 + $0x98] sm:$0xff]   ;;  %v2749_v23 = vld [vmem:[%s3606_s1 + $0x90] sm:$0xff]  }
   0x9   :  { %2468 = vmatpush3.bf16.msra.mxu1 %v2733_v7  ;;  %v2750_v24 = vld [vmem:[%s3606_s1 + $0x48] sm:$0xff]   ;;  %v2754_v28 = vld [vmem:[%s3606_s1 + $0x40] sm:$0xff]   ;;  %v2760_v35 = vld [vmem:[%s3606_s1 + $0x178] sm:$0xff]  }
   0xa   :  { %2469 = vmatprep.subr.bf16.mxu1 %v2736_v10  ;;  %v2751_v25 = vld [vmem:[%s3606_s1 + $0x8] sm:$0xff]   ;;  %v2755_v29 = vld [vmem:[%s3606_s1] sm:$0xff]   ;;  %v2763_v39 = vld [vmem:[%s3606_s1 + $0x138] sm:$0xff]  }
   0xb   :  { %2448 = vmatpush3.bf16.msra.mxu0 %v2735_v9  ;;  %v2752_v26 = vld [vmem:[%s3606_s1 + $0xc8] sm:$0xff]   ;;  %v2756_v30 = vld [vmem:[%s3606_s1 + $0xc0] sm:$0xff]   ;;  %v2764_v40 = vld [vmem:[%s3606_s1 + $0x1f8] sm:$0xff]  }
   0xc   :  { %2449 = vmatprep.subr.bf16.mxu0 %v2738_v12  ;;  %v2753_v27 = vld [vmem:[%s3606_s1 + $0x88] sm:$0xff]   ;;  %v15_v31 = vld [vmem:[%s3607_s0] sm:$0xff]  ;;  %v2765_v41 = vld [vmem:[%s3606_s1 + $0x1b8] sm:$0xff]  }
   0xd   :  { %2470 = vmatpush3.bf16.msra.mxu1 %v2737_v11  ;;  %v2221_v32 = vcombine.low %v15_v31, %v15_v31  ;;  %v2222_v33 = vcombine.high %v15_v31, %v15_v31  ;;  %v2759_v34 = vld [vmem:[%s3606_s1 + $0x80] sm:$0xff]   ;;  %v16_v36 = vld [vmem:[%s3607_s0 + $0x8] sm:$0xff]  ;;  %v2766_v42 = vld [vmem:[%s3606_s1 + $0x170] sm:$0xff]  }
   0xe   :  { %2471 = vmatprep.subr.bf16.mxu1 %v2740_v14  ;;  %v2223_v37 = vcombine.low %v16_v36, %v16_v36  ;;  %v2224_v38 = vcombine.high %v16_v36, %v16_v36  ;;  %v2767_v43 = vld [vmem:[%s3606_s1 + $0x130] sm:$0xff]   ;;  %v2770_v46 = vld [vmem:[%s3606_s1 + $0x168] sm:$0xff]   ;;  %v2774_v50 = vld [vmem:[%s3606_s1 + $0x160] sm:$0xff]  }
   0xf   :  { %2450 = vmatpush3.bf16.msra.mxu0 %v2739_v13  ;;  %1726 = vmatprep.mubr.bf16.mxu0 %v2222_v33  ;;  %v2768_v44 = vld [vmem:[%s3606_s1 + $0x1f0] sm:$0xff]   ;;  %v2771_v47 = vld [vmem:[%s3606_s1 + $0x128] sm:$0xff]   ;;  %v2775_v51 = vld [vmem:[%s3606_s1 + $0x120] sm:$0xff]  }
  0x10   :  { %2451 = vmatprep.subr.bf16.mxu0 %v2742_v16  ;;  %1766 = vmatprep.mubr.bf16.mxu1 %v2224_v38  ;;  %v2769_v45 = vld [vmem:[%s3606_s1 + $0x1b0] sm:$0xff]   ;;  %v2772_v48 = vld [vmem:[%s3606_s1 + $0x1e8] sm:$0xff]   ;;  %v2776_v52 = vld [vmem:[%s3606_s1 + $0x1e0] sm:$0xff]  }
  0x11   :  { %2472 = vmatpush3.bf16.msra.mxu1 %v2741_v15  ;;  %v2773_v49 = vld [vmem:[%s3606_s1 + $0x1a8] sm:$0xff]   ;;  %v2777_v53 = vld [vmem:[%s3606_s1 + $0x1a0] sm:$0xff]   ;;  %v2778_v54 = vld [vmem:[%s3606_s1 + $0x158] sm:$0xff]  }
  0x12   :  { %2473 = vmatprep.subr.bf16.mxu1 %v2744_v18  ;;  %v2779_v55 = vld [vmem:[%s3606_s1 + $0x118] sm:$0xff]   ;;  %v2782_v58 = vld [vmem:[%s3606_s1 + $0x150] sm:$0xff]   ;;  %v2786_v62 = vld [vmem:[%s3606_s1 + $0x148] sm:$0xff]  }
  0x13   :  { %2452 = vmatpush3.bf16.msra.mxu0 %v2743_v17  ;;  %v2780_v56 = vld [vmem:[%s3606_s1 + $0x1d8] sm:$0xff]   ;;  %v2783_v59 = vld [vmem:[%s3606_s1 + $0x110] sm:$0xff]   ;;  %v2787_v63 = vld [vmem:[%s3606_s1 + $0x108] sm:$0xff]  }
  0x14   :  { %2453 = vmatprep.subr.bf16.mxu0 %v2746_v20  ;;  %v2781_v57 = vld [vmem:[%s3606_s1 + $0x198] sm:$0xff]   ;;  %v2784_v60 = vld [vmem:[%s3606_s1 + $0x1d0] sm:$0xff]   ;;  %v2788_v0 = vld [vmem:[%s3606_s1 + $0x1c8] sm:$0xff]  }
  0x15   :  { %2474 = vmatpush3.bf16.msra.mxu1 %v2745_v19  ;;  %v2785_v61 = vld [vmem:[%s3606_s1 + $0x190] sm:$0xff]   ;;  %v2789_v1 = vld [vmem:[%s3606_s1 + $0x188] sm:$0xff]   ;;  %v2790_v2 = vld [vmem:[%s3606_s1 + $0x140] sm:$0xff]  }
  0x16   :  { %2475 = vmatprep.subr.bf16.mxu1 %v2748_v22  ;;  %v2791_v3 = vld [vmem:[%s3606_s1 + $0x100] sm:$0xff]   ;;  %v17_v5 = vld [vmem:[%s3607_s0 + $0x10] sm:$0xff]  ;;  %v2796_v9 = vld [vmem:[%s3606_s1 + $0x278] sm:$0xff]  }
  0x17   :  { %2454 = vmatpush3.bf16.msra.mxu0 %v2747_v21  ;;  %v2792_v4 = vld [vmem:[%s3606_s1 + $0x1c0] sm:$0xff]   ;;  %v2225_v6 = vcombine.low %v17_v5, %v17_v5  ;;  %v2226_v7 = vcombine.high %v17_v5, %v17_v5  ;;  %v18_v10 = vld [vmem:[%s3607_s0 + $0x18] sm:$0xff]  ;;  %v2802_v16 = vld [vmem:[%s3606_s1 + $0x270] sm:$0xff]  }
  0x18   :  { %2455 = vmatprep.subr.bf16.mxu0 %v2750_v24  ;;  %v2795_v8 = vld [vmem:[%s3606_s1 + $0x180] sm:$0xff]   ;;  %v2227_v11 = vcombine.low %v18_v10, %v18_v10  ;;  %v2228_v12 = vcombine.high %v18_v10, %v18_v10  ;;  %v2799_v13 = vld [vmem:[%s3606_s1 + $0x238] sm:$0xff]   ;;  %v2803_v17 = vld [vmem:[%s3606_s1 + $0x230] sm:$0xff]  }
  0x19   :  { %2476 = vmatpush3.bf16.msra.mxu1 %v2749_v23  ;;  %v2800_v14 = vld [vmem:[%s3606_s1 + $0x2f8] sm:$0xff]   ;;  %v2804_v18 = vld [vmem:[%s3606_s1 + $0x2f0] sm:$0xff]   ;;  %v2806_v20 = vld [vmem:[%s3606_s1 + $0x268] sm:$0xff]  }
  0x1a   :  { %2477 = vmatprep.subr.bf16.mxu1 %v2752_v26  ;;  %v2801_v15 = vld [vmem:[%s3606_s1 + $0x2b8] sm:$0xff]   ;;  %v2805_v19 = vld [vmem:[%s3606_s1 + $0x2b0] sm:$0xff]   ;;  %v2807_v21 = vld [vmem:[%s3606_s1 + $0x228] sm:$0xff]  }
  0x1b   :  { %2456 = vmatpush3.bf16.msra.mxu0 %v2751_v25  ;;  %v2808_v22 = vld [vmem:[%s3606_s1 + $0x2e8] sm:$0xff]   ;;  %v2810_v24 = vld [vmem:[%s3606_s1 + $0x260] sm:$0xff]   ;;  %v2817_v31 = vld [vmem:[%s3606_s1 + $0x298] sm:$0xff]  }
  0x1c   :  { %2457 = vmatprep.subr.bf16.mxu0 %v2754_v28  ;;  %v2809_v23 = vld [vmem:[%s3606_s1 + $0x2a8] sm:$0xff]   ;;  %v2811_v25 = vld [vmem:[%s3606_s1 + $0x220] sm:$0xff]   ;;  %v2814_v28 = vld [vmem:[%s3606_s1 + $0x258] sm:$0xff]  }
  0x1d   :  { %2478 = vmatpush3.bf16.msra.mxu1 %v2753_v27  ;;  %v2812_v26 = vld [vmem:[%s3606_s1 + $0x2e0] sm:$0xff]   ;;  %v2819_v33 = vld [vmem:[%s3606_s1 + $0x210] sm:$0xff]   ;;  %v2822_v36 = vld [vmem:[%s3606_s1 + $0x248] sm:$0xff]  }
  0x1e   :  { %2479 = vmatprep.subr.bf16.mxu1 %v2756_v30  ;;  %v2813_v27 = vld [vmem:[%s3606_s1 + $0x2a0] sm:$0xff]   ;;  %v2816_v30 = vld [vmem:[%s3606_s1 + $0x2d8] sm:$0xff]   ;;  %v2824_v38 = vld [vmem:[%s3606_s1 + $0x2c8] sm:$0xff]  }
  0x1f   :  { %2458 = vmatpush3.bf16.msra.mxu0 %v2755_v29  ;;  %v2815_v29 = vld [vmem:[%s3606_s1 + $0x218] sm:$0xff]   ;;  %v2858_v10 = vld [vmem:[%s3606_s1 + $0x348] sm:$0xff]  }
  0x20   :  { %2487 = vmatprep.subr.bf16.mxu0 %v2760_v35  ;;  %v2821_v35 = vld [vmem:[%s3606_s1 + $0x290] sm:$0xff]   ;;  %v2853_v5 = vld [vmem:[%s3606_s1 + $0x398] sm:$0xff]  }
  0x21   :  { %2480 = vmatpush3.bf16.msra.mxu1 %v2759_v34  ;;  %v2820_v34 = vld [vmem:[%s3606_s1 + $0x2d0] sm:$0xff]  }
  0x22   :  { %1727 = vmatmul.mubr.bf16.vlgmr.msra.gmra.mxu0 %v2221_v32  ;;  %2509 = vmatprep.subr.bf16.mxu1 %v2764_v40  ;;  %v2818_v32 = vld [vmem:[%s3606_s1 + $0x250] sm:$0xff]   ;;  %v2826_v40 = vld [vmem:[%s3606_s1 + $0x240] sm:$0xff]  }
  0x23   :  { %2488 = vmatpush3.bf16.msra.mxu0 %v2763_v39  ;;  %1806 = vmatprep.mubr.bf16.mxu0 %v2226_v7  ;;  %v2825_v39 = vld [vmem:[%s3606_s1 + $0x288] sm:$0xff]   ;;  %v2855_v7 = vld [vmem:[%s3606_s1 + $0x310] sm:$0xff]  }
  0x24   :  { %1767 = vmatmul.mubr.bf16.vlgmr.msra.gmra.mxu1 %v2223_v37  ;;  %2489 = vmatprep.subr.bf16.mxu0 %v2766_v42  ;;  %v2823_v37 = vld [vmem:[%s3606_s1 + $0x208] sm:$0xff]   ;;  %v2828_v42 = vld [vmem:[%s3606_s1 + $0x2c0] sm:$0xff]  }
  0x25   :  { %2510 = vmatpush3.bf16.msra.mxu1 %v2765_v41  ;;  %1846 = vmatprep.mubr.bf16.mxu1 %v2228_v12  ;;  %v2827_v41 = vld [vmem:[%s3606_s1 + $0x200] sm:$0xff]   ;;  %v2860_v12 = vld [vmem:[%s3606_s1 + $0x3c8] sm:$0xff]  }
  0x26   :  { %2511 = vmatprep.subr.bf16.mxu1 %v2768_v44 }
  0x27   :  { %2490 = vmatpush3.bf16.msra.mxu0 %v2767_v43  ;;  %v19_v43 = vld [vmem:[%s3607_s0 + $0x20] sm:$0xff] }
  0x28   :  { %2491 = vmatprep.subr.bf16.mxu0 %v2770_v46  ;;  %v2229_v44 = vcombine.low %v19_v43, %v19_v43  ;;  %v2831_v46 = vld [vmem:[%s3606_s1 + $0x280] sm:$0xff]  }
  0x29   :  { %2512 = vmatpush3.bf16.msra.mxu1 %v2769_v45  ;;  %v2230_v45 = vcombine.high %v19_v43, %v19_v43  ;;  %v2889_v43 = vld [vmem:[%s3606_s1 + $0x498] sm:$0xff]  }
  0x2a   :  { %2513 = vmatprep.subr.bf16.mxu1 %v2772_v48  ;;  %v20_v48 = vld [vmem:[%s3607_s0 + $0x28] sm:$0xff] }
  0x2b   :  { %2492 = vmatpush3.bf16.msra.mxu0 %v2771_v47  ;;  %v2832_v47 = vld [vmem:[%s3606_s1 + $0x378] sm:$0xff]  }
  0x2c   :  { %2493 = vmatprep.subr.bf16.mxu0 %v2774_v50  ;;  %v2232_v50 = vcombine.high %v20_v48, %v20_v48 }
  0x2d   :  { %2514 = vmatpush3.bf16.msra.mxu1 %v2773_v49  ;;  %v2231_v49 = vcombine.low %v20_v48, %v20_v48  ;;  %v2894_v48 = vld [vmem:[%s3606_s1 + $0x448] sm:$0xff]  }
  0x2e   :  { %2515 = vmatprep.subr.bf16.mxu1 %v2776_v52  ;;  %v2836_v52 = vld [vmem:[%s3606_s1 + $0x3f8] sm:$0xff]  }
  0x2f   :  { %2494 = vmatpush3.bf16.msra.mxu0 %v2775_v51  ;;  %v2835_v51 = vld [vmem:[%s3606_s1 + $0x338] sm:$0xff]  }
  0x30   :  { %2495 = vmatprep.subr.bf16.mxu0 %v2778_v54  ;;  %v2838_v54 = vld [vmem:[%s3606_s1 + $0x370] sm:$0xff]  }
  0x31   :  { %2516 = vmatpush3.bf16.msra.mxu1 %v2777_v53  ;;  %v2837_v53 = vld [vmem:[%s3606_s1 + $0x3b8] sm:$0xff]  }
  0x32   :  { %2517 = vmatprep.subr.bf16.mxu1 %v2780_v56  ;;  %v2840_v56 = vld [vmem:[%s3606_s1 + $0x3f0] sm:$0xff]  }
  0x33   :  { %2496 = vmatpush3.bf16.msra.mxu0 %v2779_v55  ;;  %v2839_v55 = vld [vmem:[%s3606_s1 + $0x330] sm:$0xff]  }
  0x34   :  { %2497 = vmatprep.subr.bf16.mxu0 %v2782_v58  ;;  %v2842_v58 = vld [vmem:[%s3606_s1 + $0x368] sm:$0xff]  }
  0x35   :  { %2518 = vmatpush3.bf16.msra.mxu1 %v2781_v57  ;;  %v2841_v57 = vld [vmem:[%s3606_s1 + $0x3b0] sm:$0xff]  }
  0x36   :  { %2519 = vmatprep.subr.bf16.mxu1 %v2784_v60  ;;  %v2844_v60 = vld [vmem:[%s3606_s1 + $0x3e8] sm:$0xff]  }
  0x37   :  { %2498 = vmatpush3.bf16.msra.mxu0 %v2783_v59  ;;  %v2843_v59 = vld [vmem:[%s3606_s1 + $0x328] sm:$0xff]  }
  0x38   :  { %2499 = vmatprep.subr.bf16.mxu0 %v2786_v62  ;;  %v2846_v62 = vld [vmem:[%s3606_s1 + $0x360] sm:$0xff]  }
  0x39   :  { %2520 = vmatpush3.bf16.msra.mxu1 %v2785_v61  ;;  %v2845_v61 = vld [vmem:[%s3606_s1 + $0x3a8] sm:$0xff]  }
  0x3a   :  { %2521 = vmatprep.subr.bf16.mxu1 %v2788_v0  ;;  %v2848_v0 = vld [vmem:[%s3606_s1 + $0x3e0] sm:$0xff]  }
  0x3b   :  { %2500 = vmatpush3.bf16.msra.mxu0 %v2787_v63  ;;  %v2847_v63 = vld [vmem:[%s3606_s1 + $0x320] sm:$0xff]  }
  0x3c   :  { %2501 = vmatprep.subr.bf16.mxu0 %v2790_v2  ;;  %v2850_v2 = vld [vmem:[%s3606_s1 + $0x358] sm:$0xff]  }
  0x3d   :  { %2522 = vmatpush3.bf16.msra.mxu1 %v2789_v1  ;;  %v2849_v1 = vld [vmem:[%s3606_s1 + $0x3a0] sm:$0xff]  }
  0x3e   :  { %2523 = vmatprep.subr.bf16.mxu1 %v2792_v4  ;;  %v2852_v4 = vld [vmem:[%s3606_s1 + $0x3d8] sm:$0xff]  }
  0x3f   :  { %2502 = vmatpush3.bf16.msra.mxu0 %v2791_v3  ;;  %v2851_v3 = vld [vmem:[%s3606_s1 + $0x318] sm:$0xff]  }
  0x40   :  { %2531 = vmatprep.subr.bf16.mxu0 %v2796_v9  ;;  %v2857_v9 = vld [vmem:[%s3606_s1 + $0x390] sm:$0xff]  }
  0x41   :  { %2524 = vmatpush3.bf16.msra.mxu1 %v2795_v8  ;;  %v2856_v8 = vld [vmem:[%s3606_s1 + $0x3d0] sm:$0xff]  }
  0x42   :  { %1807 = vmatmul.mubr.bf16.vlgmr.msra.gmra.mxu0 %v2225_v6  ;;  %2553 = vmatprep.subr.bf16.mxu1 %v2800_v14  ;;  %v2854_v6 = vld [vmem:[%s3606_s1 + $0x350] sm:$0xff]   ;;  %v2862_v14 = vld [vmem:[%s3606_s1 + $0x340] sm:$0xff]  }
  0x43   :  { %2532 = vmatpush3.bf16.msra.mxu0 %v2799_v13  ;;  %1886 = vmatprep.mubr.bf16.mxu0 %v2230_v45  ;;  %v2861_v13 = vld [vmem:[%s3606_s1 + $0x388] sm:$0xff]   ;;  %v2891_v45 = vld [vmem:[%s3606_s1 + $0x410] sm:$0xff]  }
  0x44   :  { %1847 = vmatmul.mubr.bf16.vlgmr.msra.gmra.mxu1 %v2227_v11  ;;  %2533 = vmatprep.subr.bf16.mxu0 %v2802_v16  ;;  %v2859_v11 = vld [vmem:[%s3606_s1 + $0x308] sm:$0xff]   ;;  %v2864_v16 = vld [vmem:[%s3606_s1 + $0x3c0] sm:$0xff]  }
  0x45   :  { %2554 = vmatpush3.bf16.msra.mxu1 %v2801_v15  ;;  %1926 = vmatprep.mubr.bf16.mxu1 %v2232_v50  ;;  %v2863_v15 = vld [vmem:[%s3606_s1 + $0x300] sm:$0xff]   ;;  %v2896_v50 = vld [vmem:[%s3606_s1 + $0x4c8] sm:$0xff]  }
  0x46   :  { %2555 = vmatprep.subr.bf16.mxu1 %v2804_v18 }
  0x47   :  { %2534 = vmatpush3.bf16.msra.mxu0 %v2803_v17  ;;  %v21_v17 = vld [vmem:[%s3607_s0 + $0x30] sm:$0xff] }
  0x48   :  { %2535 = vmatprep.subr.bf16.mxu0 %v2806_v20  ;;  %v2233_v18 = vcombine.low %v21_v17, %v21_v17  ;;  %v2867_v20 = vld [vmem:[%s3606_s1 + $0x380] sm:$0xff]  }
  0x49   :  { %2556 = vmatpush3.bf16.msra.mxu1 %v2805_v19  ;;  %v2234_v19 = vcombine.high %v21_v17, %v21_v17  ;;  %v2925_v17 = vld [vmem:[%s3606_s1 + $0x598] sm:$0xff]  }
  0x4a   :  { %2557 = vmatprep.subr.bf16.mxu1 %v2808_v22  ;;  %v22_v22 = vld [vmem:[%s3607_s0 + $0x38] sm:$0xff] }
  0x4b   :  { %2536 = vmatpush3.bf16.msra.mxu0 %v2807_v21  ;;  %v2868_v21 = vld [vmem:[%s3606_s1 + $0x478] sm:$0xff]  }
  0x4c   :  { %2537 = vmatprep.subr.bf16.mxu0 %v2810_v24  ;;  %v2236_v24 = vcombine.high %v22_v22, %v22_v22 }
  0x4d   :  { %2558 = vmatpush3.bf16.msra.mxu1 %v2809_v23  ;;  %v2235_v23 = vcombine.low %v22_v22, %v22_v22  ;;  %v2930_v22 = vld [vmem:[%s3606_s1 + $0x548] sm:$0xff]  }
  0x4e   :  { %2559 = vmatprep.subr.bf16.mxu1 %v2812_v26  ;;  %v2872_v26 = vld [vmem:[%s3606_s1 + $0x4f8] sm:$0xff]  }
  0x4f   :  { %2538 = vmatpush3.bf16.msra.mxu0 %v2811_v25  ;;  %v2871_v25 = vld [vmem:[%s3606_s1 + $0x438] sm:$0xff]  }
  0x50   :  { %2539 = vmatprep.subr.bf16.mxu0 %v2814_v28  ;;  %v2874_v28 = vld [vmem:[%s3606_s1 + $0x470] sm:$0xff]  }
  0x51   :  { %2560 = vmatpush3.bf16.msra.mxu1 %v2813_v27  ;;  %v2873_v27 = vld [vmem:[%s3606_s1 + $0x4b8] sm:$0xff]  }
  0x52   :  { %2561 = vmatprep.subr.bf16.mxu1 %v2816_v30  ;;  %v2876_v30 = vld [vmem:[%s3606_s1 + $0x4f0] sm:$0xff]  }
  0x53   :  { %2540 = vmatpush3.bf16.msra.mxu0 %v2815_v29  ;;  %v2875_v29 = vld [vmem:[%s3606_s1 + $0x430] sm:$0xff]  }
  0x54   :  { %2541 = vmatprep.subr.bf16.mxu0 %v2818_v32  ;;  %v2878_v32 = vld [vmem:[%s3606_s1 + $0x468] sm:$0xff]  }
  0x55   :  { %2562 = vmatpush3.bf16.msra.mxu1 %v2817_v31  ;;  %v2877_v31 = vld [vmem:[%s3606_s1 + $0x4b0] sm:$0xff]  }
  0x56   :  { %2563 = vmatprep.subr.bf16.mxu1 %v2820_v34  ;;  %v2880_v34 = vld [vmem:[%s3606_s1 + $0x4e8] sm:$0xff]  }
  0x57   :  { %2542 = vmatpush3.bf16.msra.mxu0 %v2819_v33  ;;  %v2879_v33 = vld [vmem:[%s3606_s1 + $0x428] sm:$0xff]  }
  0x58   :  { %2543 = vmatprep.subr.bf16.mxu0 %v2822_v36  ;;  %v2882_v36 = vld [vmem:[%s3606_s1 + $0x460] sm:$0xff]  }
  0x59   :  { %2564 = vmatpush3.bf16.msra.mxu1 %v2821_v35  ;;  %v2881_v35 = vld [vmem:[%s3606_s1 + $0x4a8] sm:$0xff]  }
  0x5a   :  { %2565 = vmatprep.subr.bf16.mxu1 %v2824_v38  ;;  %v2884_v38 = vld [vmem:[%s3606_s1 + $0x4e0] sm:$0xff]  }
  0x5b   :  { %2544 = vmatpush3.bf16.msra.mxu0 %v2823_v37  ;;  %v2883_v37 = vld [vmem:[%s3606_s1 + $0x420] sm:$0xff]  }
  0x5c   :  { %2545 = vmatprep.subr.bf16.mxu0 %v2826_v40  ;;  %v2886_v40 = vld [vmem:[%s3606_s1 + $0x458] sm:$0xff]  }
  0x5d   :  { %2566 = vmatpush3.bf16.msra.mxu1 %v2825_v39  ;;  %v2885_v39 = vld [vmem:[%s3606_s1 + $0x4a0] sm:$0xff]  }
  0x5e   :  { %2567 = vmatprep.subr.bf16.mxu1 %v2828_v42  ;;  %v2888_v42 = vld [vmem:[%s3606_s1 + $0x4d8] sm:$0xff]  }
  0x5f   :  { %2546 = vmatpush3.bf16.msra.mxu0 %v2827_v41  ;;  %v2887_v41 = vld [vmem:[%s3606_s1 + $0x418] sm:$0xff]  }
  0x60   :  { %2575 = vmatprep.subr.bf16.mxu0 %v2832_v47  ;;  %v2893_v47 = vld [vmem:[%s3606_s1 + $0x490] sm:$0xff]  }
  0x61   :  { %2568 = vmatpush3.bf16.msra.mxu1 %v2831_v46  ;;  %v2892_v46 = vld [vmem:[%s3606_s1 + $0x4d0] sm:$0xff]  }
  0x62   :  { %1887 = vmatmul.mubr.bf16.vlgmr.msra.gmra.mxu0 %v2229_v44  ;;  %2597 = vmatprep.subr.bf16.mxu1 %v2836_v52  ;;  %v2890_v44 = vld [vmem:[%s3606_s1 + $0x450] sm:$0xff]   ;;  %v2898_v52 = vld [vmem:[%s3606_s1 + $0x440] sm:$0xff]  }
  0x63   :  { %2576 = vmatpush3.bf16.msra.mxu0 %v2835_v51  ;;  %1966 = vmatprep.mubr.bf16.mxu0 %v2234_v19  ;;  %v2897_v51 = vld [vmem:[%s3606_s1 + $0x488] sm:$0xff]   ;;  %v2927_v19 = vld [vmem:[%s3606_s1 + $0x510] sm:$0xff]  }
  0x64   :  { %1927 = vmatmul.mubr.bf16.vlgmr.msra.gmra.mxu1 %v2231_v49  ;;  %2577 = vmatprep.subr.bf16.mxu0 %v2838_v54  ;;  %v2895_v49 = vld [vmem:[%s3606_s1 + $0x408] sm:$0xff]   ;;  %v2900_v54 = vld [vmem:[%s3606_s1 + $0x4c0] sm:$0xff]  }
  0x65   :  { %2598 = vmatpush3.bf16.msra.mxu1 %v2837_v53  ;;  %2006 = vmatprep.mubr.bf16.mxu1 %v2236_v24  ;;  %v2899_v53 = vld [vmem:[%s3606_s1 + $0x400] sm:$0xff]   ;;  %v2932_v24 = vld [vmem:[%s3606_s1 + $0x5c8] sm:$0xff]  }
  0x66   :  { %2599 = vmatprep.subr.bf16.mxu1 %v2840_v56 }
  0x67   :  { %2578 = vmatpush3.bf16.msra.mxu0 %v2839_v55  ;;  %v23_v55 = vld [vmem:[%s3607_s0 + $0x40] sm:$0xff] }
  0x68   :  { %2579 = vmatprep.subr.bf16.mxu0 %v2842_v58  ;;  %v2237_v56 = vcombine.low %v23_v55, %v23_v55  ;;  %v2903_v58 = vld [vmem:[%s3606_s1 + $0x480] sm:$0xff]  }
  0x69   :  { %2600 = vmatpush3.bf16.msra.mxu1 %v2841_v57  ;;  %v2238_v57 = vcombine.high %v23_v55, %v23_v55 }
  0x6a   :  { %2601 = vmatprep.subr.bf16.mxu1 %v2844_v60  ;;  %v24_v60 = vld [vmem:[%s3607_s0 + $0x48] sm:$0xff] }
  0x6b   :  { %2580 = vmatpush3.bf16.msra.mxu0 %v2843_v59  ;;  %v2904_v59 = vld [vmem:[%s3606_s1 + $0x578] sm:$0xff]  }
  0x6c   :  { %2581 = vmatprep.subr.bf16.mxu0 %v2846_v62  ;;  %v2240_v62 = vcombine.high %v24_v60, %v24_v60 }
  0x6d   :  { %2602 = vmatpush3.bf16.msra.mxu1 %v2845_v61  ;;  %v2239_v61 = vcombine.low %v24_v60, %v24_v60 }
  0x6e   :  { %2603 = vmatprep.subr.bf16.mxu1 %v2848_v0  ;;  %v2908_v0 = vld [vmem:[%s3606_s1 + $0x5f8] sm:$0xff]  }
  0x6f   :  { %2582 = vmatpush3.bf16.msra.mxu0 %v2847_v63  ;;  %v2907_v63 = vld [vmem:[%s3606_s1 + $0x538] sm:$0xff]  }
  0x70   :  { %2583 = vmatprep.subr.bf16.mxu0 %v2850_v2  ;;  %v2910_v2 = vld [vmem:[%s3606_s1 + $0x570] sm:$0xff]  }
  0x71   :  { %2604 = vmatpush3.bf16.msra.mxu1 %v2849_v1  ;;  %v2909_v1 = vld [vmem:[%s3606_s1 + $0x5b8] sm:$0xff]  }
  0x72   :  { %2605 = vmatprep.subr.bf16.mxu1 %v2852_v4  ;;  %v2912_v4 = vld [vmem:[%s3606_s1 + $0x5f0] sm:$0xff]  }
  0x73   :  { %2584 = vmatpush3.bf16.msra.mxu0 %v2851_v3  ;;  %v2911_v3 = vld [vmem:[%s3606_s1 + $0x530] sm:$0xff]  }
  0x74   :  { %2585 = vmatprep.subr.bf16.mxu0 %v2854_v6  ;;  %v2914_v6 = vld [vmem:[%s3606_s1 + $0x568] sm:$0xff]  }
  0x75   :  { %2606 = vmatpush3.bf16.msra.mxu1 %v2853_v5  ;;  %v2913_v5 = vld [vmem:[%s3606_s1 + $0x5b0] sm:$0xff]  }
  0x76   :  { %2607 = vmatprep.subr.bf16.mxu1 %v2856_v8  ;;  %v2916_v8 = vld [vmem:[%s3606_s1 + $0x5e8] sm:$0xff]  }
  0x77   :  { %2586 = vmatpush3.bf16.msra.mxu0 %v2855_v7  ;;  %v2915_v7 = vld [vmem:[%s3606_s1 + $0x528] sm:$0xff]  }
  0x78   :  { %2587 = vmatprep.subr.bf16.mxu0 %v2858_v10  ;;  %v2918_v10 = vld [vmem:[%s3606_s1 + $0x560] sm:$0xff]  }
  0x79   :  { %2608 = vmatpush3.bf16.msra.mxu1 %v2857_v9  ;;  %v2917_v9 = vld [vmem:[%s3606_s1 + $0x5a8] sm:$0xff]  }
  0x7a   :  { %2609 = vmatprep.subr.bf16.mxu1 %v2860_v12  ;;  %v2920_v12 = vld [vmem:[%s3606_s1 + $0x5e0] sm:$0xff]  }
  0x7b   :  { %2588 = vmatpush3.bf16.msra.mxu0 %v2859_v11  ;;  %v2919_v11 = vld [vmem:[%s3606_s1 + $0x520] sm:$0xff]  }
  0x7c   :  { %2589 = vmatprep.subr.bf16.mxu0 %v2862_v14  ;;  %v2922_v14 = vld [vmem:[%s3606_s1 + $0x558] sm:$0xff]  }
  0x7d   :  { %2610 = vmatpush3.bf16.msra.mxu1 %v2861_v13  ;;  %v2921_v13 = vld [vmem:[%s3606_s1 + $0x5a0] sm:$0xff]  }
  0x7e   :  { %2611 = vmatprep.subr.bf16.mxu1 %v2864_v16  ;;  %v2924_v16 = vld [vmem:[%s3606_s1 + $0x5d8] sm:$0xff]  }
  0x7f   :  { %2590 = vmatpush3.bf16.msra.mxu0 %v2863_v15  ;;  %v2923_v15 = vld [vmem:[%s3606_s1 + $0x518] sm:$0xff]  }
  0x80   :  { %2619 = vmatprep.subr.bf16.mxu0 %v2868_v21  ;;  %v2929_v21 = vld [vmem:[%s3606_s1 + $0x590] sm:$0xff]  }
  0x81   :  { %2612 = vmatpush3.bf16.msra.mxu1 %v2867_v20  ;;  %v2928_v20 = vld [vmem:[%s3606_s1 + $0x5d0] sm:$0xff]  }
  0x82   :  { %1967 = vmatmul.mubr.bf16.vlgmr.msra.gmra.mxu0 %v2233_v18  ;;  %2641 = vmatprep.subr.bf16.mxu1 %v2872_v26  ;;  %v2926_v18 = vld [vmem:[%s3606_s1 + $0x550] sm:$0xff]   ;;  %v2934_v26 = vld [vmem:[%s3606_s1 + $0x540] sm:$0xff]  }
  0x83   :  { %2620 = vmatpush3.bf16.msra.mxu0 %v2871_v25  ;;  %2046 = vmatprep.mubr.bf16.mxu0 %v2238_v57  ;;  %v2933_v25 = vld [vmem:[%s3606_s1 + $0x588] sm:$0xff]  }
  0x84   :  { %2007 = vmatmul.mubr.bf16.vlgmr.msra.gmra.mxu1 %v2235_v23  ;;  %2621 = vmatprep.subr.bf16.mxu0 %v2874_v28  ;;  %v2931_v23 = vld [vmem:[%s3606_s1 + $0x508] sm:$0xff]   ;;  %v2936_v28 = vld [vmem:[%s3606_s1 + $0x5c0] sm:$0xff]  }
  0x85   :  { %2642 = vmatpush3.bf16.msra.mxu1 %v2873_v27  ;;  %2086 = vmatprep.mubr.bf16.mxu1 %v2240_v62  ;;  %v2935_v27 = vld [vmem:[%s3606_s1 + $0x500] sm:$0xff]  }
  0x86   :  { %2643 = vmatprep.subr.bf16.mxu1 %v2876_v30 }
  0x87   :  { %2622 = vmatpush3.bf16.msra.mxu0 %v2875_v29  ;;  %v25_v29 = vld [vmem:[%s3607_s0 + $0x50] sm:$0xff] }
  0x88   :  { %2623 = vmatprep.subr.bf16.mxu0 %v2878_v32  ;;  %v2241_v30 = vcombine.low %v25_v29, %v25_v29  ;;  %v2939_v32 = vld [vmem:[%s3606_s1 + $0x580] sm:$0xff]  }
  0x89   :  { %2644 = vmatpush3.bf16.msra.mxu1 %v2877_v31  ;;  %v2242_v31 = vcombine.high %v25_v29, %v25_v29 }
  0x8a   :  { %2645 = vmatprep.subr.bf16.mxu1 %v2880_v34  ;;  %v2949_v34 = vmov 0.0  }
  0x8b   :  { %2624 = vmatpush3.bf16.msra.mxu0 %v2879_v33  ;;  %v26_v33 = vld [vmem:[%s3607_s0 + $0x58] sm:$0xff] }
  0x8c   :  { %2625 = vmatprep.subr.bf16.mxu0 %v2882_v36  ;;  %v2244_v36 = vcombine.high %v26_v33, %v26_v33 }
  0x8d   :  { %2646 = vmatpush3.bf16.msra.mxu1 %v2881_v35  ;;  %v2243_v35 = vcombine.low %v26_v33, %v26_v33 }
  0x8e   :  { %2647 = vmatprep.subr.bf16.mxu1 %v2884_v38  ;;  %v2943_v38 = vld [vmem:[%s3606_s1 + $0x610] sm:$0xff]  }
  0x8f   :  { %2626 = vmatpush3.bf16.msra.mxu0 %v2883_v37  ;;  %v2942_v37 = vld [vmem:[%s3606_s1 + $0x618] sm:$0xff]  }
  0x90   :  { %2627 = vmatprep.subr.bf16.mxu0 %v2886_v40  ;;  %v2945_v40 = vld [vmem:[%s3606_s1 + $0x600] sm:$0xff]  }
  0x91   :  { %2648 = vmatpush3.bf16.msra.mxu1 %v2885_v39  ;;  %v2944_v39 = vld [vmem:[%s3606_s1 + $0x608] sm:$0xff]  }
  0x92   :  { %2649 = vmatprep.subr.bf16.mxu1 %v2888_v42 }
  0x93   :  { %2628 = vmatpush3.bf16.msra.mxu0 %v2887_v41  ;;  %v2946_v41 = vld [vmem:[%s3607_s0 + $0x60] ss:$0 sps:$4 sm:$0xff]  }
  0x94   :  { %2629 = vmatprep.subr.bf16.mxu0 %v2890_v44 }
  0x95   :  { %2650 = vmatpush3.bf16.msra.mxu1 %v2889_v43  ;;  %v2220_v43 = vld [vmem:[%s3608_s2] ss:$0 sm:$0xff] }
  0x96   :  { %2651 = vmatprep.subr.bf16.mxu1 %v2892_v46 }
  0x97   :  { %2630 = vmatpush3.bf16.msra.mxu0 %v2891_v45 }
  0x98   :  { %2631 = vmatprep.subr.bf16.mxu0 %v2894_v48 }
  0x99   :  { %2652 = vmatpush3.bf16.msra.mxu1 %v2893_v47 }
  0x9a   :  { %2653 = vmatprep.subr.bf16.mxu1 %v2896_v50 }
  0x9b   :  { %2632 = vmatpush3.bf16.msra.mxu0 %v2895_v49 }
  0x9c   :  { %2633 = vmatprep.subr.bf16.mxu0 %v2898_v52 }
  0x9d   :  { %2654 = vmatpush3.bf16.msra.mxu1 %v2897_v51 }
  0x9e   :  { %2655 = vmatprep.subr.bf16.mxu1 %v2900_v54 }
  0x9f   :  { %2634 = vmatpush3.bf16.msra.mxu0 %v2899_v53 }
  0xa0   :  { %2663 = vmatprep.subr.bf16.mxu0 %v2904_v59 }
  0xa1   :  { %2656 = vmatpush3.bf16.msra.mxu1 %v2903_v58 }
  0xa2   :  { %2047 = vmatmul.mubr.bf16.vlgmr.msra.gmra.mxu0 %v2237_v56  ;;  %2685 = vmatprep.subr.bf16.mxu1 %v2908_v0 }
  0xa3   :  { %2664 = vmatpush3.bf16.msra.mxu0 %v2907_v63  ;;  %2126 = vmatprep.mubr.bf16.mxu0 %v2242_v31 }
  0xa4   :  { %2087 = vmatmul.mubr.bf16.vlgmr.msra.gmra.mxu1 %v2239_v61  ;;  %2665 = vmatprep.subr.bf16.mxu0 %v2910_v2 }
  0xa5   :  { %2686 = vmatpush3.bf16.msra.mxu1 %v2909_v1  ;;  %2166 = vmatprep.mubr.bf16.mxu1 %v2244_v36 }
  0xa6   :  { %2687 = vmatprep.subr.bf16.mxu1 %v2912_v4 }
  0xa7   :  { %2666 = vmatpush3.bf16.msra.mxu0 %v2911_v3 }
  0xa8   :  { %2667 = vmatprep.subr.bf16.mxu0 %v2914_v6 }
  0xa9   :  { %2688 = vmatpush3.bf16.msra.mxu1 %v2913_v5 }
  0xaa   :  { %2689 = vmatprep.subr.bf16.mxu1 %v2916_v8 }
  0xab   :  { %2668 = vmatpush3.bf16.msra.mxu0 %v2915_v7 }
  0xac   :  { %2669 = vmatprep.subr.bf16.mxu0 %v2918_v10 }
  0xad   :  { %2690 = vmatpush3.bf16.msra.mxu1 %v2917_v9 }
  0xae   :  { %2691 = vmatprep.subr.bf16.mxu1 %v2920_v12 }
  0xaf   :  { %2670 = vmatpush3.bf16.msra.mxu0 %v2919_v11 }
  0xb0   :  { %2671 = vmatprep.subr.bf16.mxu0 %v2922_v14 }
  0xb1   :  { %2692 = vmatpush3.bf16.msra.mxu1 %v2921_v13 }
  0xb2   :  { %2693 = vmatprep.subr.bf16.mxu1 %v2924_v16 }
  0xb3   :  { %2672 = vmatpush3.bf16.msra.mxu0 %v2923_v15 }
  0xb4   :  { %2673 = vmatprep.subr.bf16.mxu0 %v2926_v18 }
  0xb5   :  { %2694 = vmatpush3.bf16.msra.mxu1 %v2925_v17 }
  0xb6   :  { %2695 = vmatprep.subr.bf16.mxu1 %v2928_v20 }
  0xb7   :  { %2674 = vmatpush3.bf16.msra.mxu0 %v2927_v19 }
  0xb8   :  { %2675 = vmatprep.subr.bf16.mxu0 %v2930_v22 }
  0xb9   :  { %2696 = vmatpush3.bf16.msra.mxu1 %v2929_v21 }
  0xba   :  { %2697 = vmatprep.subr.bf16.mxu1 %v2932_v24 }
  0xbb   :  { %2676 = vmatpush3.bf16.msra.mxu0 %v2931_v23 }
  0xbc   :  { %2677 = vmatprep.subr.bf16.mxu0 %v2934_v26 }
  0xbd   :  { %2698 = vmatpush3.bf16.msra.mxu1 %v2933_v25 }
  0xbe   :  { %2699 = vmatprep.subr.bf16.mxu1 %v2936_v28 }
  0xbf   :  { %2678 = vmatpush3.bf16.msra.mxu0 %v2935_v27 }
  0xc0   :  { %2712 = vmatprep.subr.bf16.mxu0 %v2949_v34 }
  0xc1   :  { %2700 = vmatpush3.bf16.msra.mxu1 %v2939_v32 }
  0xc2   :  { %2127 = vmatmul.mubr.bf16.vlgmr.msra.gmra.mxu0 %v2241_v30 }
  0xc3   :  { %2713 = vmatpush3.bf16.msra.mxu0 %v2942_v37  ;;  %2720 = vmatprep.mubr.msk.bf16.mxu0 %vm2950_vm0, %v2949_v34 }
  0xc4   :  { %2167 = vmatmul.mubr.bf16.vlgmr.msra.gmra.mxu1 %v2243_v35  ;;  %2714 = vmatprep.subr.bf16.mxu0 %v2949_v34 }
  0xc7   :  { %2715 = vmatpush3.bf16.msra.mxu0 %v2943_v38 }
  0xc8   :  { %2716 = vmatprep.subr.bf16.mxu0 %v2949_v34 }
  0xcb   :  { %2717 = vmatpush3.bf16.msra.mxu0 %v2944_v39 }
  0xcc   :  { %2718 = vmatprep.subr.bf16.mxu0 %v2949_v34 }
  0xcf   :  { %2719 = vmatpush3.bf16.msra.mxu0 %v2945_v40 }
  0xd2   :  { %2721 = vmatmul.mubr.msk.bf16.vlgmr.msra.gmra.mxu0 %vm1690_vm1, %v2946_v41 }
  0xe2   :  { %v2459_v42 = vpop.f32.mrf.mxu0 }
  0xe4   :  { %v2460_v44 = vpop.f32.mrf.mxu0  ;;  %v2481_v45 = vpop.f32.mrf.mxu1 }
  0xe5   :  { %v2461_v46 = vadd.f32 %v2460_v44, %v2459_v42 }
  0xe6   :  { %v2462_v47 = vpop.f32.mrf.mxu0  ;;  %v2482_v48 = vpop.f32.mrf.mxu1 }
  0xe7   :  { %v1729_v49 = vadd.f32 %v2461_v46, %v2220_v43  ;;  %v2483_v50 = vadd.f32 %v2482_v48, %v2481_v45 }
  0xe8   :  { %v2463_v51 = vpop.f32.mrf.mxu0  ;;  %v2484_v52 = vpop.f32.mrf.mxu1 }
  0xe9   :  { %v1769_v53 = vadd.f32 %v2483_v50, %v1729_v49 }
  0xea   :  { %v2485_v54 = vpop.f32.mrf.mxu1 }
 0x102   :  { %v2503_v55 = vpop.f32.mrf.mxu0 }
 0x104   :  { %v2504_v56 = vpop.f32.mrf.mxu0  ;;  %v2525_v58 = vpop.f32.mrf.mxu1 }
 0x105   :  { %v2505_v57 = vadd.f32 %v2504_v56, %v2503_v55 }
 0x106   :  { %v2506_v59 = vpop.f32.mrf.mxu0  ;;  %v2526_v61 = vpop.f32.mrf.mxu1 }
 0x107   :  { %v1809_v60 = vadd.f32 %v2505_v57, %v1769_v53  ;;  %v2527_v62 = vadd.f32 %v2526_v61, %v2525_v58 }
 0x108   :  { %v2507_v63 = vpop.f32.mrf.mxu0  ;;  %v2528_v0 = vpop.f32.mrf.mxu1 }
 0x109   :  { %v1849_v1 = vadd.f32 %v2527_v62, %v1809_v60 }
 0x10a   :  { %v2529_v2 = vpop.f32.mrf.mxu1 }
 0x122   :  { %v2547_v3 = vpop.f32.mrf.mxu0 }
 0x124   :  { %v2548_v4 = vpop.f32.mrf.mxu0  ;;  %v2569_v5 = vpop.f32.mrf.mxu1 }
 0x125   :  { %v2549_v6 = vadd.f32 %v2548_v4, %v2547_v3 }
 0x126   :  { %v2550_v7 = vpop.f32.mrf.mxu0  ;;  %v2570_v8 = vpop.f32.mrf.mxu1 }
 0x127   :  { %v1889_v9 = vadd.f32 %v2549_v6, %v1849_v1  ;;  %v2571_v10 = vadd.f32 %v2570_v8, %v2569_v5 }
 0x128   :  { %v2551_v11 = vpop.f32.mrf.mxu0  ;;  %v2572_v12 = vpop.f32.mrf.mxu1 }
 0x129   :  { %v1929_v13 = vadd.f32 %v2571_v10, %v1889_v9 }
 0x12a   :  { %v2573_v14 = vpop.f32.mrf.mxu1 }
 0x142   :  { %v2591_v15 = vpop.f32.mrf.mxu0 }
 0x144   :  { %v2592_v16 = vpop.f32.mrf.mxu0  ;;  %v2613_v17 = vpop.f32.mrf.mxu1 }
 0x145   :  { %v2593_v18 = vadd.f32 %v2592_v16, %v2591_v15 }
 0x146   :  { %v2594_v19 = vpop.f32.mrf.mxu0  ;;  %v2614_v20 = vpop.f32.mrf.mxu1 }
 0x147   :  { %v1969_v21 = vadd.f32 %v2593_v18, %v1929_v13  ;;  %v2615_v22 = vadd.f32 %v2614_v20, %v2613_v17 }
 0x148   :  { %v2595_v23 = vpop.f32.mrf.mxu0  ;;  %v2616_v24 = vpop.f32.mrf.mxu1 }
 0x149   :  { %v2009_v25 = vadd.f32 %v2615_v22, %v1969_v21 }
 0x14a   :  { %v2617_v26 = vpop.f32.mrf.mxu1 }
 0x162   :  { %v2635_v27 = vpop.f32.mrf.mxu0 }
 0x164   :  { %v2636_v28 = vpop.f32.mrf.mxu0  ;;  %v2657_v29 = vpop.f32.mrf.mxu1 }
 0x165   :  { %v2637_v36 = vadd.f32 %v2636_v28, %v2635_v27 }
 0x166   :  { %v2638_v30 = vpop.f32.mrf.mxu0  ;;  %v2658_v31 = vpop.f32.mrf.mxu1 }
 0x167   :  { %v2049_v41 = vadd.f32 %v2637_v36, %v2009_v25  ;;  %v2659_v42 = vadd.f32 %v2658_v31, %v2657_v29 }
 0x168   :  { %v2639_v32 = vpop.f32.mrf.mxu0  ;;  %v2660_v33 = vpop.f32.mrf.mxu1 }
 0x169   :  { %v2089_v47 = vadd.f32 %v2659_v42, %v2049_v41 }
 0x16a   :  { %v2661_v34 = vpop.f32.mrf.mxu1 }
 0x182   :  { %v2679_v35 = vpop.f32.mrf.mxu0 }
 0x184   :  { %v2680_v37 = vpop.f32.mrf.mxu0  ;;  %v2701_v38 = vpop.f32.mrf.mxu1 }
 0x185   :  { %v2681_v45 = vadd.f32 %v2680_v37, %v2679_v35 }
 0x186   :  { %v2682_v39 = vpop.f32.mrf.mxu0  ;;  %v2702_v40 = vpop.f32.mrf.mxu1 }
 0x187   :  { %v2129_v48 = vadd.f32 %v2681_v45, %v2089_v47  ;;  %v2703_v49 = vadd.f32 %v2702_v40, %v2701_v38 }
 0x188   :  { %v2683_v43 = vpop.f32.mrf.mxu0  ;;  %v2704_v44 = vpop.f32.mrf.mxu1 }
 0x189   :  { %v2169_v50 = vadd.f32 %v2703_v49, %v2129_v48 }
 0x18a   :  { %v2705_v46 = vpop.f32.mrf.mxu1 }
 0x192   :  { %v2208_v51 = vpop.f32.mrf.mxu0 }
 0x193   :  { %v2209_v52 = vadd.f32 %v2208_v51, %v2169_v50 }
 0x194   :  { %v2722_v53 = vpop.f32.mrf.mxu0 }
 0x195   :  { %2947 = vtanh.f32 %v2209_v52 }
 0x196   :  { %v2211_v54 = vpop.f32.mrf.mxu0 }
 0x198   :  { %v2723_v55 = vpop.f32.mrf.mxu0 }
 0x1a2   :  { %v2948_v56 = vpop.eup %2947 }
 0x1a3   :  { %2215 = vst.msk [vmem:[%s3609_s3] sm:$0xff] %vm1690_vm1, %v2948_v56 }

</bundles_post_ra>
